<compile_context>
chip_gen: v6e
topology: v6e:2x2x1
jax: 0.10.0
libtpu: 0.0.40
codegen_flags: <defaults>
</compile_context>

<pallas_src>
import functools
import math

import jax
import jax.numpy as jnp
import numpy as np
from jax.experimental import pallas as pl
from jax.experimental.pallas import tpu as pltpu

# ----------------------------- config (small, synthetic) -----------------------------
D_MODEL = 32
NHEAD = 4
HEAD_DIM = D_MODEL // NHEAD
NUM_ENCODER_LAYERS = 2
NUM_DECODER_LAYERS = 2
DIM_FEEDFORWARD = 64
MAX_SEQ_LENGTH = 16
DROPOUT = 0.0  # identity (inference)
LN_EPS = 1e-5
LANES = 128

VMEM_SPEC = pl.BlockSpec(memory_space=pltpu.MemorySpace.VMEM)


# ----------------------------- slab layouts (shared by pack + kernel) -----------------------------
def _build_layouts():
    D, FF = D_MODEL, DIM_FEEDFORWARD
    mat_entries = []
    for l in range(NUM_ENCODER_LAYERS):
        mat_entries += [(f"e{l}_qkv", D, 3 * D), (f"e{l}_o", D, D),
                        (f"e{l}_w1", D, FF), (f"e{l}_w2", FF, D)]
    for l in range(NUM_DECODER_LAYERS):
        mat_entries += [(f"d{l}_sqkv", D, 3 * D), (f"d{l}_so", D, D),
                        (f"d{l}_cq", D, D), (f"d{l}_ckv", D, 2 * D),
                        (f"d{l}_co", D, D),
                        (f"d{l}_w1", D, FF), (f"d{l}_w2", FF, D)]
    # 2-row emb_w placed last so every block's row offset stays a multiple of 8.
    mat_entries += [("out_w", D, 2), ("emb_w", 2, D)]
    mat_layout, off = {}, 0
    for name, rows, cols in mat_entries:
        mat_layout[name] = (off, rows, cols)
        off += rows
    mat_rows = ((off + 7) // 8) * 8

    vec_entries = []
    for l in range(NUM_ENCODER_LAYERS):
        vec_entries += [(f"e{l}_qkv_b", 3 * D), (f"e{l}_o_b", D),
                        (f"e{l}_b1", FF), (f"e{l}_b2", D),
                        (f"e{l}_ln1_g", D), (f"e{l}_ln1_b", D),
                        (f"e{l}_ln2_g", D), (f"e{l}_ln2_b", D)]
    vec_entries += [("e_fin_g", D), ("e_fin_b", D)]
    for l in range(NUM_DECODER_LAYERS):
        vec_entries += [(f"d{l}_sqkv_b", 3 * D), (f"d{l}_so_b", D),
                        (f"d{l}_cq_b", D), (f"d{l}_ckv_b", 2 * D),
                        (f"d{l}_co_b", D),
                        (f"d{l}_b1", FF), (f"d{l}_b2", D),
                        (f"d{l}_ln1_g", D), (f"d{l}_ln1_b", D),
                        (f"d{l}_ln2_g", D), (f"d{l}_ln2_b", D),
                        (f"d{l}_ln3_g", D), (f"d{l}_ln3_b", D)]
    vec_entries += [("out_b", 2)]
    vec_layout = {name: (i, cols) for i, (name, cols) in enumerate(vec_entries)}
    return mat_layout, mat_rows, vec_layout, len(vec_entries)


MAT_LAYOUT, MAT_ROWS, VEC_LAYOUT, NUM_VECS = _build_layouts()


# ----------------------------- the fused Pallas kernel -----------------------------
def _fused_transformer_kernel(src_ref, tgt_ref, pe_src_ref, pe_tgt_ref,
                              wmat_ref, wvec_ref, o_ref, *, B, Ss, St):
    D, H, dh = D_MODEL, NHEAD, HEAD_DIM
    Ms, Mt = B * Ss, B * St

    def W(name):
        off, rows, cols = MAT_LAYOUT[name]
        return wmat_ref[off:off + rows, 0:cols]           # 8-row-aligned static slice

    def V(name):
        idx, cols = VEC_LAYOUT[name]
        return wvec_ref[idx][:, 0:cols]                   # (1, cols)

    # --- batch-block-diagonal (+ causal) additive masks, built in-kernel ---
    def block_mask(Mq, Mk, Sq, Sk, causal):
        qi = jax.lax.broadcasted_iota(jnp.int32, (Mq, Mk), 0)
        kj = jax.lax.broadcasted_iota(jnp.int32, (Mq, Mk), 1)
        ok = None
        for b in range(B):
            blk = ((qi >= b * Sq) & (qi < (b + 1) * Sq) &
                   (kj >= b * Sk) & (kj < (b + 1) * Sk))
            ok = blk if ok is None else (ok | blk)
        if causal:
            assert Sq == Sk  # decoder self-attention only
            ok = ok & (kj <= qi)
        return jnp.where(ok, 0.0, -1e9).astype(jnp.float32)

    enc_mask = block_mask(Ms, Ms, Ss, Ss, False)
    dec_mask = block_mask(Mt, Mt, St, St, True)    # generate_square_subsequent_mask
    crs_mask = block_mask(Mt, Ms, St, Ss, False)

    def layernorm(x, g, b):
        mu = jnp.mean(x, axis=-1, keepdims=True)
        xc = x - mu
        var = jnp.mean(xc * xc, axis=-1, keepdims=True)
        return xc * jax.lax.rsqrt(var + LN_EPS) * g + b

    def mm(x, w, b):
        return jnp.dot(x, w, preferred_element_type=jnp.float32) + b

    def attention(q, k, v, mask):
        # q: (Mq, D) with 1/sqrt(dh) pre-folded; k, v: (Mk, D).
        heads = []
        for h in range(H):
            sl = slice(h * dh, (h + 1) * dh)
            s = jax.lax.dot_general(q[:, sl], k[:, sl],
                                    (((1,), (1,)), ((), ())),
                                    preferred_element_type=jnp.float32) + mask
            s = s - jnp.max(s, axis=-1, keepdims=True)
            p = jnp.exp(s)
            p = p / jnp.sum(p, axis=-1, keepdims=True)     # exact softmax (no approx recip)
            heads.append(jnp.dot(p, v[:, sl], preferred_element_type=jnp.float32))
        # lane-concat heads -> single (M,D)@(D,D) output projection by the caller.
        return jnp.concatenate(heads, axis=-1)

    def ffn(x, pfx):
        h1 = jnp.maximum(mm(x, W(f"{pfx}_w1"), V(f"{pfx}_b1")), 0.0)
        return mm(h1, W(f"{pfx}_w2"), V(f"{pfx}_b2"))

    # --- coord embedding + positional encoding (emb bias pre-folded into PE) ---
    emb_w = W("emb_w")                                     # (2, D)
    src_e = jnp.dot(src_ref[...], emb_w, preferred_element_type=jnp.float32) + pe_src_ref[...]
    tgt_e = jnp.dot(tgt_ref[...], emb_w, preferred_element_type=jnp.float32) + pe_tgt_ref[...]

    # ---------------- encoder (post-norm) ----------------
    mem = src_e
    for l in range(NUM_ENCODER_LAYERS):
        pfx = f"e{l}"
        qkv = mm(mem, W(f"{pfx}_qkv"), V(f"{pfx}_qkv_b"))               # (Ms, 3D)
        att = attention(qkv[:, 0:D], qkv[:, D:2 * D], qkv[:, 2 * D:3 * D], enc_mask)
        sa = mm(att, W(f"{pfx}_o"), V(f"{pfx}_o_b"))
        mem = layernorm(mem + sa, V(f"{pfx}_ln1_g"), V(f"{pfx}_ln1_b"))
        ff = ffn(mem, pfx)
        mem = layernorm(mem + ff, V(f"{pfx}_ln2_g"), V(f"{pfx}_ln2_b"))
    mem = layernorm(mem, V("e_fin_g"), V("e_fin_b"))

    # ---------------- decoder (post-norm) ----------------
    x = tgt_e
    for l in range(NUM_DECODER_LAYERS):
        pfx = f"d{l}"
        qkv = mm(x, W(f"{pfx}_sqkv"), V(f"{pfx}_sqkv_b"))               # (Mt, 3D)
        att = attention(qkv[:, 0:D], qkv[:, D:2 * D], qkv[:, 2 * D:3 * D], dec_mask)
        sa = mm(att, W(f"{pfx}_so"), V(f"{pfx}_so_b"))
        x = layernorm(x + sa, V(f"{pfx}_ln1_g"), V(f"{pfx}_ln1_b"))
        q = mm(x, W(f"{pfx}_cq"), V(f"{pfx}_cq_b"))                     # (Mt, D), pre-scaled
        kv = mm(mem, W(f"{pfx}_ckv"), V(f"{pfx}_ckv_b"))                # (Ms, 2D)
        att = attention(q, kv[:, 0:D], kv[:, D:2 * D], crs_mask)
        ca = mm(att, W(f"{pfx}_co"), V(f"{pfx}_co_b"))
        x = layernorm(x + ca, V(f"{pfx}_ln2_g"), V(f"{pfx}_ln2_b"))
        ff = ffn(x, pfx)
        x = layernorm(x + ff, V(f"{pfx}_ln3_g"), V(f"{pfx}_ln3_b"))

    # final decoder LayerNorm: normalization here, affine folded into out head at pack time
    mu = jnp.mean(x, axis=-1, keepdims=True)
    xc = x - mu
    var = jnp.mean(xc * xc, axis=-1, keepdims=True)
    x_hat = xc * jax.lax.rsqrt(var + LN_EPS)
    out = jnp.dot(x_hat, W("out_w"), preferred_element_type=jnp.float32) + V("out_b")
    o_ref[...] = out.astype(o_ref.dtype)


# ----------------------------- host-side glue -----------------------------
def positional_encoding(max_len, d_model):
    position = jnp.arange(max_len, dtype=jnp.float32)[:, None]
    div_term = jnp.exp(jnp.arange(0, d_model, 2, dtype=jnp.float32)
                       * (-math.log(10000.0) / d_model))
    ang = position * div_term
    pe = jnp.stack([jnp.sin(ang), jnp.cos(ang)], axis=-1).reshape(max_len, d_model)
    return pe                                              # [:,0::2]=sin, [:,1::2]=cos


def pack_params(params, batch_size, src_len, tgt_len):
    """One-time transform of PyTorch-layout params into 2 lane-dense VMEM slabs
    (plus pre-tiled positional encodings with the embedding bias folded in)."""
    D = D_MODEL
    scale = 1.0 / math.sqrt(HEAD_DIM)

    wmat = np.zeros((MAT_ROWS, LANES), np.float32)
    wvec = np.zeros((NUM_VECS, 1, LANES), np.float32)

    def put_m(name, m):
        off, rows, cols = MAT_LAYOUT[name]
        m = np.asarray(m, np.float32)
        assert m.shape == (rows, cols), (name, m.shape, (rows, cols))
        wmat[off:off + rows, :cols] = m

    def put_v(name, v):
        idx, cols = VEC_LAYOUT[name]
        v = np.asarray(v, np.float32).reshape(-1)
        assert v.shape == (cols,), (name, v.shape, cols)
        wvec[idx, 0, :cols] = v

    emb_wT = np.asarray(params["emb_w"], np.float32).T          # (2, D)
    emb_b = np.asarray(params["emb_b"], np.float32)             # (D,)
    put_m("emb_w", emb_wT)

    def pack_self_attn(prefix, attn):
        in_w = np.asarray(attn["in_w"], np.float32)             # (3D, D)
        in_b = np.asarray(attn["in_b"], np.float32)             # (3D,)
        wqkv = in_w.T.copy()                                    # cols [0:D]=Wq^T|Wk^T|Wv^T
        bqkv = in_b.copy()
        wqkv[:, :D] *= scale                                    # fold 1/sqrt(dh) into Q
        bqkv[:D] *= scale
        put_m(f"{prefix}", wqkv)
        put_v(f"{prefix}_b", bqkv)

    # encoder layers
    for l, lp in enumerate(params["enc_layers"]):
        pack_self_attn(f"e{l}_qkv", lp["self_attn"])
        put_m(f"e{l}_o", np.asarray(lp["self_attn"]["out_w"], np.float32).T)
        put_v(f"e{l}_o_b", lp["self_attn"]["out_b"])
        put_m(f"e{l}_w1", np.asarray(lp["lin1_w"], np.float32).T)
        put_v(f"e{l}_b1", lp["lin1_b"])
        put_m(f"e{l}_w2", np.asarray(lp["lin2_w"], np.float32).T)
        put_v(f"e{l}_b2", lp["lin2_b"])
        put_v(f"e{l}_ln1_g", lp["norm1_g"]); put_v(f"e{l}_ln1_b", lp["norm1_b"])
        put_v(f"e{l}_ln2_g", lp["norm2_g"]); put_v(f"e{l}_ln2_b", lp["norm2_b"])
    put_v("e_fin_g", params["enc_norm_g"]); put_v("e_fin_b", params["enc_norm_b"])

    # decoder layers
    for l, lp in enumerate(params["dec_layers"]):
        pack_self_attn(f"d{l}_sqkv", lp["self_attn"])
        put_m(f"d{l}_so", np.asarray(lp["self_attn"]["out_w"], np.float32).T)
        put_v(f"d{l}_so_b", lp["self_attn"]["out_b"])
        cin_w = np.asarray(lp["cross_attn"]["in_w"], np.float32)
        cin_b = np.asarray(lp["cross_attn"]["in_b"], np.float32)
        put_m(f"d{l}_cq", cin_w[:D].T * scale)                  # query proj (scaled)
        put_v(f"d{l}_cq_b", cin_b[:D] * scale)
        put_m(f"d{l}_ckv", cin_w[D:].T)                         # (D, 2D): K|V of memory
        put_v(f"d{l}_ckv_b", cin_b[D:])
        put_m(f"d{l}_co", np.asarray(lp["cross_attn"]["out_w"], np.float32).T)
        put_v(f"d{l}_co_b", lp["cross_attn"]["out_b"])
        put_m(f"d{l}_w1", np.asarray(lp["lin1_w"], np.float32).T)
        put_v(f"d{l}_b1", lp["lin1_b"])
        put_m(f"d{l}_w2", np.asarray(lp["lin2_w"], np.float32).T)
        put_v(f"d{l}_b2", lp["lin2_b"])
        put_v(f"d{l}_ln1_g", lp["norm1_g"]); put_v(f"d{l}_ln1_b", lp["norm1_b"])
        put_v(f"d{l}_ln2_g", lp["norm2_g"]); put_v(f"d{l}_ln2_b", lp["norm2_b"])
        put_v(f"d{l}_ln3_g", lp["norm3_g"]); put_v(f"d{l}_ln3_b", lp["norm3_b"])

    # output head with the final decoder LayerNorm affine folded in:
    # (x_hat*g + b) @ Wout^T + b_out == x_hat @ (diag(g) Wout^T) + (b @ Wout^T + b_out)
    out_wT = np.asarray(params["out_w"], np.float32).T          # (D, 2)
    out_b = np.asarray(params["out_b"], np.float32)             # (2,)
    g = np.asarray(params["dec_norm_g"], np.float32)
    bln = np.asarray(params["dec_norm_b"], np.float32)
    put_m("out_w", out_wT * g[:, None])
    put_v("out_b", bln @ out_wT + out_b)

    # positional encodings: pre-tiled per batch, embedding bias folded in (pack time)
    pe = np.asarray(positional_encoding(MAX_SEQ_LENGTH, D), np.float32)
    pe_src = np.tile(pe[:src_len], (batch_size, 1)) + emb_b[None, :]
    pe_tgt = np.tile(pe[:tgt_len], (batch_size, 1)) + emb_b[None, :]

    return {"wmat": jnp.asarray(wmat), "wvec": jnp.asarray(wvec),
            "pe_src": jnp.asarray(pe_src), "pe_tgt": jnp.asarray(pe_tgt)}


@jax.jit
def circle_transformer_forward(packed, src, tgt):
    """src, tgt: (B, S, 2) float32 -> (B, S_tgt, 2). Single fused, gridless pallas_call."""
    B, Ss, _ = src.shape
    St = tgt.shape[1]
    kernel = functools.partial(_fused_transformer_kernel, B=B, Ss=Ss, St=St)
    out2d = pl.pallas_call(
        kernel,
        out_shape=jax.ShapeDtypeStruct((B * St, 2), jnp.float32),
        in_specs=[VMEM_SPEC] * 6,
        out_specs=VMEM_SPEC,
    )(src.reshape(B * Ss, 2), tgt.reshape(B * St, 2),
      packed["pe_src"], packed["pe_tgt"], packed["wmat"], packed["wvec"])
    return out2d.reshape(B, St, 2)


# ----------------------------- deterministic parameter init (PyTorch layout) -----------------------------
def _w(key, shape, scale=0.02):
    return (scale * jax.random.normal(key, shape)).astype(jnp.float32)


def init_mha(key, d):
    k1, k2 = jax.random.split(key)
    return {"in_w": _w(k1, (3 * d, d)), "in_b": jnp.zeros((3 * d,), jnp.float32),
            "out_w": _w(k2, (d, d)), "out_b": jnp.zeros((d,), jnp.float32)}


def init_enc_layer(key, d, ff):
    k1, k2, k3 = jax.random.split(key, 3)
    return {"self_attn": init_mha(k1, d),
            "lin1_w": _w(k2, (ff, d)), "lin1_b": jnp.zeros((ff,), jnp.float32),
            "lin2_w": _w(k3, (d, ff)), "lin2_b": jnp.zeros((d,), jnp.float32),
            "norm1_g": jnp.ones((d,), jnp.float32), "norm1_b": jnp.zeros((d,), jnp.float32),
            "norm2_g": jnp.ones((d,), jnp.float32), "norm2_b": jnp.zeros((d,), jnp.float32)}


def init_dec_layer(key, d, ff):
    k1, k2, k3, k4 = jax.random.split(key, 4)
    return {"self_attn": init_mha(k1, d), "cross_attn": init_mha(k2, d),
            "lin1_w": _w(k3, (ff, d)), "lin1_b": jnp.zeros((ff,), jnp.float32),
            "lin2_w": _w(k4, (d, ff)), "lin2_b": jnp.zeros((d,), jnp.float32),
            "norm1_g": jnp.ones((d,), jnp.float32), "norm1_b": jnp.zeros((d,), jnp.float32),
            "norm2_g": jnp.ones((d,), jnp.float32), "norm2_b": jnp.zeros((d,), jnp.float32),
            "norm3_g": jnp.ones((d,), jnp.float32), "norm3_b": jnp.zeros((d,), jnp.float32)}


def init_params(key):
    keys = jax.random.split(key, 3 + NUM_ENCODER_LAYERS + NUM_DECODER_LAYERS)
    return {
        "emb_w": _w(keys[0], (D_MODEL, 2)), "emb_b": jnp.zeros((D_MODEL,), jnp.float32),
        "out_w": _w(keys[1], (2, D_MODEL)), "out_b": jnp.zeros((2,), jnp.float32),
        "enc_norm_g": jnp.ones((D_MODEL,), jnp.float32),
        "enc_norm_b": jnp.zeros((D_MODEL,), jnp.float32),
        "dec_norm_g": jnp.ones((D_MODEL,), jnp.float32),
        "dec_norm_b": jnp.zeros((D_MODEL,), jnp.float32),
        "enc_layers": [init_enc_layer(keys[3 + i], D_MODEL, DIM_FEEDFORWARD)
                       for i in range(NUM_ENCODER_LAYERS)],
        "dec_layers": [init_dec_layer(keys[3 + NUM_ENCODER_LAYERS + i], D_MODEL, DIM_FEEDFORWARD)
                       for i in range(NUM_DECODER_LAYERS)],
    }


# ----------------------------- run -----------------------------
if __name__ == "__main__":
    key = jax.random.PRNGKey(0)
    kp, ks, kt = jax.random.split(key, 3)

    params = init_params(kp)

    B, S = 2, 8
    packed = pack_params(params, batch_size=B, src_len=S, tgt_len=S)

    src = jax.random.normal(ks, (B, S, 2), dtype=jnp.float32)
    tgt = jax.random.normal(kt, (B, S, 2), dtype=jnp.float32)

    out = jax.block_until_ready(circle_transformer_forward(packed, src, tgt))

    assert out.shape == (B, S, 2), out.shape
    assert bool(jnp.all(jnp.isfinite(out)))
    print("KERNEL_OK")
</pallas_src>

<mosaic_0001>
module attributes {stable_mosaic.version = 11 : i64} {
  func.func @_fused_transformer_kernel(%arg0: memref<16x2xf32, #tpu.memory_space<vmem>>, %arg1: memref<16x2xf32, #tpu.memory_space<vmem>>, %arg2: memref<16x32xf32, #tpu.memory_space<vmem>>, %arg3: memref<16x32xf32, #tpu.memory_space<vmem>>, %arg4: memref<872x128xf32, #tpu.memory_space<vmem>>, %arg5: memref<45x1x128xf32, #tpu.memory_space<vmem>>, %arg6: memref<16x2xf32, #tpu.memory_space<vmem>>) attributes {dimension_semantics = [], scalar_prefetch = 0 : i64, scratch_operands = 0 : i64, tpu.core_type = #tpu.core_type<tc>} {
    %0 = tpu.iota {dimensions = array<i32: 0>} : vector<16x16xi32>
    %1 = tpu.iota {dimensions = array<i32: 1>} : vector<16x16xi32>
    %c0_i32 = arith.constant 0 : i32
    %2 = vector.broadcast %c0_i32 : i32 to vector<16x16xi32>
    %3 = arith.cmpi sge, %0, %2 : vector<16x16xi32>
    %c8_i32 = arith.constant 8 : i32
    %4 = vector.broadcast %c8_i32 : i32 to vector<16x16xi32>
    %5 = arith.cmpi slt, %0, %4 : vector<16x16xi32>
    %6 = arith.andi %3, %5 : vector<16x16xi1>
    %c0_i32_0 = arith.constant 0 : i32
    %7 = vector.broadcast %c0_i32_0 : i32 to vector<16x16xi32>
    %8 = arith.cmpi sge, %1, %7 : vector<16x16xi32>
    %9 = arith.andi %6, %8 : vector<16x16xi1>
    %c8_i32_1 = arith.constant 8 : i32
    %10 = vector.broadcast %c8_i32_1 : i32 to vector<16x16xi32>
    %11 = arith.cmpi slt, %1, %10 : vector<16x16xi32>
    %12 = arith.andi %9, %11 : vector<16x16xi1>
    %c8_i32_2 = arith.constant 8 : i32
    %13 = vector.broadcast %c8_i32_2 : i32 to vector<16x16xi32>
    %14 = arith.cmpi sge, %0, %13 : vector<16x16xi32>
    %c16_i32 = arith.constant 16 : i32
    %15 = vector.broadcast %c16_i32 : i32 to vector<16x16xi32>
    %16 = arith.cmpi slt, %0, %15 : vector<16x16xi32>
    %17 = arith.andi %14, %16 : vector<16x16xi1>
    %c8_i32_3 = arith.constant 8 : i32
    %18 = vector.broadcast %c8_i32_3 : i32 to vector<16x16xi32>
    %19 = arith.cmpi sge, %1, %18 : vector<16x16xi32>
    %20 = arith.andi %17, %19 : vector<16x16xi1>
    %c16_i32_4 = arith.constant 16 : i32
    %21 = vector.broadcast %c16_i32_4 : i32 to vector<16x16xi32>
    %22 = arith.cmpi slt, %1, %21 : vector<16x16xi32>
    %23 = arith.andi %20, %22 : vector<16x16xi1>
    %24 = arith.ori %12, %23 : vector<16x16xi1>
    %cst = arith.constant 0.000000e+00 : f32
    %cst_5 = arith.constant -1.000000e+09 : f32
    %25 = vector.broadcast %cst : f32 to vector<16x16xf32>
    %26 = vector.broadcast %cst_5 : f32 to vector<16x16xf32>
    %27 = arith.select %24, %25, %26 : vector<16x16xi1>, vector<16x16xf32>
    %28 = tpu.iota {dimensions = array<i32: 0>} : vector<16x16xi32>
    %29 = tpu.iota {dimensions = array<i32: 1>} : vector<16x16xi32>
    %c0_i32_6 = arith.constant 0 : i32
    %30 = vector.broadcast %c0_i32_6 : i32 to vector<16x16xi32>
    %31 = arith.cmpi sge, %28, %30 : vector<16x16xi32>
    %c8_i32_7 = arith.constant 8 : i32
    %32 = vector.broadcast %c8_i32_7 : i32 to vector<16x16xi32>
    %33 = arith.cmpi slt, %28, %32 : vector<16x16xi32>
    %34 = arith.andi %31, %33 : vector<16x16xi1>
    %c0_i32_8 = arith.constant 0 : i32
    %35 = vector.broadcast %c0_i32_8 : i32 to vector<16x16xi32>
    %36 = arith.cmpi sge, %29, %35 : vector<16x16xi32>
    %37 = arith.andi %34, %36 : vector<16x16xi1>
    %c8_i32_9 = arith.constant 8 : i32
    %38 = vector.broadcast %c8_i32_9 : i32 to vector<16x16xi32>
    %39 = arith.cmpi slt, %29, %38 : vector<16x16xi32>
    %40 = arith.andi %37, %39 : vector<16x16xi1>
    %c8_i32_10 = arith.constant 8 : i32
    %41 = vector.broadcast %c8_i32_10 : i32 to vector<16x16xi32>
    %42 = arith.cmpi sge, %28, %41 : vector<16x16xi32>
    %c16_i32_11 = arith.constant 16 : i32
    %43 = vector.broadcast %c16_i32_11 : i32 to vector<16x16xi32>
    %44 = arith.cmpi slt, %28, %43 : vector<16x16xi32>
    %45 = arith.andi %42, %44 : vector<16x16xi1>
    %c8_i32_12 = arith.constant 8 : i32
    %46 = vector.broadcast %c8_i32_12 : i32 to vector<16x16xi32>
    %47 = arith.cmpi sge, %29, %46 : vector<16x16xi32>
    %48 = arith.andi %45, %47 : vector<16x16xi1>
    %c16_i32_13 = arith.constant 16 : i32
    %49 = vector.broadcast %c16_i32_13 : i32 to vector<16x16xi32>
    %50 = arith.cmpi slt, %29, %49 : vector<16x16xi32>
    %51 = arith.andi %48, %50 : vector<16x16xi1>
    %52 = arith.ori %40, %51 : vector<16x16xi1>
    %53 = arith.cmpi sle, %29, %28 : vector<16x16xi32>
    %54 = arith.andi %52, %53 : vector<16x16xi1>
    %cst_14 = arith.constant 0.000000e+00 : f32
    %cst_15 = arith.constant -1.000000e+09 : f32
    %55 = vector.broadcast %cst_14 : f32 to vector<16x16xf32>
    %56 = vector.broadcast %cst_15 : f32 to vector<16x16xf32>
    %57 = arith.select %54, %55, %56 : vector<16x16xi1>, vector<16x16xf32>
    %58 = tpu.iota {dimensions = array<i32: 0>} : vector<16x16xi32>
    %59 = tpu.iota {dimensions = array<i32: 1>} : vector<16x16xi32>
    %c0_i32_16 = arith.constant 0 : i32
    %60 = vector.broadcast %c0_i32_16 : i32 to vector<16x16xi32>
    %61 = arith.cmpi sge, %58, %60 : vector<16x16xi32>
    %c8_i32_17 = arith.constant 8 : i32
    %62 = vector.broadcast %c8_i32_17 : i32 to vector<16x16xi32>
    %63 = arith.cmpi slt, %58, %62 : vector<16x16xi32>
    %64 = arith.andi %61, %63 : vector<16x16xi1>
    %c0_i32_18 = arith.constant 0 : i32
    %65 = vector.broadcast %c0_i32_18 : i32 to vector<16x16xi32>
    %66 = arith.cmpi sge, %59, %65 : vector<16x16xi32>
    %67 = arith.andi %64, %66 : vector<16x16xi1>
    %c8_i32_19 = arith.constant 8 : i32
    %68 = vector.broadcast %c8_i32_19 : i32 to vector<16x16xi32>
    %69 = arith.cmpi slt, %59, %68 : vector<16x16xi32>
    %70 = arith.andi %67, %69 : vector<16x16xi1>
    %c8_i32_20 = arith.constant 8 : i32
    %71 = vector.broadcast %c8_i32_20 : i32 to vector<16x16xi32>
    %72 = arith.cmpi sge, %58, %71 : vector<16x16xi32>
    %c16_i32_21 = arith.constant 16 : i32
    %73 = vector.broadcast %c16_i32_21 : i32 to vector<16x16xi32>
    %74 = arith.cmpi slt, %58, %73 : vector<16x16xi32>
    %75 = arith.andi %72, %74 : vector<16x16xi1>
    %c8_i32_22 = arith.constant 8 : i32
    %76 = vector.broadcast %c8_i32_22 : i32 to vector<16x16xi32>
    %77 = arith.cmpi sge, %59, %76 : vector<16x16xi32>
    %78 = arith.andi %75, %77 : vector<16x16xi1>
    %c16_i32_23 = arith.constant 16 : i32
    %79 = vector.broadcast %c16_i32_23 : i32 to vector<16x16xi32>
    %80 = arith.cmpi slt, %59, %79 : vector<16x16xi32>
    %81 = arith.andi %78, %80 : vector<16x16xi1>
    %82 = arith.ori %70, %81 : vector<16x16xi1>
    %cst_24 = arith.constant 0.000000e+00 : f32
    %cst_25 = arith.constant -1.000000e+09 : f32
    %83 = vector.broadcast %cst_24 : f32 to vector<16x16xf32>
    %84 = vector.broadcast %cst_25 : f32 to vector<16x16xf32>
    %85 = arith.select %82, %83, %84 : vector<16x16xi1>, vector<16x16xf32>
    %c864 = arith.constant 864 : index
    %c0 = arith.constant 0 : index
    %86 = vector.load %arg4[%c864, %c0] : memref<872x128xf32, #tpu.memory_space<vmem>>, vector<2x32xf32>
    %c0_26 = arith.constant 0 : index
    %c0_27 = arith.constant 0 : index
    %87 = vector.load %arg0[%c0_26, %c0_27] : memref<16x2xf32, #tpu.memory_space<vmem>>, vector<16x2xf32>
    %cst_28 = arith.constant dense<0.000000e+00> : vector<16x32xf32>
    %88 = tpu.matmul %87, %86, %cst_28 {dimension_numbers = #tpu.dot_dimension_numbers<[1], [0], [0], [1], [0, 0, 1, 1], [], []>} : vector<16x2xf32>, vector<2x32xf32>, vector<16x32xf32> -> vector<16x32xf32>
    %c0_29 = arith.constant 0 : index
    %c0_30 = arith.constant 0 : index
    %89 = vector.load %arg2[%c0_29, %c0_30] : memref<16x32xf32, #tpu.memory_space<vmem>>, vector<16x32xf32>
    %90 = arith.addf %88, %89 : vector<16x32xf32>
    %c0_31 = arith.constant 0 : index
    %c0_32 = arith.constant 0 : index
    %91 = vector.load %arg1[%c0_31, %c0_32] : memref<16x2xf32, #tpu.memory_space<vmem>>, vector<16x2xf32>
    %cst_33 = arith.constant dense<0.000000e+00> : vector<16x32xf32>
    %92 = tpu.matmul %91, %86, %cst_33 {dimension_numbers = #tpu.dot_dimension_numbers<[1], [0], [0], [1], [0, 0, 1, 1], [], []>} : vector<16x2xf32>, vector<2x32xf32>, vector<16x32xf32> -> vector<16x32xf32>
    %c0_34 = arith.constant 0 : index
    %c0_35 = arith.constant 0 : index
    %93 = vector.load %arg3[%c0_34, %c0_35] : memref<16x32xf32, #tpu.memory_space<vmem>>, vector<16x32xf32>
    %94 = arith.addf %92, %93 : vector<16x32xf32>
    %c0_36 = arith.constant 0 : index
    %c0_37 = arith.constant 0 : index
    %95 = vector.load %arg4[%c0_36, %c0_37] : memref<872x128xf32, #tpu.memory_space<vmem>>, vector<32x96xf32>
    %c0_38 = arith.constant 0 : index
    %c0_39 = arith.constant 0 : index
    %c0_40 = arith.constant 0 : index
    %96 = vector.load %arg5[%c0_38, %c0_39, %c0_40] : memref<45x1x128xf32, #tpu.memory_space<vmem>>, vector<1x1x128xf32>
    %97 = vector.shape_cast %96 : vector<1x1x128xf32> to vector<1x128xf32>
    %98 = vector.extract_strided_slice %97 {offsets = [0, 0], sizes = [1, 96], strides = [1, 1]} : vector<1x128xf32> to vector<1x96xf32>
    %cst_41 = arith.constant dense<0.000000e+00> : vector<16x96xf32>
    %99 = tpu.matmul %90, %95, %cst_41 {dimension_numbers = #tpu.dot_dimension_numbers<[1], [0], [0], [1], [0, 0, 1, 1], [], []>} : vector<16x32xf32>, vector<32x96xf32>, vector<16x96xf32> -> vector<16x96xf32>
    %100 = vector.broadcast %98 : vector<1x96xf32> to vector<16x96xf32>
    %101 = arith.addf %99, %100 : vector<16x96xf32>
    %102 = vector.extract_strided_slice %101 {offsets = [0, 0], sizes = [16, 32], strides = [1, 1]} : vector<16x96xf32> to vector<16x32xf32>
    %103 = vector.extract_strided_slice %101 {offsets = [0, 32], sizes = [16, 32], strides = [1, 1]} : vector<16x96xf32> to vector<16x32xf32>
    %104 = vector.extract_strided_slice %101 {offsets = [0, 64], sizes = [16, 32], strides = [1, 1]} : vector<16x96xf32> to vector<16x32xf32>
    %105 = vector.extract_strided_slice %102 {offsets = [0, 0], sizes = [16, 8], strides = [1, 1]} : vector<16x32xf32> to vector<16x8xf32>
    %106 = vector.extract_strided_slice %103 {offsets = [0, 0], sizes = [16, 8], strides = [1, 1]} : vector<16x32xf32> to vector<16x8xf32>
    %cst_42 = arith.constant dense<0.000000e+00> : vector<16x16xf32>
    %107 = tpu.matmul %105, %106, %cst_42 {dimension_numbers = #tpu.dot_dimension_numbers<[1], [1], [0], [0], [0, 0, 1, 0], [], []>} : vector<16x8xf32>, vector<16x8xf32>, vector<16x16xf32> -> vector<16x16xf32>
    %108 = arith.addf %107, %27 : vector<16x16xf32>
    %cst_43 = arith.constant dense<0xFF800000> : vector<16xf32>
    %109 = vector.multi_reduction <maximumf>, %108, %cst_43 [1] : vector<16x16xf32> to vector<16xf32>
    %110 = vector.shape_cast %109 : vector<16xf32> to vector<16x1xf32>
    %111 = vector.broadcast %110 : vector<16x1xf32> to vector<16x16xf32>
    %112 = arith.subf %108, %111 : vector<16x16xf32>
    %113 = math.exp %112 : vector<16x16xf32>
    %cst_44 = arith.constant dense<0.000000e+00> : vector<16xf32>
    %114 = vector.multi_reduction <add>, %113, %cst_44 [1] : vector<16x16xf32> to vector<16xf32>
    %115 = vector.shape_cast %114 : vector<16xf32> to vector<16x1xf32>
    %116 = vector.broadcast %115 : vector<16x1xf32> to vector<16x16xf32>
    %117 = arith.divf %113, %116 : vector<16x16xf32>
    %118 = vector.extract_strided_slice %104 {offsets = [0, 0], sizes = [16, 8], strides = [1, 1]} : vector<16x32xf32> to vector<16x8xf32>
    %cst_45 = arith.constant dense<0.000000e+00> : vector<16x8xf32>
    %119 = tpu.matmul %117, %118, %cst_45 {dimension_numbers = #tpu.dot_dimension_numbers<[1], [0], [0], [1], [0, 0, 1, 1], [], []>} : vector<16x16xf32>, vector<16x8xf32>, vector<16x8xf32> -> vector<16x8xf32>
    %120 = vector.extract_strided_slice %102 {offsets = [0, 8], sizes = [16, 8], strides = [1, 1]} : vector<16x32xf32> to vector<16x8xf32>
    %121 = vector.extract_strided_slice %103 {offsets = [0, 8], sizes = [16, 8], strides = [1, 1]} : vector<16x32xf32> to vector<16x8xf32>
    %cst_46 = arith.constant dense<0.000000e+00> : vector<16x16xf32>
    %122 = tpu.matmul %120, %121, %cst_46 {dimension_numbers = #tpu.dot_dimension_numbers<[1], [1], [0], [0], [0, 0, 1, 0], [], []>} : vector<16x8xf32>, vector<16x8xf32>, vector<16x16xf32> -> vector<16x16xf32>
    %123 = arith.addf %122, %27 : vector<16x16xf32>
    %cst_47 = arith.constant dense<0xFF800000> : vector<16xf32>
    %124 = vector.multi_reduction <maximumf>, %123, %cst_47 [1] : vector<16x16xf32> to vector<16xf32>
    %125 = vector.shape_cast %124 : vector<16xf32> to vector<16x1xf32>
    %126 = vector.broadcast %125 : vector<16x1xf32> to vector<16x16xf32>
    %127 = arith.subf %123, %126 : vector<16x16xf32>
    %128 = math.exp %127 : vector<16x16xf32>
    %cst_48 = arith.constant dense<0.000000e+00> : vector<16xf32>
    %129 = vector.multi_reduction <add>, %128, %cst_48 [1] : vector<16x16xf32> to vector<16xf32>
    %130 = vector.shape_cast %129 : vector<16xf32> to vector<16x1xf32>
    %131 = vector.broadcast %130 : vector<16x1xf32> to vector<16x16xf32>
    %132 = arith.divf %128, %131 : vector<16x16xf32>
    %133 = vector.extract_strided_slice %104 {offsets = [0, 8], sizes = [16, 8], strides = [1, 1]} : vector<16x32xf32> to vector<16x8xf32>
    %cst_49 = arith.constant dense<0.000000e+00> : vector<16x8xf32>
    %134 = tpu.matmul %132, %133, %cst_49 {dimension_numbers = #tpu.dot_dimension_numbers<[1], [0], [0], [1], [0, 0, 1, 1], [], []>} : vector<16x16xf32>, vector<16x8xf32>, vector<16x8xf32> -> vector<16x8xf32>
    %135 = vector.extract_strided_slice %102 {offsets = [0, 16], sizes = [16, 8], strides = [1, 1]} : vector<16x32xf32> to vector<16x8xf32>
    %136 = vector.extract_strided_slice %103 {offsets = [0, 16], sizes = [16, 8], strides = [1, 1]} : vector<16x32xf32> to vector<16x8xf32>
    %cst_50 = arith.constant dense<0.000000e+00> : vector<16x16xf32>
    %137 = tpu.matmul %135, %136, %cst_50 {dimension_numbers = #tpu.dot_dimension_numbers<[1], [1], [0], [0], [0, 0, 1, 0], [], []>} : vector<16x8xf32>, vector<16x8xf32>, vector<16x16xf32> -> vector<16x16xf32>
    %138 = arith.addf %137, %27 : vector<16x16xf32>
    %cst_51 = arith.constant dense<0xFF800000> : vector<16xf32>
    %139 = vector.multi_reduction <maximumf>, %138, %cst_51 [1] : vector<16x16xf32> to vector<16xf32>
    %140 = vector.shape_cast %139 : vector<16xf32> to vector<16x1xf32>
    %141 = vector.broadcast %140 : vector<16x1xf32> to vector<16x16xf32>
    %142 = arith.subf %138, %141 : vector<16x16xf32>
    %143 = math.exp %142 : vector<16x16xf32>
    %cst_52 = arith.constant dense<0.000000e+00> : vector<16xf32>
    %144 = vector.multi_reduction <add>, %143, %cst_52 [1] : vector<16x16xf32> to vector<16xf32>
    %145 = vector.shape_cast %144 : vector<16xf32> to vector<16x1xf32>
    %146 = vector.broadcast %145 : vector<16x1xf32> to vector<16x16xf32>
    %147 = arith.divf %143, %146 : vector<16x16xf32>
    %148 = vector.extract_strided_slice %104 {offsets = [0, 16], sizes = [16, 8], strides = [1, 1]} : vector<16x32xf32> to vector<16x8xf32>
    %cst_53 = arith.constant dense<0.000000e+00> : vector<16x8xf32>
    %149 = tpu.matmul %147, %148, %cst_53 {dimension_numbers = #tpu.dot_dimension_numbers<[1], [0], [0], [1], [0, 0, 1, 1], [], []>} : vector<16x16xf32>, vector<16x8xf32>, vector<16x8xf32> -> vector<16x8xf32>
    %150 = vector.extract_strided_slice %102 {offsets = [0, 24], sizes = [16, 8], strides = [1, 1]} : vector<16x32xf32> to vector<16x8xf32>
    %151 = vector.extract_strided_slice %103 {offsets = [0, 24], sizes = [16, 8], strides = [1, 1]} : vector<16x32xf32> to vector<16x8xf32>
    %cst_54 = arith.constant dense<0.000000e+00> : vector<16x16xf32>
    %152 = tpu.matmul %150, %151, %cst_54 {dimension_numbers = #tpu.dot_dimension_numbers<[1], [1], [0], [0], [0, 0, 1, 0], [], []>} : vector<16x8xf32>, vector<16x8xf32>, vector<16x16xf32> -> vector<16x16xf32>
    %153 = arith.addf %152, %27 : vector<16x16xf32>
    %cst_55 = arith.constant dense<0xFF800000> : vector<16xf32>
    %154 = vector.multi_reduction <maximumf>, %153, %cst_55 [1] : vector<16x16xf32> to vector<16xf32>
    %155 = vector.shape_cast %154 : vector<16xf32> to vector<16x1xf32>
    %156 = vector.broadcast %155 : vector<16x1xf32> to vector<16x16xf32>
    %157 = arith.subf %153, %156 : vector<16x16xf32>
    %158 = math.exp %157 : vector<16x16xf32>
    %cst_56 = arith.constant dense<0.000000e+00> : vector<16xf32>
    %159 = vector.multi_reduction <add>, %158, %cst_56 [1] : vector<16x16xf32> to vector<16xf32>
    %160 = vector.shape_cast %159 : vector<16xf32> to vector<16x1xf32>
    %161 = vector.broadcast %160 : vector<16x1xf32> to vector<16x16xf32>
    %162 = arith.divf %158, %161 : vector<16x16xf32>
    %163 = vector.extract_strided_slice %104 {offsets = [0, 24], sizes = [16, 8], strides = [1, 1]} : vector<16x32xf32> to vector<16x8xf32>
    %cst_57 = arith.constant dense<0.000000e+00> : vector<16x8xf32>
    %164 = tpu.matmul %162, %163, %cst_57 {dimension_numbers = #tpu.dot_dimension_numbers<[1], [0], [0], [1], [0, 0, 1, 1], [], []>} : vector<16x16xf32>, vector<16x8xf32>, vector<16x8xf32> -> vector<16x8xf32>
    %165 = tpu.concatenate %119, %134, %149, %164 in 1 : vector<16x8xf32>, vector<16x8xf32>, vector<16x8xf32>, vector<16x8xf32> -> vector<16x32xf32>
    %c32 = arith.constant 32 : index
    %c0_58 = arith.constant 0 : index
    %166 = vector.load %arg4[%c32, %c0_58] : memref<872x128xf32, #tpu.memory_space<vmem>>, vector<32x32xf32>
    %c1 = arith.constant 1 : index
    %c0_59 = arith.constant 0 : index
    %c0_60 = arith.constant 0 : index
    %167 = vector.load %arg5[%c1, %c0_59, %c0_60] : memref<45x1x128xf32, #tpu.memory_space<vmem>>, vector<1x1x128xf32>
    %168 = vector.shape_cast %167 : vector<1x1x128xf32> to vector<1x128xf32>
    %169 = vector.extract_strided_slice %168 {offsets = [0, 0], sizes = [1, 32], strides = [1, 1]} : vector<1x128xf32> to vector<1x32xf32>
    %cst_61 = arith.constant dense<0.000000e+00> : vector<16x32xf32>
    %170 = tpu.matmul %165, %166, %cst_61 {dimension_numbers = #tpu.dot_dimension_numbers<[1], [0], [0], [1], [0, 0, 1, 1], [], []>} : vector<16x32xf32>, vector<32x32xf32>, vector<16x32xf32> -> vector<16x32xf32>
    %171 = vector.broadcast %169 : vector<1x32xf32> to vector<16x32xf32>
    %172 = arith.addf %170, %171 : vector<16x32xf32>
    %173 = arith.addf %90, %172 : vector<16x32xf32>
    %c4 = arith.constant 4 : index
    %c0_62 = arith.constant 0 : index
    %c0_63 = arith.constant 0 : index
    %174 = vector.load %arg5[%c4, %c0_62, %c0_63] : memref<45x1x128xf32, #tpu.memory_space<vmem>>, vector<1x1x128xf32>
    %175 = vector.shape_cast %174 : vector<1x1x128xf32> to vector<1x128xf32>
    %176 = vector.extract_strided_slice %175 {offsets = [0, 0], sizes = [1, 32], strides = [1, 1]} : vector<1x128xf32> to vector<1x32xf32>
    %c5 = arith.constant 5 : index
    %c0_64 = arith.constant 0 : index
    %c0_65 = arith.constant 0 : index
    %177 = vector.load %arg5[%c5, %c0_64, %c0_65] : memref<45x1x128xf32, #tpu.memory_space<vmem>>, vector<1x1x128xf32>
    %178 = vector.shape_cast %177 : vector<1x1x128xf32> to vector<1x128xf32>
    %179 = vector.extract_strided_slice %178 {offsets = [0, 0], sizes = [1, 32], strides = [1, 1]} : vector<1x128xf32> to vector<1x32xf32>
    %cst_66 = arith.constant dense<0.000000e+00> : vector<16xf32>
    %180 = vector.multi_reduction <add>, %173, %cst_66 [1] : vector<16x32xf32> to vector<16xf32>
    %181 = vector.shape_cast %180 : vector<16xf32> to vector<16x1xf32>
    %cst_67 = arith.constant 3.200000e+01 : f32
    %182 = vector.broadcast %cst_67 : f32 to vector<16x1xf32>
    %183 = arith.divf %181, %182 : vector<16x1xf32>
    %184 = vector.broadcast %183 : vector<16x1xf32> to vector<16x32xf32>
    %185 = arith.subf %173, %184 : vector<16x32xf32>
    %186 = arith.mulf %185, %185 : vector<16x32xf32>
    %cst_68 = arith.constant dense<0.000000e+00> : vector<16xf32>
    %187 = vector.multi_reduction <add>, %186, %cst_68 [1] : vector<16x32xf32> to vector<16xf32>
    %188 = vector.shape_cast %187 : vector<16xf32> to vector<16x1xf32>
    %cst_69 = arith.constant 3.200000e+01 : f32
    %189 = vector.broadcast %cst_69 : f32 to vector<16x1xf32>
    %190 = arith.divf %188, %189 : vector<16x1xf32>
    %cst_70 = arith.constant 9.99999974E-6 : f32
    %191 = vector.broadcast %cst_70 : f32 to vector<16x1xf32>
    %192 = arith.addf %190, %191 : vector<16x1xf32>
    %193 = math.rsqrt %192 : vector<16x1xf32>
    %194 = vector.broadcast %193 : vector<16x1xf32> to vector<16x32xf32>
    %195 = arith.mulf %185, %194 : vector<16x32xf32>
    %196 = vector.broadcast %176 : vector<1x32xf32> to vector<16x32xf32>
    %197 = arith.mulf %195, %196 : vector<16x32xf32>
    %198 = vector.broadcast %179 : vector<1x32xf32> to vector<16x32xf32>
    %199 = arith.addf %197, %198 : vector<16x32xf32>
    %c64 = arith.constant 64 : index
    %c0_71 = arith.constant 0 : index
    %200 = vector.load %arg4[%c64, %c0_71] : memref<872x128xf32, #tpu.memory_space<vmem>>, vector<32x64xf32>
    %c2 = arith.constant 2 : index
    %c0_72 = arith.constant 0 : index
    %c0_73 = arith.constant 0 : index
    %201 = vector.load %arg5[%c2, %c0_72, %c0_73] : memref<45x1x128xf32, #tpu.memory_space<vmem>>, vector<1x1x128xf32>
    %202 = vector.shape_cast %201 : vector<1x1x128xf32> to vector<1x128xf32>
    %203 = vector.extract_strided_slice %202 {offsets = [0, 0], sizes = [1, 64], strides = [1, 1]} : vector<1x128xf32> to vector<1x64xf32>
    %cst_74 = arith.constant dense<0.000000e+00> : vector<16x64xf32>
    %204 = tpu.matmul %199, %200, %cst_74 {dimension_numbers = #tpu.dot_dimension_numbers<[1], [0], [0], [1], [0, 0, 1, 1], [], []>} : vector<16x32xf32>, vector<32x64xf32>, vector<16x64xf32> -> vector<16x64xf32>
    %205 = vector.broadcast %203 : vector<1x64xf32> to vector<16x64xf32>
    %206 = arith.addf %204, %205 : vector<16x64xf32>
    %cst_75 = arith.constant 0.000000e+00 : f32
    %207 = vector.broadcast %cst_75 : f32 to vector<16x64xf32>
    %208 = arith.maximumf %206, %207 : vector<16x64xf32>
    %c96 = arith.constant 96 : index
    %c0_76 = arith.constant 0 : index
    %209 = vector.load %arg4[%c96, %c0_76] : memref<872x128xf32, #tpu.memory_space<vmem>>, vector<64x32xf32>
    %c3 = arith.constant 3 : index
    %c0_77 = arith.constant 0 : index
    %c0_78 = arith.constant 0 : index
    %210 = vector.load %arg5[%c3, %c0_77, %c0_78] : memref<45x1x128xf32, #tpu.memory_space<vmem>>, vector<1x1x128xf32>
    %211 = vector.shape_cast %210 : vector<1x1x128xf32> to vector<1x128xf32>
    %212 = vector.extract_strided_slice %211 {offsets = [0, 0], sizes = [1, 32], strides = [1, 1]} : vector<1x128xf32> to vector<1x32xf32>
    %cst_79 = arith.constant dense<0.000000e+00> : vector<16x32xf32>
    %213 = tpu.matmul %208, %209, %cst_79 {dimension_numbers = #tpu.dot_dimension_numbers<[1], [0], [0], [1], [0, 0, 1, 1], [], []>} : vector<16x64xf32>, vector<64x32xf32>, vector<16x32xf32> -> vector<16x32xf32>
    %214 = vector.broadcast %212 : vector<1x32xf32> to vector<16x32xf32>
    %215 = arith.addf %213, %214 : vector<16x32xf32>
    %216 = arith.addf %199, %215 : vector<16x32xf32>
    %c6 = arith.constant 6 : index
    %c0_80 = arith.constant 0 : index
    %c0_81 = arith.constant 0 : index
    %217 = vector.load %arg5[%c6, %c0_80, %c0_81] : memref<45x1x128xf32, #tpu.memory_space<vmem>>, vector<1x1x128xf32>
    %218 = vector.shape_cast %217 : vector<1x1x128xf32> to vector<1x128xf32>
    %219 = vector.extract_strided_slice %218 {offsets = [0, 0], sizes = [1, 32], strides = [1, 1]} : vector<1x128xf32> to vector<1x32xf32>
    %c7 = arith.constant 7 : index
    %c0_82 = arith.constant 0 : index
    %c0_83 = arith.constant 0 : index
    %220 = vector.load %arg5[%c7, %c0_82, %c0_83] : memref<45x1x128xf32, #tpu.memory_space<vmem>>, vector<1x1x128xf32>
    %221 = vector.shape_cast %220 : vector<1x1x128xf32> to vector<1x128xf32>
    %222 = vector.extract_strided_slice %221 {offsets = [0, 0], sizes = [1, 32], strides = [1, 1]} : vector<1x128xf32> to vector<1x32xf32>
    %cst_84 = arith.constant dense<0.000000e+00> : vector<16xf32>
    %223 = vector.multi_reduction <add>, %216, %cst_84 [1] : vector<16x32xf32> to vector<16xf32>
    %224 = vector.shape_cast %223 : vector<16xf32> to vector<16x1xf32>
    %cst_85 = arith.constant 3.200000e+01 : f32
    %225 = vector.broadcast %cst_85 : f32 to vector<16x1xf32>
    %226 = arith.divf %224, %225 : vector<16x1xf32>
    %227 = vector.broadcast %226 : vector<16x1xf32> to vector<16x32xf32>
    %228 = arith.subf %216, %227 : vector<16x32xf32>
    %229 = arith.mulf %228, %228 : vector<16x32xf32>
    %cst_86 = arith.constant dense<0.000000e+00> : vector<16xf32>
    %230 = vector.multi_reduction <add>, %229, %cst_86 [1] : vector<16x32xf32> to vector<16xf32>
    %231 = vector.shape_cast %230 : vector<16xf32> to vector<16x1xf32>
    %cst_87 = arith.constant 3.200000e+01 : f32
    %232 = vector.broadcast %cst_87 : f32 to vector<16x1xf32>
    %233 = arith.divf %231, %232 : vector<16x1xf32>
    %cst_88 = arith.constant 9.99999974E-6 : f32
    %234 = vector.broadcast %cst_88 : f32 to vector<16x1xf32>
    %235 = arith.addf %233, %234 : vector<16x1xf32>
    %236 = math.rsqrt %235 : vector<16x1xf32>
    %237 = vector.broadcast %236 : vector<16x1xf32> to vector<16x32xf32>
    %238 = arith.mulf %228, %237 : vector<16x32xf32>
    %239 = vector.broadcast %219 : vector<1x32xf32> to vector<16x32xf32>
    %240 = arith.mulf %238, %239 : vector<16x32xf32>
    %241 = vector.broadcast %222 : vector<1x32xf32> to vector<16x32xf32>
    %242 = arith.addf %240, %241 : vector<16x32xf32>
    %c160 = arith.constant 160 : index
    %c0_89 = arith.constant 0 : index
    %243 = vector.load %arg4[%c160, %c0_89] : memref<872x128xf32, #tpu.memory_space<vmem>>, vector<32x96xf32>
    %c8 = arith.constant 8 : index
    %c0_90 = arith.constant 0 : index
    %c0_91 = arith.constant 0 : index
    %244 = vector.load %arg5[%c8, %c0_90, %c0_91] : memref<45x1x128xf32, #tpu.memory_space<vmem>>, vector<1x1x128xf32>
    %245 = vector.shape_cast %244 : vector<1x1x128xf32> to vector<1x128xf32>
    %246 = vector.extract_strided_slice %245 {offsets = [0, 0], sizes = [1, 96], strides = [1, 1]} : vector<1x128xf32> to vector<1x96xf32>
    %cst_92 = arith.constant dense<0.000000e+00> : vector<16x96xf32>
    %247 = tpu.matmul %242, %243, %cst_92 {dimension_numbers = #tpu.dot_dimension_numbers<[1], [0], [0], [1], [0, 0, 1, 1], [], []>} : vector<16x32xf32>, vector<32x96xf32>, vector<16x96xf32> -> vector<16x96xf32>
    %248 = vector.broadcast %246 : vector<1x96xf32> to vector<16x96xf32>
    %249 = arith.addf %247, %248 : vector<16x96xf32>
    %250 = vector.extract_strided_slice %249 {offsets = [0, 0], sizes = [16, 32], strides = [1, 1]} : vector<16x96xf32> to vector<16x32xf32>
    %251 = vector.extract_strided_slice %249 {offsets = [0, 32], sizes = [16, 32], strides = [1, 1]} : vector<16x96xf32> to vector<16x32xf32>
    %252 = vector.extract_strided_slice %249 {offsets = [0, 64], sizes = [16, 32], strides = [1, 1]} : vector<16x96xf32> to vector<16x32xf32>
    %253 = vector.extract_strided_slice %250 {offsets = [0, 0], sizes = [16, 8], strides = [1, 1]} : vector<16x32xf32> to vector<16x8xf32>
    %254 = vector.extract_strided_slice %251 {offsets = [0, 0], sizes = [16, 8], strides = [1, 1]} : vector<16x32xf32> to vector<16x8xf32>
    %cst_93 = arith.constant dense<0.000000e+00> : vector<16x16xf32>
    %255 = tpu.matmul %253, %254, %cst_93 {dimension_numbers = #tpu.dot_dimension_numbers<[1], [1], [0], [0], [0, 0, 1, 0], [], []>} : vector<16x8xf32>, vector<16x8xf32>, vector<16x16xf32> -> vector<16x16xf32>
    %256 = arith.addf %255, %27 : vector<16x16xf32>
    %cst_94 = arith.constant dense<0xFF800000> : vector<16xf32>
    %257 = vector.multi_reduction <maximumf>, %256, %cst_94 [1] : vector<16x16xf32> to vector<16xf32>
    %258 = vector.shape_cast %257 : vector<16xf32> to vector<16x1xf32>
    %259 = vector.broadcast %258 : vector<16x1xf32> to vector<16x16xf32>
    %260 = arith.subf %256, %259 : vector<16x16xf32>
    %261 = math.exp %260 : vector<16x16xf32>
    %cst_95 = arith.constant dense<0.000000e+00> : vector<16xf32>
    %262 = vector.multi_reduction <add>, %261, %cst_95 [1] : vector<16x16xf32> to vector<16xf32>
    %263 = vector.shape_cast %262 : vector<16xf32> to vector<16x1xf32>
    %264 = vector.broadcast %263 : vector<16x1xf32> to vector<16x16xf32>
    %265 = arith.divf %261, %264 : vector<16x16xf32>
    %266 = vector.extract_strided_slice %252 {offsets = [0, 0], sizes = [16, 8], strides = [1, 1]} : vector<16x32xf32> to vector<16x8xf32>
    %cst_96 = arith.constant dense<0.000000e+00> : vector<16x8xf32>
    %267 = tpu.matmul %265, %266, %cst_96 {dimension_numbers = #tpu.dot_dimension_numbers<[1], [0], [0], [1], [0, 0, 1, 1], [], []>} : vector<16x16xf32>, vector<16x8xf32>, vector<16x8xf32> -> vector<16x8xf32>
    %268 = vector.extract_strided_slice %250 {offsets = [0, 8], sizes = [16, 8], strides = [1, 1]} : vector<16x32xf32> to vector<16x8xf32>
    %269 = vector.extract_strided_slice %251 {offsets = [0, 8], sizes = [16, 8], strides = [1, 1]} : vector<16x32xf32> to vector<16x8xf32>
    %cst_97 = arith.constant dense<0.000000e+00> : vector<16x16xf32>
    %270 = tpu.matmul %268, %269, %cst_97 {dimension_numbers = #tpu.dot_dimension_numbers<[1], [1], [0], [0], [0, 0, 1, 0], [], []>} : vector<16x8xf32>, vector<16x8xf32>, vector<16x16xf32> -> vector<16x16xf32>
    %271 = arith.addf %270, %27 : vector<16x16xf32>
    %cst_98 = arith.constant dense<0xFF800000> : vector<16xf32>
    %272 = vector.multi_reduction <maximumf>, %271, %cst_98 [1] : vector<16x16xf32> to vector<16xf32>
    %273 = vector.shape_cast %272 : vector<16xf32> to vector<16x1xf32>
    %274 = vector.broadcast %273 : vector<16x1xf32> to vector<16x16xf32>
    %275 = arith.subf %271, %274 : vector<16x16xf32>
    %276 = math.exp %275 : vector<16x16xf32>
    %cst_99 = arith.constant dense<0.000000e+00> : vector<16xf32>
    %277 = vector.multi_reduction <add>, %276, %cst_99 [1] : vector<16x16xf32> to vector<16xf32>
    %278 = vector.shape_cast %277 : vector<16xf32> to vector<16x1xf32>
    %279 = vector.broadcast %278 : vector<16x1xf32> to vector<16x16xf32>
    %280 = arith.divf %276, %279 : vector<16x16xf32>
    %281 = vector.extract_strided_slice %252 {offsets = [0, 8], sizes = [16, 8], strides = [1, 1]} : vector<16x32xf32> to vector<16x8xf32>
    %cst_100 = arith.constant dense<0.000000e+00> : vector<16x8xf32>
    %282 = tpu.matmul %280, %281, %cst_100 {dimension_numbers = #tpu.dot_dimension_numbers<[1], [0], [0], [1], [0, 0, 1, 1], [], []>} : vector<16x16xf32>, vector<16x8xf32>, vector<16x8xf32> -> vector<16x8xf32>
    %283 = vector.extract_strided_slice %250 {offsets = [0, 16], sizes = [16, 8], strides = [1, 1]} : vector<16x32xf32> to vector<16x8xf32>
    %284 = vector.extract_strided_slice %251 {offsets = [0, 16], sizes = [16, 8], strides = [1, 1]} : vector<16x32xf32> to vector<16x8xf32>
    %cst_101 = arith.constant dense<0.000000e+00> : vector<16x16xf32>
    %285 = tpu.matmul %283, %284, %cst_101 {dimension_numbers = #tpu.dot_dimension_numbers<[1], [1], [0], [0], [0, 0, 1, 0], [], []>} : vector<16x8xf32>, vector<16x8xf32>, vector<16x16xf32> -> vector<16x16xf32>
    %286 = arith.addf %285, %27 : vector<16x16xf32>
    %cst_102 = arith.constant dense<0xFF800000> : vector<16xf32>
    %287 = vector.multi_reduction <maximumf>, %286, %cst_102 [1] : vector<16x16xf32> to vector<16xf32>
    %288 = vector.shape_cast %287 : vector<16xf32> to vector<16x1xf32>
    %289 = vector.broadcast %288 : vector<16x1xf32> to vector<16x16xf32>
    %290 = arith.subf %286, %289 : vector<16x16xf32>
    %291 = math.exp %290 : vector<16x16xf32>
    %cst_103 = arith.constant dense<0.000000e+00> : vector<16xf32>
    %292 = vector.multi_reduction <add>, %291, %cst_103 [1] : vector<16x16xf32> to vector<16xf32>
    %293 = vector.shape_cast %292 : vector<16xf32> to vector<16x1xf32>
    %294 = vector.broadcast %293 : vector<16x1xf32> to vector<16x16xf32>
    %295 = arith.divf %291, %294 : vector<16x16xf32>
    %296 = vector.extract_strided_slice %252 {offsets = [0, 16], sizes = [16, 8], strides = [1, 1]} : vector<16x32xf32> to vector<16x8xf32>
    %cst_104 = arith.constant dense<0.000000e+00> : vector<16x8xf32>
    %297 = tpu.matmul %295, %296, %cst_104 {dimension_numbers = #tpu.dot_dimension_numbers<[1], [0], [0], [1], [0, 0, 1, 1], [], []>} : vector<16x16xf32>, vector<16x8xf32>, vector<16x8xf32> -> vector<16x8xf32>
    %298 = vector.extract_strided_slice %250 {offsets = [0, 24], sizes = [16, 8], strides = [1, 1]} : vector<16x32xf32> to vector<16x8xf32>
    %299 = vector.extract_strided_slice %251 {offsets = [0, 24], sizes = [16, 8], strides = [1, 1]} : vector<16x32xf32> to vector<16x8xf32>
    %cst_105 = arith.constant dense<0.000000e+00> : vector<16x16xf32>
    %300 = tpu.matmul %298, %299, %cst_105 {dimension_numbers = #tpu.dot_dimension_numbers<[1], [1], [0], [0], [0, 0, 1, 0], [], []>} : vector<16x8xf32>, vector<16x8xf32>, vector<16x16xf32> -> vector<16x16xf32>
    %301 = arith.addf %300, %27 : vector<16x16xf32>
    %cst_106 = arith.constant dense<0xFF800000> : vector<16xf32>
    %302 = vector.multi_reduction <maximumf>, %301, %cst_106 [1] : vector<16x16xf32> to vector<16xf32>
    %303 = vector.shape_cast %302 : vector<16xf32> to vector<16x1xf32>
    %304 = vector.broadcast %303 : vector<16x1xf32> to vector<16x16xf32>
    %305 = arith.subf %301, %304 : vector<16x16xf32>
    %306 = math.exp %305 : vector<16x16xf32>
    %cst_107 = arith.constant dense<0.000000e+00> : vector<16xf32>
    %307 = vector.multi_reduction <add>, %306, %cst_107 [1] : vector<16x16xf32> to vector<16xf32>
    %308 = vector.shape_cast %307 : vector<16xf32> to vector<16x1xf32>
    %309 = vector.broadcast %308 : vector<16x1xf32> to vector<16x16xf32>
    %310 = arith.divf %306, %309 : vector<16x16xf32>
    %311 = vector.extract_strided_slice %252 {offsets = [0, 24], sizes = [16, 8], strides = [1, 1]} : vector<16x32xf32> to vector<16x8xf32>
    %cst_108 = arith.constant dense<0.000000e+00> : vector<16x8xf32>
    %312 = tpu.matmul %310, %311, %cst_108 {dimension_numbers = #tpu.dot_dimension_numbers<[1], [0], [0], [1], [0, 0, 1, 1], [], []>} : vector<16x16xf32>, vector<16x8xf32>, vector<16x8xf32> -> vector<16x8xf32>
    %313 = tpu.concatenate %267, %282, %297, %312 in 1 : vector<16x8xf32>, vector<16x8xf32>, vector<16x8xf32>, vector<16x8xf32> -> vector<16x32xf32>
    %c192 = arith.constant 192 : index
    %c0_109 = arith.constant 0 : index
    %314 = vector.load %arg4[%c192, %c0_109] : memref<872x128xf32, #tpu.memory_space<vmem>>, vector<32x32xf32>
    %c9 = arith.constant 9 : index
    %c0_110 = arith.constant 0 : index
    %c0_111 = arith.constant 0 : index
    %315 = vector.load %arg5[%c9, %c0_110, %c0_111] : memref<45x1x128xf32, #tpu.memory_space<vmem>>, vector<1x1x128xf32>
    %316 = vector.shape_cast %315 : vector<1x1x128xf32> to vector<1x128xf32>
    %317 = vector.extract_strided_slice %316 {offsets = [0, 0], sizes = [1, 32], strides = [1, 1]} : vector<1x128xf32> to vector<1x32xf32>
    %cst_112 = arith.constant dense<0.000000e+00> : vector<16x32xf32>
    %318 = tpu.matmul %313, %314, %cst_112 {dimension_numbers = #tpu.dot_dimension_numbers<[1], [0], [0], [1], [0, 0, 1, 1], [], []>} : vector<16x32xf32>, vector<32x32xf32>, vector<16x32xf32> -> vector<16x32xf32>
    %319 = vector.broadcast %317 : vector<1x32xf32> to vector<16x32xf32>
    %320 = arith.addf %318, %319 : vector<16x32xf32>
    %321 = arith.addf %242, %320 : vector<16x32xf32>
    %c12 = arith.constant 12 : index
    %c0_113 = arith.constant 0 : index
    %c0_114 = arith.constant 0 : index
    %322 = vector.load %arg5[%c12, %c0_113, %c0_114] : memref<45x1x128xf32, #tpu.memory_space<vmem>>, vector<1x1x128xf32>
    %323 = vector.shape_cast %322 : vector<1x1x128xf32> to vector<1x128xf32>
    %324 = vector.extract_strided_slice %323 {offsets = [0, 0], sizes = [1, 32], strides = [1, 1]} : vector<1x128xf32> to vector<1x32xf32>
    %c13 = arith.constant 13 : index
    %c0_115 = arith.constant 0 : index
    %c0_116 = arith.constant 0 : index
    %325 = vector.load %arg5[%c13, %c0_115, %c0_116] : memref<45x1x128xf32, #tpu.memory_space<vmem>>, vector<1x1x128xf32>
    %326 = vector.shape_cast %325 : vector<1x1x128xf32> to vector<1x128xf32>
    %327 = vector.extract_strided_slice %326 {offsets = [0, 0], sizes = [1, 32], strides = [1, 1]} : vector<1x128xf32> to vector<1x32xf32>
    %cst_117 = arith.constant dense<0.000000e+00> : vector<16xf32>
    %328 = vector.multi_reduction <add>, %321, %cst_117 [1] : vector<16x32xf32> to vector<16xf32>
    %329 = vector.shape_cast %328 : vector<16xf32> to vector<16x1xf32>
    %cst_118 = arith.constant 3.200000e+01 : f32
    %330 = vector.broadcast %cst_118 : f32 to vector<16x1xf32>
    %331 = arith.divf %329, %330 : vector<16x1xf32>
    %332 = vector.broadcast %331 : vector<16x1xf32> to vector<16x32xf32>
    %333 = arith.subf %321, %332 : vector<16x32xf32>
    %334 = arith.mulf %333, %333 : vector<16x32xf32>
    %cst_119 = arith.constant dense<0.000000e+00> : vector<16xf32>
    %335 = vector.multi_reduction <add>, %334, %cst_119 [1] : vector<16x32xf32> to vector<16xf32>
    %336 = vector.shape_cast %335 : vector<16xf32> to vector<16x1xf32>
    %cst_120 = arith.constant 3.200000e+01 : f32
    %337 = vector.broadcast %cst_120 : f32 to vector<16x1xf32>
    %338 = arith.divf %336, %337 : vector<16x1xf32>
    %cst_121 = arith.constant 9.99999974E-6 : f32
    %339 = vector.broadcast %cst_121 : f32 to vector<16x1xf32>
    %340 = arith.addf %338, %339 : vector<16x1xf32>
    %341 = math.rsqrt %340 : vector<16x1xf32>
    %342 = vector.broadcast %341 : vector<16x1xf32> to vector<16x32xf32>
    %343 = arith.mulf %333, %342 : vector<16x32xf32>
    %344 = vector.broadcast %324 : vector<1x32xf32> to vector<16x32xf32>
    %345 = arith.mulf %343, %344 : vector<16x32xf32>
    %346 = vector.broadcast %327 : vector<1x32xf32> to vector<16x32xf32>
    %347 = arith.addf %345, %346 : vector<16x32xf32>
    %c224 = arith.constant 224 : index
    %c0_122 = arith.constant 0 : index
    %348 = vector.load %arg4[%c224, %c0_122] : memref<872x128xf32, #tpu.memory_space<vmem>>, vector<32x64xf32>
    %c10 = arith.constant 10 : index
    %c0_123 = arith.constant 0 : index
    %c0_124 = arith.constant 0 : index
    %349 = vector.load %arg5[%c10, %c0_123, %c0_124] : memref<45x1x128xf32, #tpu.memory_space<vmem>>, vector<1x1x128xf32>
    %350 = vector.shape_cast %349 : vector<1x1x128xf32> to vector<1x128xf32>
    %351 = vector.extract_strided_slice %350 {offsets = [0, 0], sizes = [1, 64], strides = [1, 1]} : vector<1x128xf32> to vector<1x64xf32>
    %cst_125 = arith.constant dense<0.000000e+00> : vector<16x64xf32>
    %352 = tpu.matmul %347, %348, %cst_125 {dimension_numbers = #tpu.dot_dimension_numbers<[1], [0], [0], [1], [0, 0, 1, 1], [], []>} : vector<16x32xf32>, vector<32x64xf32>, vector<16x64xf32> -> vector<16x64xf32>
    %353 = vector.broadcast %351 : vector<1x64xf32> to vector<16x64xf32>
    %354 = arith.addf %352, %353 : vector<16x64xf32>
    %cst_126 = arith.constant 0.000000e+00 : f32
    %355 = vector.broadcast %cst_126 : f32 to vector<16x64xf32>
    %356 = arith.maximumf %354, %355 : vector<16x64xf32>
    %c256 = arith.constant 256 : index
    %c0_127 = arith.constant 0 : index
    %357 = vector.load %arg4[%c256, %c0_127] : memref<872x128xf32, #tpu.memory_space<vmem>>, vector<64x32xf32>
    %c11 = arith.constant 11 : index
    %c0_128 = arith.constant 0 : index
    %c0_129 = arith.constant 0 : index
    %358 = vector.load %arg5[%c11, %c0_128, %c0_129] : memref<45x1x128xf32, #tpu.memory_space<vmem>>, vector<1x1x128xf32>
    %359 = vector.shape_cast %358 : vector<1x1x128xf32> to vector<1x128xf32>
    %360 = vector.extract_strided_slice %359 {offsets = [0, 0], sizes = [1, 32], strides = [1, 1]} : vector<1x128xf32> to vector<1x32xf32>
    %cst_130 = arith.constant dense<0.000000e+00> : vector<16x32xf32>
    %361 = tpu.matmul %356, %357, %cst_130 {dimension_numbers = #tpu.dot_dimension_numbers<[1], [0], [0], [1], [0, 0, 1, 1], [], []>} : vector<16x64xf32>, vector<64x32xf32>, vector<16x32xf32> -> vector<16x32xf32>
    %362 = vector.broadcast %360 : vector<1x32xf32> to vector<16x32xf32>
    %363 = arith.addf %361, %362 : vector<16x32xf32>
    %364 = arith.addf %347, %363 : vector<16x32xf32>
    %c14 = arith.constant 14 : index
    %c0_131 = arith.constant 0 : index
    %c0_132 = arith.constant 0 : index
    %365 = vector.load %arg5[%c14, %c0_131, %c0_132] : memref<45x1x128xf32, #tpu.memory_space<vmem>>, vector<1x1x128xf32>
    %366 = vector.shape_cast %365 : vector<1x1x128xf32> to vector<1x128xf32>
    %367 = vector.extract_strided_slice %366 {offsets = [0, 0], sizes = [1, 32], strides = [1, 1]} : vector<1x128xf32> to vector<1x32xf32>
    %c15 = arith.constant 15 : index
    %c0_133 = arith.constant 0 : index
    %c0_134 = arith.constant 0 : index
    %368 = vector.load %arg5[%c15, %c0_133, %c0_134] : memref<45x1x128xf32, #tpu.memory_space<vmem>>, vector<1x1x128xf32>
    %369 = vector.shape_cast %368 : vector<1x1x128xf32> to vector<1x128xf32>
    %370 = vector.extract_strided_slice %369 {offsets = [0, 0], sizes = [1, 32], strides = [1, 1]} : vector<1x128xf32> to vector<1x32xf32>
    %cst_135 = arith.constant dense<0.000000e+00> : vector<16xf32>
    %371 = vector.multi_reduction <add>, %364, %cst_135 [1] : vector<16x32xf32> to vector<16xf32>
    %372 = vector.shape_cast %371 : vector<16xf32> to vector<16x1xf32>
    %cst_136 = arith.constant 3.200000e+01 : f32
    %373 = vector.broadcast %cst_136 : f32 to vector<16x1xf32>
    %374 = arith.divf %372, %373 : vector<16x1xf32>
    %375 = vector.broadcast %374 : vector<16x1xf32> to vector<16x32xf32>
    %376 = arith.subf %364, %375 : vector<16x32xf32>
    %377 = arith.mulf %376, %376 : vector<16x32xf32>
    %cst_137 = arith.constant dense<0.000000e+00> : vector<16xf32>
    %378 = vector.multi_reduction <add>, %377, %cst_137 [1] : vector<16x32xf32> to vector<16xf32>
    %379 = vector.shape_cast %378 : vector<16xf32> to vector<16x1xf32>
    %cst_138 = arith.constant 3.200000e+01 : f32
    %380 = vector.broadcast %cst_138 : f32 to vector<16x1xf32>
    %381 = arith.divf %379, %380 : vector<16x1xf32>
    %cst_139 = arith.constant 9.99999974E-6 : f32
    %382 = vector.broadcast %cst_139 : f32 to vector<16x1xf32>
    %383 = arith.addf %381, %382 : vector<16x1xf32>
    %384 = math.rsqrt %383 : vector<16x1xf32>
    %385 = vector.broadcast %384 : vector<16x1xf32> to vector<16x32xf32>
    %386 = arith.mulf %376, %385 : vector<16x32xf32>
    %387 = vector.broadcast %367 : vector<1x32xf32> to vector<16x32xf32>
    %388 = arith.mulf %386, %387 : vector<16x32xf32>
    %389 = vector.broadcast %370 : vector<1x32xf32> to vector<16x32xf32>
    %390 = arith.addf %388, %389 : vector<16x32xf32>
    %c16 = arith.constant 16 : index
    %c0_140 = arith.constant 0 : index
    %c0_141 = arith.constant 0 : index
    %391 = vector.load %arg5[%c16, %c0_140, %c0_141] : memref<45x1x128xf32, #tpu.memory_space<vmem>>, vector<1x1x128xf32>
    %392 = vector.shape_cast %391 : vector<1x1x128xf32> to vector<1x128xf32>
    %393 = vector.extract_strided_slice %392 {offsets = [0, 0], sizes = [1, 32], strides = [1, 1]} : vector<1x128xf32> to vector<1x32xf32>
    %c17 = arith.constant 17 : index
    %c0_142 = arith.constant 0 : index
    %c0_143 = arith.constant 0 : index
    %394 = vector.load %arg5[%c17, %c0_142, %c0_143] : memref<45x1x128xf32, #tpu.memory_space<vmem>>, vector<1x1x128xf32>
    %395 = vector.shape_cast %394 : vector<1x1x128xf32> to vector<1x128xf32>
    %396 = vector.extract_strided_slice %395 {offsets = [0, 0], sizes = [1, 32], strides = [1, 1]} : vector<1x128xf32> to vector<1x32xf32>
    %cst_144 = arith.constant dense<0.000000e+00> : vector<16xf32>
    %397 = vector.multi_reduction <add>, %390, %cst_144 [1] : vector<16x32xf32> to vector<16xf32>
    %398 = vector.shape_cast %397 : vector<16xf32> to vector<16x1xf32>
    %cst_145 = arith.constant 3.200000e+01 : f32
    %399 = vector.broadcast %cst_145 : f32 to vector<16x1xf32>
    %400 = arith.divf %398, %399 : vector<16x1xf32>
    %401 = vector.broadcast %400 : vector<16x1xf32> to vector<16x32xf32>
    %402 = arith.subf %390, %401 : vector<16x32xf32>
    %403 = arith.mulf %402, %402 : vector<16x32xf32>
    %cst_146 = arith.constant dense<0.000000e+00> : vector<16xf32>
    %404 = vector.multi_reduction <add>, %403, %cst_146 [1] : vector<16x32xf32> to vector<16xf32>
    %405 = vector.shape_cast %404 : vector<16xf32> to vector<16x1xf32>
    %cst_147 = arith.constant 3.200000e+01 : f32
    %406 = vector.broadcast %cst_147 : f32 to vector<16x1xf32>
    %407 = arith.divf %405, %406 : vector<16x1xf32>
    %cst_148 = arith.constant 9.99999974E-6 : f32
    %408 = vector.broadcast %cst_148 : f32 to vector<16x1xf32>
    %409 = arith.addf %407, %408 : vector<16x1xf32>
    %410 = math.rsqrt %409 : vector<16x1xf32>
    %411 = vector.broadcast %410 : vector<16x1xf32> to vector<16x32xf32>
    %412 = arith.mulf %402, %411 : vector<16x32xf32>
    %413 = vector.broadcast %393 : vector<1x32xf32> to vector<16x32xf32>
    %414 = arith.mulf %412, %413 : vector<16x32xf32>
    %415 = vector.broadcast %396 : vector<1x32xf32> to vector<16x32xf32>
    %416 = arith.addf %414, %415 : vector<16x32xf32>
    %c320 = arith.constant 320 : index
    %c0_149 = arith.constant 0 : index
    %417 = vector.load %arg4[%c320, %c0_149] : memref<872x128xf32, #tpu.memory_space<vmem>>, vector<32x96xf32>
    %c18 = arith.constant 18 : index
    %c0_150 = arith.constant 0 : index
    %c0_151 = arith.constant 0 : index
    %418 = vector.load %arg5[%c18, %c0_150, %c0_151] : memref<45x1x128xf32, #tpu.memory_space<vmem>>, vector<1x1x128xf32>
    %419 = vector.shape_cast %418 : vector<1x1x128xf32> to vector<1x128xf32>
    %420 = vector.extract_strided_slice %419 {offsets = [0, 0], sizes = [1, 96], strides = [1, 1]} : vector<1x128xf32> to vector<1x96xf32>
    %cst_152 = arith.constant dense<0.000000e+00> : vector<16x96xf32>
    %421 = tpu.matmul %94, %417, %cst_152 {dimension_numbers = #tpu.dot_dimension_numbers<[1], [0], [0], [1], [0, 0, 1, 1], [], []>} : vector<16x32xf32>, vector<32x96xf32>, vector<16x96xf32> -> vector<16x96xf32>
    %422 = vector.broadcast %420 : vector<1x96xf32> to vector<16x96xf32>
    %423 = arith.addf %421, %422 : vector<16x96xf32>
    %424 = vector.extract_strided_slice %423 {offsets = [0, 0], sizes = [16, 32], strides = [1, 1]} : vector<16x96xf32> to vector<16x32xf32>
    %425 = vector.extract_strided_slice %423 {offsets = [0, 32], sizes = [16, 32], strides = [1, 1]} : vector<16x96xf32> to vector<16x32xf32>
    %426 = vector.extract_strided_slice %423 {offsets = [0, 64], sizes = [16, 32], strides = [1, 1]} : vector<16x96xf32> to vector<16x32xf32>
    %427 = vector.extract_strided_slice %424 {offsets = [0, 0], sizes = [16, 8], strides = [1, 1]} : vector<16x32xf32> to vector<16x8xf32>
    %428 = vector.extract_strided_slice %425 {offsets = [0, 0], sizes = [16, 8], strides = [1, 1]} : vector<16x32xf32> to vector<16x8xf32>
    %cst_153 = arith.constant dense<0.000000e+00> : vector<16x16xf32>
    %429 = tpu.matmul %427, %428, %cst_153 {dimension_numbers = #tpu.dot_dimension_numbers<[1], [1], [0], [0], [0, 0, 1, 0], [], []>} : vector<16x8xf32>, vector<16x8xf32>, vector<16x16xf32> -> vector<16x16xf32>
    %430 = arith.addf %429, %57 : vector<16x16xf32>
    %cst_154 = arith.constant dense<0xFF800000> : vector<16xf32>
    %431 = vector.multi_reduction <maximumf>, %430, %cst_154 [1] : vector<16x16xf32> to vector<16xf32>
    %432 = vector.shape_cast %431 : vector<16xf32> to vector<16x1xf32>
    %433 = vector.broadcast %432 : vector<16x1xf32> to vector<16x16xf32>
    %434 = arith.subf %430, %433 : vector<16x16xf32>
    %435 = math.exp %434 : vector<16x16xf32>
    %cst_155 = arith.constant dense<0.000000e+00> : vector<16xf32>
    %436 = vector.multi_reduction <add>, %435, %cst_155 [1] : vector<16x16xf32> to vector<16xf32>
    %437 = vector.shape_cast %436 : vector<16xf32> to vector<16x1xf32>
    %438 = vector.broadcast %437 : vector<16x1xf32> to vector<16x16xf32>
    %439 = arith.divf %435, %438 : vector<16x16xf32>
    %440 = vector.extract_strided_slice %426 {offsets = [0, 0], sizes = [16, 8], strides = [1, 1]} : vector<16x32xf32> to vector<16x8xf32>
    %cst_156 = arith.constant dense<0.000000e+00> : vector<16x8xf32>
    %441 = tpu.matmul %439, %440, %cst_156 {dimension_numbers = #tpu.dot_dimension_numbers<[1], [0], [0], [1], [0, 0, 1, 1], [], []>} : vector<16x16xf32>, vector<16x8xf32>, vector<16x8xf32> -> vector<16x8xf32>
    %442 = vector.extract_strided_slice %424 {offsets = [0, 8], sizes = [16, 8], strides = [1, 1]} : vector<16x32xf32> to vector<16x8xf32>
    %443 = vector.extract_strided_slice %425 {offsets = [0, 8], sizes = [16, 8], strides = [1, 1]} : vector<16x32xf32> to vector<16x8xf32>
    %cst_157 = arith.constant dense<0.000000e+00> : vector<16x16xf32>
    %444 = tpu.matmul %442, %443, %cst_157 {dimension_numbers = #tpu.dot_dimension_numbers<[1], [1], [0], [0], [0, 0, 1, 0], [], []>} : vector<16x8xf32>, vector<16x8xf32>, vector<16x16xf32> -> vector<16x16xf32>
    %445 = arith.addf %444, %57 : vector<16x16xf32>
    %cst_158 = arith.constant dense<0xFF800000> : vector<16xf32>
    %446 = vector.multi_reduction <maximumf>, %445, %cst_158 [1] : vector<16x16xf32> to vector<16xf32>
    %447 = vector.shape_cast %446 : vector<16xf32> to vector<16x1xf32>
    %448 = vector.broadcast %447 : vector<16x1xf32> to vector<16x16xf32>
    %449 = arith.subf %445, %448 : vector<16x16xf32>
    %450 = math.exp %449 : vector<16x16xf32>
    %cst_159 = arith.constant dense<0.000000e+00> : vector<16xf32>
    %451 = vector.multi_reduction <add>, %450, %cst_159 [1] : vector<16x16xf32> to vector<16xf32>
    %452 = vector.shape_cast %451 : vector<16xf32> to vector<16x1xf32>
    %453 = vector.broadcast %452 : vector<16x1xf32> to vector<16x16xf32>
    %454 = arith.divf %450, %453 : vector<16x16xf32>
    %455 = vector.extract_strided_slice %426 {offsets = [0, 8], sizes = [16, 8], strides = [1, 1]} : vector<16x32xf32> to vector<16x8xf32>
    %cst_160 = arith.constant dense<0.000000e+00> : vector<16x8xf32>
    %456 = tpu.matmul %454, %455, %cst_160 {dimension_numbers = #tpu.dot_dimension_numbers<[1], [0], [0], [1], [0, 0, 1, 1], [], []>} : vector<16x16xf32>, vector<16x8xf32>, vector<16x8xf32> -> vector<16x8xf32>
    %457 = vector.extract_strided_slice %424 {offsets = [0, 16], sizes = [16, 8], strides = [1, 1]} : vector<16x32xf32> to vector<16x8xf32>
    %458 = vector.extract_strided_slice %425 {offsets = [0, 16], sizes = [16, 8], strides = [1, 1]} : vector<16x32xf32> to vector<16x8xf32>
    %cst_161 = arith.constant dense<0.000000e+00> : vector<16x16xf32>
    %459 = tpu.matmul %457, %458, %cst_161 {dimension_numbers = #tpu.dot_dimension_numbers<[1], [1], [0], [0], [0, 0, 1, 0], [], []>} : vector<16x8xf32>, vector<16x8xf32>, vector<16x16xf32> -> vector<16x16xf32>
    %460 = arith.addf %459, %57 : vector<16x16xf32>
    %cst_162 = arith.constant dense<0xFF800000> : vector<16xf32>
    %461 = vector.multi_reduction <maximumf>, %460, %cst_162 [1] : vector<16x16xf32> to vector<16xf32>
    %462 = vector.shape_cast %461 : vector<16xf32> to vector<16x1xf32>
    %463 = vector.broadcast %462 : vector<16x1xf32> to vector<16x16xf32>
    %464 = arith.subf %460, %463 : vector<16x16xf32>
    %465 = math.exp %464 : vector<16x16xf32>
    %cst_163 = arith.constant dense<0.000000e+00> : vector<16xf32>
    %466 = vector.multi_reduction <add>, %465, %cst_163 [1] : vector<16x16xf32> to vector<16xf32>
    %467 = vector.shape_cast %466 : vector<16xf32> to vector<16x1xf32>
    %468 = vector.broadcast %467 : vector<16x1xf32> to vector<16x16xf32>
    %469 = arith.divf %465, %468 : vector<16x16xf32>
    %470 = vector.extract_strided_slice %426 {offsets = [0, 16], sizes = [16, 8], strides = [1, 1]} : vector<16x32xf32> to vector<16x8xf32>
    %cst_164 = arith.constant dense<0.000000e+00> : vector<16x8xf32>
    %471 = tpu.matmul %469, %470, %cst_164 {dimension_numbers = #tpu.dot_dimension_numbers<[1], [0], [0], [1], [0, 0, 1, 1], [], []>} : vector<16x16xf32>, vector<16x8xf32>, vector<16x8xf32> -> vector<16x8xf32>
    %472 = vector.extract_strided_slice %424 {offsets = [0, 24], sizes = [16, 8], strides = [1, 1]} : vector<16x32xf32> to vector<16x8xf32>
    %473 = vector.extract_strided_slice %425 {offsets = [0, 24], sizes = [16, 8], strides = [1, 1]} : vector<16x32xf32> to vector<16x8xf32>
    %cst_165 = arith.constant dense<0.000000e+00> : vector<16x16xf32>
    %474 = tpu.matmul %472, %473, %cst_165 {dimension_numbers = #tpu.dot_dimension_numbers<[1], [1], [0], [0], [0, 0, 1, 0], [], []>} : vector<16x8xf32>, vector<16x8xf32>, vector<16x16xf32> -> vector<16x16xf32>
    %475 = arith.addf %474, %57 : vector<16x16xf32>
    %cst_166 = arith.constant dense<0xFF800000> : vector<16xf32>
    %476 = vector.multi_reduction <maximumf>, %475, %cst_166 [1] : vector<16x16xf32> to vector<16xf32>
    %477 = vector.shape_cast %476 : vector<16xf32> to vector<16x1xf32>
    %478 = vector.broadcast %477 : vector<16x1xf32> to vector<16x16xf32>
    %479 = arith.subf %475, %478 : vector<16x16xf32>
    %480 = math.exp %479 : vector<16x16xf32>
    %cst_167 = arith.constant dense<0.000000e+00> : vector<16xf32>
    %481 = vector.multi_reduction <add>, %480, %cst_167 [1] : vector<16x16xf32> to vector<16xf32>
    %482 = vector.shape_cast %481 : vector<16xf32> to vector<16x1xf32>
    %483 = vector.broadcast %482 : vector<16x1xf32> to vector<16x16xf32>
    %484 = arith.divf %480, %483 : vector<16x16xf32>
    %485 = vector.extract_strided_slice %426 {offsets = [0, 24], sizes = [16, 8], strides = [1, 1]} : vector<16x32xf32> to vector<16x8xf32>
    %cst_168 = arith.constant dense<0.000000e+00> : vector<16x8xf32>
    %486 = tpu.matmul %484, %485, %cst_168 {dimension_numbers = #tpu.dot_dimension_numbers<[1], [0], [0], [1], [0, 0, 1, 1], [], []>} : vector<16x16xf32>, vector<16x8xf32>, vector<16x8xf32> -> vector<16x8xf32>
    %487 = tpu.concatenate %441, %456, %471, %486 in 1 : vector<16x8xf32>, vector<16x8xf32>, vector<16x8xf32>, vector<16x8xf32> -> vector<16x32xf32>
    %c352 = arith.constant 352 : index
    %c0_169 = arith.constant 0 : index
    %488 = vector.load %arg4[%c352, %c0_169] : memref<872x128xf32, #tpu.memory_space<vmem>>, vector<32x32xf32>
    %c19 = arith.constant 19 : index
    %c0_170 = arith.constant 0 : index
    %c0_171 = arith.constant 0 : index
    %489 = vector.load %arg5[%c19, %c0_170, %c0_171] : memref<45x1x128xf32, #tpu.memory_space<vmem>>, vector<1x1x128xf32>
    %490 = vector.shape_cast %489 : vector<1x1x128xf32> to vector<1x128xf32>
    %491 = vector.extract_strided_slice %490 {offsets = [0, 0], sizes = [1, 32], strides = [1, 1]} : vector<1x128xf32> to vector<1x32xf32>
    %cst_172 = arith.constant dense<0.000000e+00> : vector<16x32xf32>
    %492 = tpu.matmul %487, %488, %cst_172 {dimension_numbers = #tpu.dot_dimension_numbers<[1], [0], [0], [1], [0, 0, 1, 1], [], []>} : vector<16x32xf32>, vector<32x32xf32>, vector<16x32xf32> -> vector<16x32xf32>
    %493 = vector.broadcast %491 : vector<1x32xf32> to vector<16x32xf32>
    %494 = arith.addf %492, %493 : vector<16x32xf32>
    %495 = arith.addf %94, %494 : vector<16x32xf32>
    %c25 = arith.constant 25 : index
    %c0_173 = arith.constant 0 : index
    %c0_174 = arith.constant 0 : index
    %496 = vector.load %arg5[%c25, %c0_173, %c0_174] : memref<45x1x128xf32, #tpu.memory_space<vmem>>, vector<1x1x128xf32>
    %497 = vector.shape_cast %496 : vector<1x1x128xf32> to vector<1x128xf32>
    %498 = vector.extract_strided_slice %497 {offsets = [0, 0], sizes = [1, 32], strides = [1, 1]} : vector<1x128xf32> to vector<1x32xf32>
    %c26 = arith.constant 26 : index
    %c0_175 = arith.constant 0 : index
    %c0_176 = arith.constant 0 : index
    %499 = vector.load %arg5[%c26, %c0_175, %c0_176] : memref<45x1x128xf32, #tpu.memory_space<vmem>>, vector<1x1x128xf32>
    %500 = vector.shape_cast %499 : vector<1x1x128xf32> to vector<1x128xf32>
    %501 = vector.extract_strided_slice %500 {offsets = [0, 0], sizes = [1, 32], strides = [1, 1]} : vector<1x128xf32> to vector<1x32xf32>
    %cst_177 = arith.constant dense<0.000000e+00> : vector<16xf32>
    %502 = vector.multi_reduction <add>, %495, %cst_177 [1] : vector<16x32xf32> to vector<16xf32>
    %503 = vector.shape_cast %502 : vector<16xf32> to vector<16x1xf32>
    %cst_178 = arith.constant 3.200000e+01 : f32
    %504 = vector.broadcast %cst_178 : f32 to vector<16x1xf32>
    %505 = arith.divf %503, %504 : vector<16x1xf32>
    %506 = vector.broadcast %505 : vector<16x1xf32> to vector<16x32xf32>
    %507 = arith.subf %495, %506 : vector<16x32xf32>
    %508 = arith.mulf %507, %507 : vector<16x32xf32>
    %cst_179 = arith.constant dense<0.000000e+00> : vector<16xf32>
    %509 = vector.multi_reduction <add>, %508, %cst_179 [1] : vector<16x32xf32> to vector<16xf32>
    %510 = vector.shape_cast %509 : vector<16xf32> to vector<16x1xf32>
    %cst_180 = arith.constant 3.200000e+01 : f32
    %511 = vector.broadcast %cst_180 : f32 to vector<16x1xf32>
    %512 = arith.divf %510, %511 : vector<16x1xf32>
    %cst_181 = arith.constant 9.99999974E-6 : f32
    %513 = vector.broadcast %cst_181 : f32 to vector<16x1xf32>
    %514 = arith.addf %512, %513 : vector<16x1xf32>
    %515 = math.rsqrt %514 : vector<16x1xf32>
    %516 = vector.broadcast %515 : vector<16x1xf32> to vector<16x32xf32>
    %517 = arith.mulf %507, %516 : vector<16x32xf32>
    %518 = vector.broadcast %498 : vector<1x32xf32> to vector<16x32xf32>
    %519 = arith.mulf %517, %518 : vector<16x32xf32>
    %520 = vector.broadcast %501 : vector<1x32xf32> to vector<16x32xf32>
    %521 = arith.addf %519, %520 : vector<16x32xf32>
    %c384 = arith.constant 384 : index
    %c0_182 = arith.constant 0 : index
    %522 = vector.load %arg4[%c384, %c0_182] : memref<872x128xf32, #tpu.memory_space<vmem>>, vector<32x32xf32>
    %c20 = arith.constant 20 : index
    %c0_183 = arith.constant 0 : index
    %c0_184 = arith.constant 0 : index
    %523 = vector.load %arg5[%c20, %c0_183, %c0_184] : memref<45x1x128xf32, #tpu.memory_space<vmem>>, vector<1x1x128xf32>
    %524 = vector.shape_cast %523 : vector<1x1x128xf32> to vector<1x128xf32>
    %525 = vector.extract_strided_slice %524 {offsets = [0, 0], sizes = [1, 32], strides = [1, 1]} : vector<1x128xf32> to vector<1x32xf32>
    %cst_185 = arith.constant dense<0.000000e+00> : vector<16x32xf32>
    %526 = tpu.matmul %521, %522, %cst_185 {dimension_numbers = #tpu.dot_dimension_numbers<[1], [0], [0], [1], [0, 0, 1, 1], [], []>} : vector<16x32xf32>, vector<32x32xf32>, vector<16x32xf32> -> vector<16x32xf32>
    %527 = vector.broadcast %525 : vector<1x32xf32> to vector<16x32xf32>
    %528 = arith.addf %526, %527 : vector<16x32xf32>
    %c416 = arith.constant 416 : index
    %c0_186 = arith.constant 0 : index
    %529 = vector.load %arg4[%c416, %c0_186] : memref<872x128xf32, #tpu.memory_space<vmem>>, vector<32x64xf32>
    %c21 = arith.constant 21 : index
    %c0_187 = arith.constant 0 : index
    %c0_188 = arith.constant 0 : index
    %530 = vector.load %arg5[%c21, %c0_187, %c0_188] : memref<45x1x128xf32, #tpu.memory_space<vmem>>, vector<1x1x128xf32>
    %531 = vector.shape_cast %530 : vector<1x1x128xf32> to vector<1x128xf32>
    %532 = vector.extract_strided_slice %531 {offsets = [0, 0], sizes = [1, 64], strides = [1, 1]} : vector<1x128xf32> to vector<1x64xf32>
    %cst_189 = arith.constant dense<0.000000e+00> : vector<16x64xf32>
    %533 = tpu.matmul %416, %529, %cst_189 {dimension_numbers = #tpu.dot_dimension_numbers<[1], [0], [0], [1], [0, 0, 1, 1], [], []>} : vector<16x32xf32>, vector<32x64xf32>, vector<16x64xf32> -> vector<16x64xf32>
    %534 = vector.broadcast %532 : vector<1x64xf32> to vector<16x64xf32>
    %535 = arith.addf %533, %534 : vector<16x64xf32>
    %536 = vector.extract_strided_slice %535 {offsets = [0, 0], sizes = [16, 32], strides = [1, 1]} : vector<16x64xf32> to vector<16x32xf32>
    %537 = vector.extract_strided_slice %535 {offsets = [0, 32], sizes = [16, 32], strides = [1, 1]} : vector<16x64xf32> to vector<16x32xf32>
    %538 = vector.extract_strided_slice %528 {offsets = [0, 0], sizes = [16, 8], strides = [1, 1]} : vector<16x32xf32> to vector<16x8xf32>
    %539 = vector.extract_strided_slice %536 {offsets = [0, 0], sizes = [16, 8], strides = [1, 1]} : vector<16x32xf32> to vector<16x8xf32>
    %cst_190 = arith.constant dense<0.000000e+00> : vector<16x16xf32>
    %540 = tpu.matmul %538, %539, %cst_190 {dimension_numbers = #tpu.dot_dimension_numbers<[1], [1], [0], [0], [0, 0, 1, 0], [], []>} : vector<16x8xf32>, vector<16x8xf32>, vector<16x16xf32> -> vector<16x16xf32>
    %541 = arith.addf %540, %85 : vector<16x16xf32>
    %cst_191 = arith.constant dense<0xFF800000> : vector<16xf32>
    %542 = vector.multi_reduction <maximumf>, %541, %cst_191 [1] : vector<16x16xf32> to vector<16xf32>
    %543 = vector.shape_cast %542 : vector<16xf32> to vector<16x1xf32>
    %544 = vector.broadcast %543 : vector<16x1xf32> to vector<16x16xf32>
    %545 = arith.subf %541, %544 : vector<16x16xf32>
    %546 = math.exp %545 : vector<16x16xf32>
    %cst_192 = arith.constant dense<0.000000e+00> : vector<16xf32>
    %547 = vector.multi_reduction <add>, %546, %cst_192 [1] : vector<16x16xf32> to vector<16xf32>
    %548 = vector.shape_cast %547 : vector<16xf32> to vector<16x1xf32>
    %549 = vector.broadcast %548 : vector<16x1xf32> to vector<16x16xf32>
    %550 = arith.divf %546, %549 : vector<16x16xf32>
    %551 = vector.extract_strided_slice %537 {offsets = [0, 0], sizes = [16, 8], strides = [1, 1]} : vector<16x32xf32> to vector<16x8xf32>
    %cst_193 = arith.constant dense<0.000000e+00> : vector<16x8xf32>
    %552 = tpu.matmul %550, %551, %cst_193 {dimension_numbers = #tpu.dot_dimension_numbers<[1], [0], [0], [1], [0, 0, 1, 1], [], []>} : vector<16x16xf32>, vector<16x8xf32>, vector<16x8xf32> -> vector<16x8xf32>
    %553 = vector.extract_strided_slice %528 {offsets = [0, 8], sizes = [16, 8], strides = [1, 1]} : vector<16x32xf32> to vector<16x8xf32>
    %554 = vector.extract_strided_slice %536 {offsets = [0, 8], sizes = [16, 8], strides = [1, 1]} : vector<16x32xf32> to vector<16x8xf32>
    %cst_194 = arith.constant dense<0.000000e+00> : vector<16x16xf32>
    %555 = tpu.matmul %553, %554, %cst_194 {dimension_numbers = #tpu.dot_dimension_numbers<[1], [1], [0], [0], [0, 0, 1, 0], [], []>} : vector<16x8xf32>, vector<16x8xf32>, vector<16x16xf32> -> vector<16x16xf32>
    %556 = arith.addf %555, %85 : vector<16x16xf32>
    %cst_195 = arith.constant dense<0xFF800000> : vector<16xf32>
    %557 = vector.multi_reduction <maximumf>, %556, %cst_195 [1] : vector<16x16xf32> to vector<16xf32>
    %558 = vector.shape_cast %557 : vector<16xf32> to vector<16x1xf32>
    %559 = vector.broadcast %558 : vector<16x1xf32> to vector<16x16xf32>
    %560 = arith.subf %556, %559 : vector<16x16xf32>
    %561 = math.exp %560 : vector<16x16xf32>
    %cst_196 = arith.constant dense<0.000000e+00> : vector<16xf32>
    %562 = vector.multi_reduction <add>, %561, %cst_196 [1] : vector<16x16xf32> to vector<16xf32>
    %563 = vector.shape_cast %562 : vector<16xf32> to vector<16x1xf32>
    %564 = vector.broadcast %563 : vector<16x1xf32> to vector<16x16xf32>
    %565 = arith.divf %561, %564 : vector<16x16xf32>
    %566 = vector.extract_strided_slice %537 {offsets = [0, 8], sizes = [16, 8], strides = [1, 1]} : vector<16x32xf32> to vector<16x8xf32>
    %cst_197 = arith.constant dense<0.000000e+00> : vector<16x8xf32>
    %567 = tpu.matmul %565, %566, %cst_197 {dimension_numbers = #tpu.dot_dimension_numbers<[1], [0], [0], [1], [0, 0, 1, 1], [], []>} : vector<16x16xf32>, vector<16x8xf32>, vector<16x8xf32> -> vector<16x8xf32>
    %568 = vector.extract_strided_slice %528 {offsets = [0, 16], sizes = [16, 8], strides = [1, 1]} : vector<16x32xf32> to vector<16x8xf32>
    %569 = vector.extract_strided_slice %536 {offsets = [0, 16], sizes = [16, 8], strides = [1, 1]} : vector<16x32xf32> to vector<16x8xf32>
    %cst_198 = arith.constant dense<0.000000e+00> : vector<16x16xf32>
    %570 = tpu.matmul %568, %569, %cst_198 {dimension_numbers = #tpu.dot_dimension_numbers<[1], [1], [0], [0], [0, 0, 1, 0], [], []>} : vector<16x8xf32>, vector<16x8xf32>, vector<16x16xf32> -> vector<16x16xf32>
    %571 = arith.addf %570, %85 : vector<16x16xf32>
    %cst_199 = arith.constant dense<0xFF800000> : vector<16xf32>
    %572 = vector.multi_reduction <maximumf>, %571, %cst_199 [1] : vector<16x16xf32> to vector<16xf32>
    %573 = vector.shape_cast %572 : vector<16xf32> to vector<16x1xf32>
    %574 = vector.broadcast %573 : vector<16x1xf32> to vector<16x16xf32>
    %575 = arith.subf %571, %574 : vector<16x16xf32>
    %576 = math.exp %575 : vector<16x16xf32>
    %cst_200 = arith.constant dense<0.000000e+00> : vector<16xf32>
    %577 = vector.multi_reduction <add>, %576, %cst_200 [1] : vector<16x16xf32> to vector<16xf32>
    %578 = vector.shape_cast %577 : vector<16xf32> to vector<16x1xf32>
    %579 = vector.broadcast %578 : vector<16x1xf32> to vector<16x16xf32>
    %580 = arith.divf %576, %579 : vector<16x16xf32>
    %581 = vector.extract_strided_slice %537 {offsets = [0, 16], sizes = [16, 8], strides = [1, 1]} : vector<16x32xf32> to vector<16x8xf32>
    %cst_201 = arith.constant dense<0.000000e+00> : vector<16x8xf32>
    %582 = tpu.matmul %580, %581, %cst_201 {dimension_numbers = #tpu.dot_dimension_numbers<[1], [0], [0], [1], [0, 0, 1, 1], [], []>} : vector<16x16xf32>, vector<16x8xf32>, vector<16x8xf32> -> vector<16x8xf32>
    %583 = vector.extract_strided_slice %528 {offsets = [0, 24], sizes = [16, 8], strides = [1, 1]} : vector<16x32xf32> to vector<16x8xf32>
    %584 = vector.extract_strided_slice %536 {offsets = [0, 24], sizes = [16, 8], strides = [1, 1]} : vector<16x32xf32> to vector<16x8xf32>
    %cst_202 = arith.constant dense<0.000000e+00> : vector<16x16xf32>
    %585 = tpu.matmul %583, %584, %cst_202 {dimension_numbers = #tpu.dot_dimension_numbers<[1], [1], [0], [0], [0, 0, 1, 0], [], []>} : vector<16x8xf32>, vector<16x8xf32>, vector<16x16xf32> -> vector<16x16xf32>
    %586 = arith.addf %585, %85 : vector<16x16xf32>
    %cst_203 = arith.constant dense<0xFF800000> : vector<16xf32>
    %587 = vector.multi_reduction <maximumf>, %586, %cst_203 [1] : vector<16x16xf32> to vector<16xf32>
    %588 = vector.shape_cast %587 : vector<16xf32> to vector<16x1xf32>
    %589 = vector.broadcast %588 : vector<16x1xf32> to vector<16x16xf32>
    %590 = arith.subf %586, %589 : vector<16x16xf32>
    %591 = math.exp %590 : vector<16x16xf32>
    %cst_204 = arith.constant dense<0.000000e+00> : vector<16xf32>
    %592 = vector.multi_reduction <add>, %591, %cst_204 [1] : vector<16x16xf32> to vector<16xf32>
    %593 = vector.shape_cast %592 : vector<16xf32> to vector<16x1xf32>
    %594 = vector.broadcast %593 : vector<16x1xf32> to vector<16x16xf32>
    %595 = arith.divf %591, %594 : vector<16x16xf32>
    %596 = vector.extract_strided_slice %537 {offsets = [0, 24], sizes = [16, 8], strides = [1, 1]} : vector<16x32xf32> to vector<16x8xf32>
    %cst_205 = arith.constant dense<0.000000e+00> : vector<16x8xf32>
    %597 = tpu.matmul %595, %596, %cst_205 {dimension_numbers = #tpu.dot_dimension_numbers<[1], [0], [0], [1], [0, 0, 1, 1], [], []>} : vector<16x16xf32>, vector<16x8xf32>, vector<16x8xf32> -> vector<16x8xf32>
    %598 = tpu.concatenate %552, %567, %582, %597 in 1 : vector<16x8xf32>, vector<16x8xf32>, vector<16x8xf32>, vector<16x8xf32> -> vector<16x32xf32>
    %c448 = arith.constant 448 : index
    %c0_206 = arith.constant 0 : index
    %599 = vector.load %arg4[%c448, %c0_206] : memref<872x128xf32, #tpu.memory_space<vmem>>, vector<32x32xf32>
    %c22 = arith.constant 22 : index
    %c0_207 = arith.constant 0 : index
    %c0_208 = arith.constant 0 : index
    %600 = vector.load %arg5[%c22, %c0_207, %c0_208] : memref<45x1x128xf32, #tpu.memory_space<vmem>>, vector<1x1x128xf32>
    %601 = vector.shape_cast %600 : vector<1x1x128xf32> to vector<1x128xf32>
    %602 = vector.extract_strided_slice %601 {offsets = [0, 0], sizes = [1, 32], strides = [1, 1]} : vector<1x128xf32> to vector<1x32xf32>
    %cst_209 = arith.constant dense<0.000000e+00> : vector<16x32xf32>
    %603 = tpu.matmul %598, %599, %cst_209 {dimension_numbers = #tpu.dot_dimension_numbers<[1], [0], [0], [1], [0, 0, 1, 1], [], []>} : vector<16x32xf32>, vector<32x32xf32>, vector<16x32xf32> -> vector<16x32xf32>
    %604 = vector.broadcast %602 : vector<1x32xf32> to vector<16x32xf32>
    %605 = arith.addf %603, %604 : vector<16x32xf32>
    %606 = arith.addf %521, %605 : vector<16x32xf32>
    %c27 = arith.constant 27 : index
    %c0_210 = arith.constant 0 : index
    %c0_211 = arith.constant 0 : index
    %607 = vector.load %arg5[%c27, %c0_210, %c0_211] : memref<45x1x128xf32, #tpu.memory_space<vmem>>, vector<1x1x128xf32>
    %608 = vector.shape_cast %607 : vector<1x1x128xf32> to vector<1x128xf32>
    %609 = vector.extract_strided_slice %608 {offsets = [0, 0], sizes = [1, 32], strides = [1, 1]} : vector<1x128xf32> to vector<1x32xf32>
    %c28 = arith.constant 28 : index
    %c0_212 = arith.constant 0 : index
    %c0_213 = arith.constant 0 : index
    %610 = vector.load %arg5[%c28, %c0_212, %c0_213] : memref<45x1x128xf32, #tpu.memory_space<vmem>>, vector<1x1x128xf32>
    %611 = vector.shape_cast %610 : vector<1x1x128xf32> to vector<1x128xf32>
    %612 = vector.extract_strided_slice %611 {offsets = [0, 0], sizes = [1, 32], strides = [1, 1]} : vector<1x128xf32> to vector<1x32xf32>
    %cst_214 = arith.constant dense<0.000000e+00> : vector<16xf32>
    %613 = vector.multi_reduction <add>, %606, %cst_214 [1] : vector<16x32xf32> to vector<16xf32>
    %614 = vector.shape_cast %613 : vector<16xf32> to vector<16x1xf32>
    %cst_215 = arith.constant 3.200000e+01 : f32
    %615 = vector.broadcast %cst_215 : f32 to vector<16x1xf32>
    %616 = arith.divf %614, %615 : vector<16x1xf32>
    %617 = vector.broadcast %616 : vector<16x1xf32> to vector<16x32xf32>
    %618 = arith.subf %606, %617 : vector<16x32xf32>
    %619 = arith.mulf %618, %618 : vector<16x32xf32>
    %cst_216 = arith.constant dense<0.000000e+00> : vector<16xf32>
    %620 = vector.multi_reduction <add>, %619, %cst_216 [1] : vector<16x32xf32> to vector<16xf32>
    %621 = vector.shape_cast %620 : vector<16xf32> to vector<16x1xf32>
    %cst_217 = arith.constant 3.200000e+01 : f32
    %622 = vector.broadcast %cst_217 : f32 to vector<16x1xf32>
    %623 = arith.divf %621, %622 : vector<16x1xf32>
    %cst_218 = arith.constant 9.99999974E-6 : f32
    %624 = vector.broadcast %cst_218 : f32 to vector<16x1xf32>
    %625 = arith.addf %623, %624 : vector<16x1xf32>
    %626 = math.rsqrt %625 : vector<16x1xf32>
    %627 = vector.broadcast %626 : vector<16x1xf32> to vector<16x32xf32>
    %628 = arith.mulf %618, %627 : vector<16x32xf32>
    %629 = vector.broadcast %609 : vector<1x32xf32> to vector<16x32xf32>
    %630 = arith.mulf %628, %629 : vector<16x32xf32>
    %631 = vector.broadcast %612 : vector<1x32xf32> to vector<16x32xf32>
    %632 = arith.addf %630, %631 : vector<16x32xf32>
    %c480 = arith.constant 480 : index
    %c0_219 = arith.constant 0 : index
    %633 = vector.load %arg4[%c480, %c0_219] : memref<872x128xf32, #tpu.memory_space<vmem>>, vector<32x64xf32>
    %c23 = arith.constant 23 : index
    %c0_220 = arith.constant 0 : index
    %c0_221 = arith.constant 0 : index
    %634 = vector.load %arg5[%c23, %c0_220, %c0_221] : memref<45x1x128xf32, #tpu.memory_space<vmem>>, vector<1x1x128xf32>
    %635 = vector.shape_cast %634 : vector<1x1x128xf32> to vector<1x128xf32>
    %636 = vector.extract_strided_slice %635 {offsets = [0, 0], sizes = [1, 64], strides = [1, 1]} : vector<1x128xf32> to vector<1x64xf32>
    %cst_222 = arith.constant dense<0.000000e+00> : vector<16x64xf32>
    %637 = tpu.matmul %632, %633, %cst_222 {dimension_numbers = #tpu.dot_dimension_numbers<[1], [0], [0], [1], [0, 0, 1, 1], [], []>} : vector<16x32xf32>, vector<32x64xf32>, vector<16x64xf32> -> vector<16x64xf32>
    %638 = vector.broadcast %636 : vector<1x64xf32> to vector<16x64xf32>
    %639 = arith.addf %637, %638 : vector<16x64xf32>
    %cst_223 = arith.constant 0.000000e+00 : f32
    %640 = vector.broadcast %cst_223 : f32 to vector<16x64xf32>
    %641 = arith.maximumf %639, %640 : vector<16x64xf32>
    %c512 = arith.constant 512 : index
    %c0_224 = arith.constant 0 : index
    %642 = vector.load %arg4[%c512, %c0_224] : memref<872x128xf32, #tpu.memory_space<vmem>>, vector<64x32xf32>
    %c24 = arith.constant 24 : index
    %c0_225 = arith.constant 0 : index
    %c0_226 = arith.constant 0 : index
    %643 = vector.load %arg5[%c24, %c0_225, %c0_226] : memref<45x1x128xf32, #tpu.memory_space<vmem>>, vector<1x1x128xf32>
    %644 = vector.shape_cast %643 : vector<1x1x128xf32> to vector<1x128xf32>
    %645 = vector.extract_strided_slice %644 {offsets = [0, 0], sizes = [1, 32], strides = [1, 1]} : vector<1x128xf32> to vector<1x32xf32>
    %cst_227 = arith.constant dense<0.000000e+00> : vector<16x32xf32>
    %646 = tpu.matmul %641, %642, %cst_227 {dimension_numbers = #tpu.dot_dimension_numbers<[1], [0], [0], [1], [0, 0, 1, 1], [], []>} : vector<16x64xf32>, vector<64x32xf32>, vector<16x32xf32> -> vector<16x32xf32>
    %647 = vector.broadcast %645 : vector<1x32xf32> to vector<16x32xf32>
    %648 = arith.addf %646, %647 : vector<16x32xf32>
    %649 = arith.addf %632, %648 : vector<16x32xf32>
    %c29 = arith.constant 29 : index
    %c0_228 = arith.constant 0 : index
    %c0_229 = arith.constant 0 : index
    %650 = vector.load %arg5[%c29, %c0_228, %c0_229] : memref<45x1x128xf32, #tpu.memory_space<vmem>>, vector<1x1x128xf32>
    %651 = vector.shape_cast %650 : vector<1x1x128xf32> to vector<1x128xf32>
    %652 = vector.extract_strided_slice %651 {offsets = [0, 0], sizes = [1, 32], strides = [1, 1]} : vector<1x128xf32> to vector<1x32xf32>
    %c30 = arith.constant 30 : index
    %c0_230 = arith.constant 0 : index
    %c0_231 = arith.constant 0 : index
    %653 = vector.load %arg5[%c30, %c0_230, %c0_231] : memref<45x1x128xf32, #tpu.memory_space<vmem>>, vector<1x1x128xf32>
    %654 = vector.shape_cast %653 : vector<1x1x128xf32> to vector<1x128xf32>
    %655 = vector.extract_strided_slice %654 {offsets = [0, 0], sizes = [1, 32], strides = [1, 1]} : vector<1x128xf32> to vector<1x32xf32>
    %cst_232 = arith.constant dense<0.000000e+00> : vector<16xf32>
    %656 = vector.multi_reduction <add>, %649, %cst_232 [1] : vector<16x32xf32> to vector<16xf32>
    %657 = vector.shape_cast %656 : vector<16xf32> to vector<16x1xf32>
    %cst_233 = arith.constant 3.200000e+01 : f32
    %658 = vector.broadcast %cst_233 : f32 to vector<16x1xf32>
    %659 = arith.divf %657, %658 : vector<16x1xf32>
    %660 = vector.broadcast %659 : vector<16x1xf32> to vector<16x32xf32>
    %661 = arith.subf %649, %660 : vector<16x32xf32>
    %662 = arith.mulf %661, %661 : vector<16x32xf32>
    %cst_234 = arith.constant dense<0.000000e+00> : vector<16xf32>
    %663 = vector.multi_reduction <add>, %662, %cst_234 [1] : vector<16x32xf32> to vector<16xf32>
    %664 = vector.shape_cast %663 : vector<16xf32> to vector<16x1xf32>
    %cst_235 = arith.constant 3.200000e+01 : f32
    %665 = vector.broadcast %cst_235 : f32 to vector<16x1xf32>
    %666 = arith.divf %664, %665 : vector<16x1xf32>
    %cst_236 = arith.constant 9.99999974E-6 : f32
    %667 = vector.broadcast %cst_236 : f32 to vector<16x1xf32>
    %668 = arith.addf %666, %667 : vector<16x1xf32>
    %669 = math.rsqrt %668 : vector<16x1xf32>
    %670 = vector.broadcast %669 : vector<16x1xf32> to vector<16x32xf32>
    %671 = arith.mulf %661, %670 : vector<16x32xf32>
    %672 = vector.broadcast %652 : vector<1x32xf32> to vector<16x32xf32>
    %673 = arith.mulf %671, %672 : vector<16x32xf32>
    %674 = vector.broadcast %655 : vector<1x32xf32> to vector<16x32xf32>
    %675 = arith.addf %673, %674 : vector<16x32xf32>
    %c576 = arith.constant 576 : index
    %c0_237 = arith.constant 0 : index
    %676 = vector.load %arg4[%c576, %c0_237] : memref<872x128xf32, #tpu.memory_space<vmem>>, vector<32x96xf32>
    %c31 = arith.constant 31 : index
    %c0_238 = arith.constant 0 : index
    %c0_239 = arith.constant 0 : index
    %677 = vector.load %arg5[%c31, %c0_238, %c0_239] : memref<45x1x128xf32, #tpu.memory_space<vmem>>, vector<1x1x128xf32>
    %678 = vector.shape_cast %677 : vector<1x1x128xf32> to vector<1x128xf32>
    %679 = vector.extract_strided_slice %678 {offsets = [0, 0], sizes = [1, 96], strides = [1, 1]} : vector<1x128xf32> to vector<1x96xf32>
    %cst_240 = arith.constant dense<0.000000e+00> : vector<16x96xf32>
    %680 = tpu.matmul %675, %676, %cst_240 {dimension_numbers = #tpu.dot_dimension_numbers<[1], [0], [0], [1], [0, 0, 1, 1], [], []>} : vector<16x32xf32>, vector<32x96xf32>, vector<16x96xf32> -> vector<16x96xf32>
    %681 = vector.broadcast %679 : vector<1x96xf32> to vector<16x96xf32>
    %682 = arith.addf %680, %681 : vector<16x96xf32>
    %683 = vector.extract_strided_slice %682 {offsets = [0, 0], sizes = [16, 32], strides = [1, 1]} : vector<16x96xf32> to vector<16x32xf32>
    %684 = vector.extract_strided_slice %682 {offsets = [0, 32], sizes = [16, 32], strides = [1, 1]} : vector<16x96xf32> to vector<16x32xf32>
    %685 = vector.extract_strided_slice %682 {offsets = [0, 64], sizes = [16, 32], strides = [1, 1]} : vector<16x96xf32> to vector<16x32xf32>
    %686 = vector.extract_strided_slice %683 {offsets = [0, 0], sizes = [16, 8], strides = [1, 1]} : vector<16x32xf32> to vector<16x8xf32>
    %687 = vector.extract_strided_slice %684 {offsets = [0, 0], sizes = [16, 8], strides = [1, 1]} : vector<16x32xf32> to vector<16x8xf32>
    %cst_241 = arith.constant dense<0.000000e+00> : vector<16x16xf32>
    %688 = tpu.matmul %686, %687, %cst_241 {dimension_numbers = #tpu.dot_dimension_numbers<[1], [1], [0], [0], [0, 0, 1, 0], [], []>} : vector<16x8xf32>, vector<16x8xf32>, vector<16x16xf32> -> vector<16x16xf32>
    %689 = arith.addf %688, %57 : vector<16x16xf32>
    %cst_242 = arith.constant dense<0xFF800000> : vector<16xf32>
    %690 = vector.multi_reduction <maximumf>, %689, %cst_242 [1] : vector<16x16xf32> to vector<16xf32>
    %691 = vector.shape_cast %690 : vector<16xf32> to vector<16x1xf32>
    %692 = vector.broadcast %691 : vector<16x1xf32> to vector<16x16xf32>
    %693 = arith.subf %689, %692 : vector<16x16xf32>
    %694 = math.exp %693 : vector<16x16xf32>
    %cst_243 = arith.constant dense<0.000000e+00> : vector<16xf32>
    %695 = vector.multi_reduction <add>, %694, %cst_243 [1] : vector<16x16xf32> to vector<16xf32>
    %696 = vector.shape_cast %695 : vector<16xf32> to vector<16x1xf32>
    %697 = vector.broadcast %696 : vector<16x1xf32> to vector<16x16xf32>
    %698 = arith.divf %694, %697 : vector<16x16xf32>
    %699 = vector.extract_strided_slice %685 {offsets = [0, 0], sizes = [16, 8], strides = [1, 1]} : vector<16x32xf32> to vector<16x8xf32>
    %cst_244 = arith.constant dense<0.000000e+00> : vector<16x8xf32>
    %700 = tpu.matmul %698, %699, %cst_244 {dimension_numbers = #tpu.dot_dimension_numbers<[1], [0], [0], [1], [0, 0, 1, 1], [], []>} : vector<16x16xf32>, vector<16x8xf32>, vector<16x8xf32> -> vector<16x8xf32>
    %701 = vector.extract_strided_slice %683 {offsets = [0, 8], sizes = [16, 8], strides = [1, 1]} : vector<16x32xf32> to vector<16x8xf32>
    %702 = vector.extract_strided_slice %684 {offsets = [0, 8], sizes = [16, 8], strides = [1, 1]} : vector<16x32xf32> to vector<16x8xf32>
    %cst_245 = arith.constant dense<0.000000e+00> : vector<16x16xf32>
    %703 = tpu.matmul %701, %702, %cst_245 {dimension_numbers = #tpu.dot_dimension_numbers<[1], [1], [0], [0], [0, 0, 1, 0], [], []>} : vector<16x8xf32>, vector<16x8xf32>, vector<16x16xf32> -> vector<16x16xf32>
    %704 = arith.addf %703, %57 : vector<16x16xf32>
    %cst_246 = arith.constant dense<0xFF800000> : vector<16xf32>
    %705 = vector.multi_reduction <maximumf>, %704, %cst_246 [1] : vector<16x16xf32> to vector<16xf32>
    %706 = vector.shape_cast %705 : vector<16xf32> to vector<16x1xf32>
    %707 = vector.broadcast %706 : vector<16x1xf32> to vector<16x16xf32>
    %708 = arith.subf %704, %707 : vector<16x16xf32>
    %709 = math.exp %708 : vector<16x16xf32>
    %cst_247 = arith.constant dense<0.000000e+00> : vector<16xf32>
    %710 = vector.multi_reduction <add>, %709, %cst_247 [1] : vector<16x16xf32> to vector<16xf32>
    %711 = vector.shape_cast %710 : vector<16xf32> to vector<16x1xf32>
    %712 = vector.broadcast %711 : vector<16x1xf32> to vector<16x16xf32>
    %713 = arith.divf %709, %712 : vector<16x16xf32>
    %714 = vector.extract_strided_slice %685 {offsets = [0, 8], sizes = [16, 8], strides = [1, 1]} : vector<16x32xf32> to vector<16x8xf32>
    %cst_248 = arith.constant dense<0.000000e+00> : vector<16x8xf32>
    %715 = tpu.matmul %713, %714, %cst_248 {dimension_numbers = #tpu.dot_dimension_numbers<[1], [0], [0], [1], [0, 0, 1, 1], [], []>} : vector<16x16xf32>, vector<16x8xf32>, vector<16x8xf32> -> vector<16x8xf32>
    %716 = vector.extract_strided_slice %683 {offsets = [0, 16], sizes = [16, 8], strides = [1, 1]} : vector<16x32xf32> to vector<16x8xf32>
    %717 = vector.extract_strided_slice %684 {offsets = [0, 16], sizes = [16, 8], strides = [1, 1]} : vector<16x32xf32> to vector<16x8xf32>
    %cst_249 = arith.constant dense<0.000000e+00> : vector<16x16xf32>
    %718 = tpu.matmul %716, %717, %cst_249 {dimension_numbers = #tpu.dot_dimension_numbers<[1], [1], [0], [0], [0, 0, 1, 0], [], []>} : vector<16x8xf32>, vector<16x8xf32>, vector<16x16xf32> -> vector<16x16xf32>
    %719 = arith.addf %718, %57 : vector<16x16xf32>
    %cst_250 = arith.constant dense<0xFF800000> : vector<16xf32>
    %720 = vector.multi_reduction <maximumf>, %719, %cst_250 [1] : vector<16x16xf32> to vector<16xf32>
    %721 = vector.shape_cast %720 : vector<16xf32> to vector<16x1xf32>
    %722 = vector.broadcast %721 : vector<16x1xf32> to vector<16x16xf32>
    %723 = arith.subf %719, %722 : vector<16x16xf32>
    %724 = math.exp %723 : vector<16x16xf32>
    %cst_251 = arith.constant dense<0.000000e+00> : vector<16xf32>
    %725 = vector.multi_reduction <add>, %724, %cst_251 [1] : vector<16x16xf32> to vector<16xf32>
    %726 = vector.shape_cast %725 : vector<16xf32> to vector<16x1xf32>
    %727 = vector.broadcast %726 : vector<16x1xf32> to vector<16x16xf32>
    %728 = arith.divf %724, %727 : vector<16x16xf32>
    %729 = vector.extract_strided_slice %685 {offsets = [0, 16], sizes = [16, 8], strides = [1, 1]} : vector<16x32xf32> to vector<16x8xf32>
    %cst_252 = arith.constant dense<0.000000e+00> : vector<16x8xf32>
    %730 = tpu.matmul %728, %729, %cst_252 {dimension_numbers = #tpu.dot_dimension_numbers<[1], [0], [0], [1], [0, 0, 1, 1], [], []>} : vector<16x16xf32>, vector<16x8xf32>, vector<16x8xf32> -> vector<16x8xf32>
    %731 = vector.extract_strided_slice %683 {offsets = [0, 24], sizes = [16, 8], strides = [1, 1]} : vector<16x32xf32> to vector<16x8xf32>
    %732 = vector.extract_strided_slice %684 {offsets = [0, 24], sizes = [16, 8], strides = [1, 1]} : vector<16x32xf32> to vector<16x8xf32>
    %cst_253 = arith.constant dense<0.000000e+00> : vector<16x16xf32>
    %733 = tpu.matmul %731, %732, %cst_253 {dimension_numbers = #tpu.dot_dimension_numbers<[1], [1], [0], [0], [0, 0, 1, 0], [], []>} : vector<16x8xf32>, vector<16x8xf32>, vector<16x16xf32> -> vector<16x16xf32>
    %734 = arith.addf %733, %57 : vector<16x16xf32>
    %cst_254 = arith.constant dense<0xFF800000> : vector<16xf32>
    %735 = vector.multi_reduction <maximumf>, %734, %cst_254 [1] : vector<16x16xf32> to vector<16xf32>
    %736 = vector.shape_cast %735 : vector<16xf32> to vector<16x1xf32>
    %737 = vector.broadcast %736 : vector<16x1xf32> to vector<16x16xf32>
    %738 = arith.subf %734, %737 : vector<16x16xf32>
    %739 = math.exp %738 : vector<16x16xf32>
    %cst_255 = arith.constant dense<0.000000e+00> : vector<16xf32>
    %740 = vector.multi_reduction <add>, %739, %cst_255 [1] : vector<16x16xf32> to vector<16xf32>
    %741 = vector.shape_cast %740 : vector<16xf32> to vector<16x1xf32>
    %742 = vector.broadcast %741 : vector<16x1xf32> to vector<16x16xf32>
    %743 = arith.divf %739, %742 : vector<16x16xf32>
    %744 = vector.extract_strided_slice %685 {offsets = [0, 24], sizes = [16, 8], strides = [1, 1]} : vector<16x32xf32> to vector<16x8xf32>
    %cst_256 = arith.constant dense<0.000000e+00> : vector<16x8xf32>
    %745 = tpu.matmul %743, %744, %cst_256 {dimension_numbers = #tpu.dot_dimension_numbers<[1], [0], [0], [1], [0, 0, 1, 1], [], []>} : vector<16x16xf32>, vector<16x8xf32>, vector<16x8xf32> -> vector<16x8xf32>
    %746 = tpu.concatenate %700, %715, %730, %745 in 1 : vector<16x8xf32>, vector<16x8xf32>, vector<16x8xf32>, vector<16x8xf32> -> vector<16x32xf32>
    %c608 = arith.constant 608 : index
    %c0_257 = arith.constant 0 : index
    %747 = vector.load %arg4[%c608, %c0_257] : memref<872x128xf32, #tpu.memory_space<vmem>>, vector<32x32xf32>
    %c32_258 = arith.constant 32 : index
    %c0_259 = arith.constant 0 : index
    %c0_260 = arith.constant 0 : index
    %748 = vector.load %arg5[%c32_258, %c0_259, %c0_260] : memref<45x1x128xf32, #tpu.memory_space<vmem>>, vector<1x1x128xf32>
    %749 = vector.shape_cast %748 : vector<1x1x128xf32> to vector<1x128xf32>
    %750 = vector.extract_strided_slice %749 {offsets = [0, 0], sizes = [1, 32], strides = [1, 1]} : vector<1x128xf32> to vector<1x32xf32>
    %cst_261 = arith.constant dense<0.000000e+00> : vector<16x32xf32>
    %751 = tpu.matmul %746, %747, %cst_261 {dimension_numbers = #tpu.dot_dimension_numbers<[1], [0], [0], [1], [0, 0, 1, 1], [], []>} : vector<16x32xf32>, vector<32x32xf32>, vector<16x32xf32> -> vector<16x32xf32>
    %752 = vector.broadcast %750 : vector<1x32xf32> to vector<16x32xf32>
    %753 = arith.addf %751, %752 : vector<16x32xf32>
    %754 = arith.addf %675, %753 : vector<16x32xf32>
    %c38 = arith.constant 38 : index
    %c0_262 = arith.constant 0 : index
    %c0_263 = arith.constant 0 : index
    %755 = vector.load %arg5[%c38, %c0_262, %c0_263] : memref<45x1x128xf32, #tpu.memory_space<vmem>>, vector<1x1x128xf32>
    %756 = vector.shape_cast %755 : vector<1x1x128xf32> to vector<1x128xf32>
    %757 = vector.extract_strided_slice %756 {offsets = [0, 0], sizes = [1, 32], strides = [1, 1]} : vector<1x128xf32> to vector<1x32xf32>
    %c39 = arith.constant 39 : index
    %c0_264 = arith.constant 0 : index
    %c0_265 = arith.constant 0 : index
    %758 = vector.load %arg5[%c39, %c0_264, %c0_265] : memref<45x1x128xf32, #tpu.memory_space<vmem>>, vector<1x1x128xf32>
    %759 = vector.shape_cast %758 : vector<1x1x128xf32> to vector<1x128xf32>
    %760 = vector.extract_strided_slice %759 {offsets = [0, 0], sizes = [1, 32], strides = [1, 1]} : vector<1x128xf32> to vector<1x32xf32>
    %cst_266 = arith.constant dense<0.000000e+00> : vector<16xf32>
    %761 = vector.multi_reduction <add>, %754, %cst_266 [1] : vector<16x32xf32> to vector<16xf32>
    %762 = vector.shape_cast %761 : vector<16xf32> to vector<16x1xf32>
    %cst_267 = arith.constant 3.200000e+01 : f32
    %763 = vector.broadcast %cst_267 : f32 to vector<16x1xf32>
    %764 = arith.divf %762, %763 : vector<16x1xf32>
    %765 = vector.broadcast %764 : vector<16x1xf32> to vector<16x32xf32>
    %766 = arith.subf %754, %765 : vector<16x32xf32>
    %767 = arith.mulf %766, %766 : vector<16x32xf32>
    %cst_268 = arith.constant dense<0.000000e+00> : vector<16xf32>
    %768 = vector.multi_reduction <add>, %767, %cst_268 [1] : vector<16x32xf32> to vector<16xf32>
    %769 = vector.shape_cast %768 : vector<16xf32> to vector<16x1xf32>
    %cst_269 = arith.constant 3.200000e+01 : f32
    %770 = vector.broadcast %cst_269 : f32 to vector<16x1xf32>
    %771 = arith.divf %769, %770 : vector<16x1xf32>
    %cst_270 = arith.constant 9.99999974E-6 : f32
    %772 = vector.broadcast %cst_270 : f32 to vector<16x1xf32>
    %773 = arith.addf %771, %772 : vector<16x1xf32>
    %774 = math.rsqrt %773 : vector<16x1xf32>
    %775 = vector.broadcast %774 : vector<16x1xf32> to vector<16x32xf32>
    %776 = arith.mulf %766, %775 : vector<16x32xf32>
    %777 = vector.broadcast %757 : vector<1x32xf32> to vector<16x32xf32>
    %778 = arith.mulf %776, %777 : vector<16x32xf32>
    %779 = vector.broadcast %760 : vector<1x32xf32> to vector<16x32xf32>
    %780 = arith.addf %778, %779 : vector<16x32xf32>
    %c640 = arith.constant 640 : index
    %c0_271 = arith.constant 0 : index
    %781 = vector.load %arg4[%c640, %c0_271] : memref<872x128xf32, #tpu.memory_space<vmem>>, vector<32x32xf32>
    %c33 = arith.constant 33 : index
    %c0_272 = arith.constant 0 : index
    %c0_273 = arith.constant 0 : index
    %782 = vector.load %arg5[%c33, %c0_272, %c0_273] : memref<45x1x128xf32, #tpu.memory_space<vmem>>, vector<1x1x128xf32>
    %783 = vector.shape_cast %782 : vector<1x1x128xf32> to vector<1x128xf32>
    %784 = vector.extract_strided_slice %783 {offsets = [0, 0], sizes = [1, 32], strides = [1, 1]} : vector<1x128xf32> to vector<1x32xf32>
    %cst_274 = arith.constant dense<0.000000e+00> : vector<16x32xf32>
    %785 = tpu.matmul %780, %781, %cst_274 {dimension_numbers = #tpu.dot_dimension_numbers<[1], [0], [0], [1], [0, 0, 1, 1], [], []>} : vector<16x32xf32>, vector<32x32xf32>, vector<16x32xf32> -> vector<16x32xf32>
    %786 = vector.broadcast %784 : vector<1x32xf32> to vector<16x32xf32>
    %787 = arith.addf %785, %786 : vector<16x32xf32>
    %c672 = arith.constant 672 : index
    %c0_275 = arith.constant 0 : index
    %788 = vector.load %arg4[%c672, %c0_275] : memref<872x128xf32, #tpu.memory_space<vmem>>, vector<32x64xf32>
    %c34 = arith.constant 34 : index
    %c0_276 = arith.constant 0 : index
    %c0_277 = arith.constant 0 : index
    %789 = vector.load %arg5[%c34, %c0_276, %c0_277] : memref<45x1x128xf32, #tpu.memory_space<vmem>>, vector<1x1x128xf32>
    %790 = vector.shape_cast %789 : vector<1x1x128xf32> to vector<1x128xf32>
    %791 = vector.extract_strided_slice %790 {offsets = [0, 0], sizes = [1, 64], strides = [1, 1]} : vector<1x128xf32> to vector<1x64xf32>
    %cst_278 = arith.constant dense<0.000000e+00> : vector<16x64xf32>
    %792 = tpu.matmul %416, %788, %cst_278 {dimension_numbers = #tpu.dot_dimension_numbers<[1], [0], [0], [1], [0, 0, 1, 1], [], []>} : vector<16x32xf32>, vector<32x64xf32>, vector<16x64xf32> -> vector<16x64xf32>
    %793 = vector.broadcast %791 : vector<1x64xf32> to vector<16x64xf32>
    %794 = arith.addf %792, %793 : vector<16x64xf32>
    %795 = vector.extract_strided_slice %794 {offsets = [0, 0], sizes = [16, 32], strides = [1, 1]} : vector<16x64xf32> to vector<16x32xf32>
    %796 = vector.extract_strided_slice %794 {offsets = [0, 32], sizes = [16, 32], strides = [1, 1]} : vector<16x64xf32> to vector<16x32xf32>
    %797 = vector.extract_strided_slice %787 {offsets = [0, 0], sizes = [16, 8], strides = [1, 1]} : vector<16x32xf32> to vector<16x8xf32>
    %798 = vector.extract_strided_slice %795 {offsets = [0, 0], sizes = [16, 8], strides = [1, 1]} : vector<16x32xf32> to vector<16x8xf32>
    %cst_279 = arith.constant dense<0.000000e+00> : vector<16x16xf32>
    %799 = tpu.matmul %797, %798, %cst_279 {dimension_numbers = #tpu.dot_dimension_numbers<[1], [1], [0], [0], [0, 0, 1, 0], [], []>} : vector<16x8xf32>, vector<16x8xf32>, vector<16x16xf32> -> vector<16x16xf32>
    %800 = arith.addf %799, %85 : vector<16x16xf32>
    %cst_280 = arith.constant dense<0xFF800000> : vector<16xf32>
    %801 = vector.multi_reduction <maximumf>, %800, %cst_280 [1] : vector<16x16xf32> to vector<16xf32>
    %802 = vector.shape_cast %801 : vector<16xf32> to vector<16x1xf32>
    %803 = vector.broadcast %802 : vector<16x1xf32> to vector<16x16xf32>
    %804 = arith.subf %800, %803 : vector<16x16xf32>
    %805 = math.exp %804 : vector<16x16xf32>
    %cst_281 = arith.constant dense<0.000000e+00> : vector<16xf32>
    %806 = vector.multi_reduction <add>, %805, %cst_281 [1] : vector<16x16xf32> to vector<16xf32>
    %807 = vector.shape_cast %806 : vector<16xf32> to vector<16x1xf32>
    %808 = vector.broadcast %807 : vector<16x1xf32> to vector<16x16xf32>
    %809 = arith.divf %805, %808 : vector<16x16xf32>
    %810 = vector.extract_strided_slice %796 {offsets = [0, 0], sizes = [16, 8], strides = [1, 1]} : vector<16x32xf32> to vector<16x8xf32>
    %cst_282 = arith.constant dense<0.000000e+00> : vector<16x8xf32>
    %811 = tpu.matmul %809, %810, %cst_282 {dimension_numbers = #tpu.dot_dimension_numbers<[1], [0], [0], [1], [0, 0, 1, 1], [], []>} : vector<16x16xf32>, vector<16x8xf32>, vector<16x8xf32> -> vector<16x8xf32>
    %812 = vector.extract_strided_slice %787 {offsets = [0, 8], sizes = [16, 8], strides = [1, 1]} : vector<16x32xf32> to vector<16x8xf32>
    %813 = vector.extract_strided_slice %795 {offsets = [0, 8], sizes = [16, 8], strides = [1, 1]} : vector<16x32xf32> to vector<16x8xf32>
    %cst_283 = arith.constant dense<0.000000e+00> : vector<16x16xf32>
    %814 = tpu.matmul %812, %813, %cst_283 {dimension_numbers = #tpu.dot_dimension_numbers<[1], [1], [0], [0], [0, 0, 1, 0], [], []>} : vector<16x8xf32>, vector<16x8xf32>, vector<16x16xf32> -> vector<16x16xf32>
    %815 = arith.addf %814, %85 : vector<16x16xf32>
    %cst_284 = arith.constant dense<0xFF800000> : vector<16xf32>
    %816 = vector.multi_reduction <maximumf>, %815, %cst_284 [1] : vector<16x16xf32> to vector<16xf32>
    %817 = vector.shape_cast %816 : vector<16xf32> to vector<16x1xf32>
    %818 = vector.broadcast %817 : vector<16x1xf32> to vector<16x16xf32>
    %819 = arith.subf %815, %818 : vector<16x16xf32>
    %820 = math.exp %819 : vector<16x16xf32>
    %cst_285 = arith.constant dense<0.000000e+00> : vector<16xf32>
    %821 = vector.multi_reduction <add>, %820, %cst_285 [1] : vector<16x16xf32> to vector<16xf32>
    %822 = vector.shape_cast %821 : vector<16xf32> to vector<16x1xf32>
    %823 = vector.broadcast %822 : vector<16x1xf32> to vector<16x16xf32>
    %824 = arith.divf %820, %823 : vector<16x16xf32>
    %825 = vector.extract_strided_slice %796 {offsets = [0, 8], sizes = [16, 8], strides = [1, 1]} : vector<16x32xf32> to vector<16x8xf32>
    %cst_286 = arith.constant dense<0.000000e+00> : vector<16x8xf32>
    %826 = tpu.matmul %824, %825, %cst_286 {dimension_numbers = #tpu.dot_dimension_numbers<[1], [0], [0], [1], [0, 0, 1, 1], [], []>} : vector<16x16xf32>, vector<16x8xf32>, vector<16x8xf32> -> vector<16x8xf32>
    %827 = vector.extract_strided_slice %787 {offsets = [0, 16], sizes = [16, 8], strides = [1, 1]} : vector<16x32xf32> to vector<16x8xf32>
    %828 = vector.extract_strided_slice %795 {offsets = [0, 16], sizes = [16, 8], strides = [1, 1]} : vector<16x32xf32> to vector<16x8xf32>
    %cst_287 = arith.constant dense<0.000000e+00> : vector<16x16xf32>
    %829 = tpu.matmul %827, %828, %cst_287 {dimension_numbers = #tpu.dot_dimension_numbers<[1], [1], [0], [0], [0, 0, 1, 0], [], []>} : vector<16x8xf32>, vector<16x8xf32>, vector<16x16xf32> -> vector<16x16xf32>
    %830 = arith.addf %829, %85 : vector<16x16xf32>
    %cst_288 = arith.constant dense<0xFF800000> : vector<16xf32>
    %831 = vector.multi_reduction <maximumf>, %830, %cst_288 [1] : vector<16x16xf32> to vector<16xf32>
    %832 = vector.shape_cast %831 : vector<16xf32> to vector<16x1xf32>
    %833 = vector.broadcast %832 : vector<16x1xf32> to vector<16x16xf32>
    %834 = arith.subf %830, %833 : vector<16x16xf32>
    %835 = math.exp %834 : vector<16x16xf32>
    %cst_289 = arith.constant dense<0.000000e+00> : vector<16xf32>
    %836 = vector.multi_reduction <add>, %835, %cst_289 [1] : vector<16x16xf32> to vector<16xf32>
    %837 = vector.shape_cast %836 : vector<16xf32> to vector<16x1xf32>
    %838 = vector.broadcast %837 : vector<16x1xf32> to vector<16x16xf32>
    %839 = arith.divf %835, %838 : vector<16x16xf32>
    %840 = vector.extract_strided_slice %796 {offsets = [0, 16], sizes = [16, 8], strides = [1, 1]} : vector<16x32xf32> to vector<16x8xf32>
    %cst_290 = arith.constant dense<0.000000e+00> : vector<16x8xf32>
    %841 = tpu.matmul %839, %840, %cst_290 {dimension_numbers = #tpu.dot_dimension_numbers<[1], [0], [0], [1], [0, 0, 1, 1], [], []>} : vector<16x16xf32>, vector<16x8xf32>, vector<16x8xf32> -> vector<16x8xf32>
    %842 = vector.extract_strided_slice %787 {offsets = [0, 24], sizes = [16, 8], strides = [1, 1]} : vector<16x32xf32> to vector<16x8xf32>
    %843 = vector.extract_strided_slice %795 {offsets = [0, 24], sizes = [16, 8], strides = [1, 1]} : vector<16x32xf32> to vector<16x8xf32>
    %cst_291 = arith.constant dense<0.000000e+00> : vector<16x16xf32>
    %844 = tpu.matmul %842, %843, %cst_291 {dimension_numbers = #tpu.dot_dimension_numbers<[1], [1], [0], [0], [0, 0, 1, 0], [], []>} : vector<16x8xf32>, vector<16x8xf32>, vector<16x16xf32> -> vector<16x16xf32>
    %845 = arith.addf %844, %85 : vector<16x16xf32>
    %cst_292 = arith.constant dense<0xFF800000> : vector<16xf32>
    %846 = vector.multi_reduction <maximumf>, %845, %cst_292 [1] : vector<16x16xf32> to vector<16xf32>
    %847 = vector.shape_cast %846 : vector<16xf32> to vector<16x1xf32>
    %848 = vector.broadcast %847 : vector<16x1xf32> to vector<16x16xf32>
    %849 = arith.subf %845, %848 : vector<16x16xf32>
    %850 = math.exp %849 : vector<16x16xf32>
    %cst_293 = arith.constant dense<0.000000e+00> : vector<16xf32>
    %851 = vector.multi_reduction <add>, %850, %cst_293 [1] : vector<16x16xf32> to vector<16xf32>
    %852 = vector.shape_cast %851 : vector<16xf32> to vector<16x1xf32>
    %853 = vector.broadcast %852 : vector<16x1xf32> to vector<16x16xf32>
    %854 = arith.divf %850, %853 : vector<16x16xf32>
    %855 = vector.extract_strided_slice %796 {offsets = [0, 24], sizes = [16, 8], strides = [1, 1]} : vector<16x32xf32> to vector<16x8xf32>
    %cst_294 = arith.constant dense<0.000000e+00> : vector<16x8xf32>
    %856 = tpu.matmul %854, %855, %cst_294 {dimension_numbers = #tpu.dot_dimension_numbers<[1], [0], [0], [1], [0, 0, 1, 1], [], []>} : vector<16x16xf32>, vector<16x8xf32>, vector<16x8xf32> -> vector<16x8xf32>
    %857 = tpu.concatenate %811, %826, %841, %856 in 1 : vector<16x8xf32>, vector<16x8xf32>, vector<16x8xf32>, vector<16x8xf32> -> vector<16x32xf32>
    %c704 = arith.constant 704 : index
    %c0_295 = arith.constant 0 : index
    %858 = vector.load %arg4[%c704, %c0_295] : memref<872x128xf32, #tpu.memory_space<vmem>>, vector<32x32xf32>
    %c35 = arith.constant 35 : index
    %c0_296 = arith.constant 0 : index
    %c0_297 = arith.constant 0 : index
    %859 = vector.load %arg5[%c35, %c0_296, %c0_297] : memref<45x1x128xf32, #tpu.memory_space<vmem>>, vector<1x1x128xf32>
    %860 = vector.shape_cast %859 : vector<1x1x128xf32> to vector<1x128xf32>
    %861 = vector.extract_strided_slice %860 {offsets = [0, 0], sizes = [1, 32], strides = [1, 1]} : vector<1x128xf32> to vector<1x32xf32>
    %cst_298 = arith.constant dense<0.000000e+00> : vector<16x32xf32>
    %862 = tpu.matmul %857, %858, %cst_298 {dimension_numbers = #tpu.dot_dimension_numbers<[1], [0], [0], [1], [0, 0, 1, 1], [], []>} : vector<16x32xf32>, vector<32x32xf32>, vector<16x32xf32> -> vector<16x32xf32>
    %863 = vector.broadcast %861 : vector<1x32xf32> to vector<16x32xf32>
    %864 = arith.addf %862, %863 : vector<16x32xf32>
    %865 = arith.addf %780, %864 : vector<16x32xf32>
    %c40 = arith.constant 40 : index
    %c0_299 = arith.constant 0 : index
    %c0_300 = arith.constant 0 : index
    %866 = vector.load %arg5[%c40, %c0_299, %c0_300] : memref<45x1x128xf32, #tpu.memory_space<vmem>>, vector<1x1x128xf32>
    %867 = vector.shape_cast %866 : vector<1x1x128xf32> to vector<1x128xf32>
    %868 = vector.extract_strided_slice %867 {offsets = [0, 0], sizes = [1, 32], strides = [1, 1]} : vector<1x128xf32> to vector<1x32xf32>
    %c41 = arith.constant 41 : index
    %c0_301 = arith.constant 0 : index
    %c0_302 = arith.constant 0 : index
    %869 = vector.load %arg5[%c41, %c0_301, %c0_302] : memref<45x1x128xf32, #tpu.memory_space<vmem>>, vector<1x1x128xf32>
    %870 = vector.shape_cast %869 : vector<1x1x128xf32> to vector<1x128xf32>
    %871 = vector.extract_strided_slice %870 {offsets = [0, 0], sizes = [1, 32], strides = [1, 1]} : vector<1x128xf32> to vector<1x32xf32>
    %cst_303 = arith.constant dense<0.000000e+00> : vector<16xf32>
    %872 = vector.multi_reduction <add>, %865, %cst_303 [1] : vector<16x32xf32> to vector<16xf32>
    %873 = vector.shape_cast %872 : vector<16xf32> to vector<16x1xf32>
    %cst_304 = arith.constant 3.200000e+01 : f32
    %874 = vector.broadcast %cst_304 : f32 to vector<16x1xf32>
    %875 = arith.divf %873, %874 : vector<16x1xf32>
    %876 = vector.broadcast %875 : vector<16x1xf32> to vector<16x32xf32>
    %877 = arith.subf %865, %876 : vector<16x32xf32>
    %878 = arith.mulf %877, %877 : vector<16x32xf32>
    %cst_305 = arith.constant dense<0.000000e+00> : vector<16xf32>
    %879 = vector.multi_reduction <add>, %878, %cst_305 [1] : vector<16x32xf32> to vector<16xf32>
    %880 = vector.shape_cast %879 : vector<16xf32> to vector<16x1xf32>
    %cst_306 = arith.constant 3.200000e+01 : f32
    %881 = vector.broadcast %cst_306 : f32 to vector<16x1xf32>
    %882 = arith.divf %880, %881 : vector<16x1xf32>
    %cst_307 = arith.constant 9.99999974E-6 : f32
    %883 = vector.broadcast %cst_307 : f32 to vector<16x1xf32>
    %884 = arith.addf %882, %883 : vector<16x1xf32>
    %885 = math.rsqrt %884 : vector<16x1xf32>
    %886 = vector.broadcast %885 : vector<16x1xf32> to vector<16x32xf32>
    %887 = arith.mulf %877, %886 : vector<16x32xf32>
    %888 = vector.broadcast %868 : vector<1x32xf32> to vector<16x32xf32>
    %889 = arith.mulf %887, %888 : vector<16x32xf32>
    %890 = vector.broadcast %871 : vector<1x32xf32> to vector<16x32xf32>
    %891 = arith.addf %889, %890 : vector<16x32xf32>
    %c736 = arith.constant 736 : index
    %c0_308 = arith.constant 0 : index
    %892 = vector.load %arg4[%c736, %c0_308] : memref<872x128xf32, #tpu.memory_space<vmem>>, vector<32x64xf32>
    %c36 = arith.constant 36 : index
    %c0_309 = arith.constant 0 : index
    %c0_310 = arith.constant 0 : index
    %893 = vector.load %arg5[%c36, %c0_309, %c0_310] : memref<45x1x128xf32, #tpu.memory_space<vmem>>, vector<1x1x128xf32>
    %894 = vector.shape_cast %893 : vector<1x1x128xf32> to vector<1x128xf32>
    %895 = vector.extract_strided_slice %894 {offsets = [0, 0], sizes = [1, 64], strides = [1, 1]} : vector<1x128xf32> to vector<1x64xf32>
    %cst_311 = arith.constant dense<0.000000e+00> : vector<16x64xf32>
    %896 = tpu.matmul %891, %892, %cst_311 {dimension_numbers = #tpu.dot_dimension_numbers<[1], [0], [0], [1], [0, 0, 1, 1], [], []>} : vector<16x32xf32>, vector<32x64xf32>, vector<16x64xf32> -> vector<16x64xf32>
    %897 = vector.broadcast %895 : vector<1x64xf32> to vector<16x64xf32>
    %898 = arith.addf %896, %897 : vector<16x64xf32>
    %cst_312 = arith.constant 0.000000e+00 : f32
    %899 = vector.broadcast %cst_312 : f32 to vector<16x64xf32>
    %900 = arith.maximumf %898, %899 : vector<16x64xf32>
    %c768 = arith.constant 768 : index
    %c0_313 = arith.constant 0 : index
    %901 = vector.load %arg4[%c768, %c0_313] : memref<872x128xf32, #tpu.memory_space<vmem>>, vector<64x32xf32>
    %c37 = arith.constant 37 : index
    %c0_314 = arith.constant 0 : index
    %c0_315 = arith.constant 0 : index
    %902 = vector.load %arg5[%c37, %c0_314, %c0_315] : memref<45x1x128xf32, #tpu.memory_space<vmem>>, vector<1x1x128xf32>
    %903 = vector.shape_cast %902 : vector<1x1x128xf32> to vector<1x128xf32>
    %904 = vector.extract_strided_slice %903 {offsets = [0, 0], sizes = [1, 32], strides = [1, 1]} : vector<1x128xf32> to vector<1x32xf32>
    %cst_316 = arith.constant dense<0.000000e+00> : vector<16x32xf32>
    %905 = tpu.matmul %900, %901, %cst_316 {dimension_numbers = #tpu.dot_dimension_numbers<[1], [0], [0], [1], [0, 0, 1, 1], [], []>} : vector<16x64xf32>, vector<64x32xf32>, vector<16x32xf32> -> vector<16x32xf32>
    %906 = vector.broadcast %904 : vector<1x32xf32> to vector<16x32xf32>
    %907 = arith.addf %905, %906 : vector<16x32xf32>
    %908 = arith.addf %891, %907 : vector<16x32xf32>
    %c42 = arith.constant 42 : index
    %c0_317 = arith.constant 0 : index
    %c0_318 = arith.constant 0 : index
    %909 = vector.load %arg5[%c42, %c0_317, %c0_318] : memref<45x1x128xf32, #tpu.memory_space<vmem>>, vector<1x1x128xf32>
    %910 = vector.shape_cast %909 : vector<1x1x128xf32> to vector<1x128xf32>
    %911 = vector.extract_strided_slice %910 {offsets = [0, 0], sizes = [1, 32], strides = [1, 1]} : vector<1x128xf32> to vector<1x32xf32>
    %c43 = arith.constant 43 : index
    %c0_319 = arith.constant 0 : index
    %c0_320 = arith.constant 0 : index
    %912 = vector.load %arg5[%c43, %c0_319, %c0_320] : memref<45x1x128xf32, #tpu.memory_space<vmem>>, vector<1x1x128xf32>
    %913 = vector.shape_cast %912 : vector<1x1x128xf32> to vector<1x128xf32>
    %914 = vector.extract_strided_slice %913 {offsets = [0, 0], sizes = [1, 32], strides = [1, 1]} : vector<1x128xf32> to vector<1x32xf32>
    %cst_321 = arith.constant dense<0.000000e+00> : vector<16xf32>
    %915 = vector.multi_reduction <add>, %908, %cst_321 [1] : vector<16x32xf32> to vector<16xf32>
    %916 = vector.shape_cast %915 : vector<16xf32> to vector<16x1xf32>
    %cst_322 = arith.constant 3.200000e+01 : f32
    %917 = vector.broadcast %cst_322 : f32 to vector<16x1xf32>
    %918 = arith.divf %916, %917 : vector<16x1xf32>
    %919 = vector.broadcast %918 : vector<16x1xf32> to vector<16x32xf32>
    %920 = arith.subf %908, %919 : vector<16x32xf32>
    %921 = arith.mulf %920, %920 : vector<16x32xf32>
    %cst_323 = arith.constant dense<0.000000e+00> : vector<16xf32>
    %922 = vector.multi_reduction <add>, %921, %cst_323 [1] : vector<16x32xf32> to vector<16xf32>
    %923 = vector.shape_cast %922 : vector<16xf32> to vector<16x1xf32>
    %cst_324 = arith.constant 3.200000e+01 : f32
    %924 = vector.broadcast %cst_324 : f32 to vector<16x1xf32>
    %925 = arith.divf %923, %924 : vector<16x1xf32>
    %cst_325 = arith.constant 9.99999974E-6 : f32
    %926 = vector.broadcast %cst_325 : f32 to vector<16x1xf32>
    %927 = arith.addf %925, %926 : vector<16x1xf32>
    %928 = math.rsqrt %927 : vector<16x1xf32>
    %929 = vector.broadcast %928 : vector<16x1xf32> to vector<16x32xf32>
    %930 = arith.mulf %920, %929 : vector<16x32xf32>
    %931 = vector.broadcast %911 : vector<1x32xf32> to vector<16x32xf32>
    %932 = arith.mulf %930, %931 : vector<16x32xf32>
    %933 = vector.broadcast %914 : vector<1x32xf32> to vector<16x32xf32>
    %934 = arith.addf %932, %933 : vector<16x32xf32>
    %cst_326 = arith.constant dense<0.000000e+00> : vector<16xf32>
    %935 = vector.multi_reduction <add>, %934, %cst_326 [1] : vector<16x32xf32> to vector<16xf32>
    %936 = vector.shape_cast %935 : vector<16xf32> to vector<16x1xf32>
    %cst_327 = arith.constant 3.200000e+01 : f32
    %937 = vector.broadcast %cst_327 : f32 to vector<16x1xf32>
    %938 = arith.divf %936, %937 : vector<16x1xf32>
    %939 = vector.broadcast %938 : vector<16x1xf32> to vector<16x32xf32>
    %940 = arith.subf %934, %939 : vector<16x32xf32>
    %941 = arith.mulf %940, %940 : vector<16x32xf32>
    %cst_328 = arith.constant dense<0.000000e+00> : vector<16xf32>
    %942 = vector.multi_reduction <add>, %941, %cst_328 [1] : vector<16x32xf32> to vector<16xf32>
    %943 = vector.shape_cast %942 : vector<16xf32> to vector<16x1xf32>
    %cst_329 = arith.constant 3.200000e+01 : f32
    %944 = vector.broadcast %cst_329 : f32 to vector<16x1xf32>
    %945 = arith.divf %943, %944 : vector<16x1xf32>
    %cst_330 = arith.constant 9.99999974E-6 : f32
    %946 = vector.broadcast %cst_330 : f32 to vector<16x1xf32>
    %947 = arith.addf %945, %946 : vector<16x1xf32>
    %948 = math.rsqrt %947 : vector<16x1xf32>
    %949 = vector.broadcast %948 : vector<16x1xf32> to vector<16x32xf32>
    %950 = arith.mulf %940, %949 : vector<16x32xf32>
    %c832 = arith.constant 832 : index
    %c0_331 = arith.constant 0 : index
    %951 = vector.load %arg4[%c832, %c0_331] : memref<872x128xf32, #tpu.memory_space<vmem>>, vector<32x2xf32>
    %cst_332 = arith.constant dense<0.000000e+00> : vector<16x2xf32>
    %952 = tpu.matmul %950, %951, %cst_332 {dimension_numbers = #tpu.dot_dimension_numbers<[1], [0], [0], [1], [0, 0, 1, 1], [], []>} : vector<16x32xf32>, vector<32x2xf32>, vector<16x2xf32> -> vector<16x2xf32>
    %c44 = arith.constant 44 : index
    %c0_333 = arith.constant 0 : index
    %c0_334 = arith.constant 0 : index
    %953 = vector.load %arg5[%c44, %c0_333, %c0_334] : memref<45x1x128xf32, #tpu.memory_space<vmem>>, vector<1x1x128xf32>
    %954 = vector.shape_cast %953 : vector<1x1x128xf32> to vector<1x128xf32>
    %955 = vector.extract_strided_slice %954 {offsets = [0, 0], sizes = [1, 2], strides = [1, 1]} : vector<1x128xf32> to vector<1x2xf32>
    %956 = vector.broadcast %955 : vector<1x2xf32> to vector<16x2xf32>
    %957 = arith.addf %952, %956 : vector<16x2xf32>
    %c0_335 = arith.constant 0 : index
    %c0_336 = arith.constant 0 : index
    %958 = vector.load %arg6[%c0_335, %c0_336] : memref<16x2xf32, #tpu.memory_space<vmem>>, vector<16x2xf32>
    tpu.vector_store %arg6[%c0_335, %c0_336], %957 {strides = array<i32>} : memref<16x2xf32, #tpu.memory_space<vmem>>, vector<16x2xf32>,
    return
  }
}

</mosaic_0001>

<bundles_post_ra>
// kernel: circle_transformer_forward.1
= control target key start
LH: loop header
LB: loop body
LE: loop exit
PB: predicated region body
PF: predicated region fallthrough
CT: control target
= control target key end

     0   :  { %11 = vsyncpa [#allocation3], 0  ;;  %s10792_s0 = inlined_call_operand.vmem [shape: f32[16,2], index: 0, kind: input, shape index: {}]   ;;  %s10793_s1 = inlined_call_operand.vmem [shape: f32[16,2], index: 1, kind: input, shape index: {}]   ;;  %s10794_s2 = inlined_call_operand.hbm [shape: f32[16,32], index: 2, kind: input, shape index: {}]   ;;  %s10795_s3 = inlined_call_operand.hbm [shape: f32[16,32], index: 3, kind: input, shape index: {}]   ;;  %s10796_s4 = inlined_call_operand.hbm [shape: f32[872,128], index: 4, kind: input, shape index: {}]   ;;  %s10797_s5 = inlined_call_operand.vmem [shape: f32[45,1,128], index: 5, kind: input, shape index: {}]   ;;  %s10798_s6 = inlined_call_operand.vmem [shape: f32[16,2], index: 6, kind: output, shape index: {}]  }
   0x1   :  { %12 = vsyncpa [#allocation5], 0  ;;  %s9556_s21 = smov [#allocation4]   ;;  %s9557_s23 = smov [#allocation2]  }
   0x2   :  { %s34_s22 = sshll.u32 %s9556_s21, 4  ;;  %s22_s24 = sshll.u32 %s9557_s23, 4  ;;  %s35_s22 = int_to_ptr.vmem [resolvable:$true] %s34_s22  ;;  %s23_s24 = int_to_ptr.vmem [resolvable:$true] %s22_s24 }
   0x3   :  { %s9500_s25 = scalar_lea.vmem %s35_s22, 256  ;;  %p9505_p1 = scmp.lt.s32.totalorder %s35_s22, %s35_s22 }
   0x4   :  { %p9501_p0 = scmp.ne.s32.totalorder %s35_s22, %s9500_s25  ;;  %p9506_p2 = scmp.lt.s32.totalorder %s9500_s25, %s9500_s25 }
   0x6   :  { %p9507_p3 = por %p9506_p2, %p9505_p1 }
   0x8   :  { %p9508_p4 = pnand %p9507_p3, %p9501_p0 }
   0xa   :  { %9511 = shalt.err (!%p9508_p4)
}
   0xb   :  { %s9558_s26 = smov 128   ;;  %s9559_s27 = smov 8  }
   0xc   :  { %40 = dma.hbm_to_vmem [thread:$0]  %s10795_s3, 256, %s35_s22, [#allocation5], %s9558_s26, %s9558_s26, %s9559_s27  }
   0xd   :  { %s9520_s30 = scalar_lea.vmem %s23_s24, 256  ;;  %p9525_p6 = scmp.lt.s32.totalorder %s23_s24, %s23_s24 }
   0xe   :  { %p9521_p5 = scmp.ne.s32.totalorder %s23_s24, %s9520_s30  ;;  %p9526_p7 = scmp.lt.s32.totalorder %s9520_s30, %s9520_s30 }
  0x10   :  { %p9527_p8 = por %p9526_p7, %p9525_p6 }
  0x12   :  { %p9528_p9 = pnand %p9527_p8, %p9521_p5 }
  0x14   :  { %9531 = shalt.err (!%p9528_p9)
}
  0x15   :  { %28 = dma.hbm_to_vmem [thread:$0]  %s10794_s2, 256, %s23_s24, [#allocation3], %s9558_s26, %s9558_s26, %s9559_s27  }
  0x16   :  { %s9560_s9 = smov [#allocation6]  }
  0x17   :  { %s46_s10 = sshll.u32 %s9560_s9, 4  ;;  %s47_s10 = int_to_ptr.vmem [resolvable:$true] %s46_s10 }
  0x18   :  { %s9540_s11 = scalar_lea.vmem %s47_s10, 13952  ;;  %p9545_p11 = scmp.lt.s32.totalorder %s47_s10, %s47_s10 }
  0x19   :  { %p9541_p10 = scmp.ne.s32.totalorder %s47_s10, %s9540_s11  ;;  %p9546_p12 = scmp.lt.s32.totalorder %s9540_s11, %s9540_s11 }
  0x1b   :  { %p9547_p13 = por %p9546_p12, %p9545_p11 }
  0x1d   :  { %p9548_p0 = pnand %p9547_p13, %p9541_p10 }
  0x1f   :  { %9551 = shalt.err (!%p9548_p0)
}
  0x20   :  { %52 = dma.hbm_to_vmem [thread:$0]  %s10796_s4, 13952, %s47_s10, [#allocation5], %s9558_s26, %s9558_s26, %s9559_s27  }
  0x21   :  { %9552 = dma.done.wait [#allocation3], 256  }
  0x22   :  { %9553 = vsyncadd [#allocation3], 4294967040 }
  0x23   :  { %9554 = dma.done.wait [#allocation5], 14208  }
  0x24   :  { %9555 = vsyncadd [#allocation5], 4294953088  ;;  %vm115_vm0 = vcmask 1041408   ;;  %vm108_vm1 = vcmask 15360   ;;  %v103_v0 = vld [vmem:[#allocation6 + $0x360] sm:$0x3]  ;;  %v64_v22 = vlaneseq }
  0x25   :  { %v104_v1 = vld [vmem:[%s10792_s0] sm:$0xff]  ;;  %v105_v2 = vld [vmem:[%s10792_s0 + $0x8] sm:$0xff]  ;;  %8602 = vmatprep.subr.msk.mxu0 %vm115_vm0, %v103_v0  ;;  %v282_v3 = vld [vmem:[#allocation6 + $0x18] sm:$0xff]  ;;  %8607 = vmatprep.subr.msk.mxu1 %vm115_vm0, %v103_v0  ;;  %vm290_vm2 = vcmask 261120   ;;  %vm378_vm3 = vcmask 64512   ;;  %s9561_s20 = smov 96  }
  0x26   :  { %8604 = vmatprep.mubr.msk.f32.mxu0 %vm108_vm1, %v104_v1  ;;  %8603 = vmatpush3.msk.msra.mxu0 %vm115_vm0, %v103_v0  ;;  %v281_v4 = vld [vmem:[#allocation6 + $0x10] sm:$0xff]  ;;  %v280_v5 = vld [vmem:[#allocation6 + $0x8] sm:$0xff]  ;;  %v279_v6 = vld [vmem:[#allocation6] sm:$0xff]  ;;  %v9666_v23 = vand.u32 127, %v64_v22  ;;  %v9562_v28 = vmov -1e+09  }
  0x27   :  { %8605 = vmatmul.mubr.msk.f32.vlgmr.msra.gmra.mxu0 %vm108_vm1, %v105_v2  ;;  %8612 = vmatprep.subr.mxu0 %v282_v3  ;;  %v106_v8 = vld [vmem:[#allocation2] sm:$0xff]  ;;  %v107_v9 = vld [vmem:[#allocation2 + $0x8] sm:$0xff]  ;;  %vm462_vm8 = vcmask 130048   ;;  %s9564_s21 = smov 120   ;;  %s9565_s22 = smov 88   ;;  %vm1200_vm9 = vcmask 195584  }
  0x28   :  { %8613 = vmatpush3.msra.mxu0 %v282_v3  ;;  %8608 = vmatpush3.msk.msra.mxu1 %vm115_vm0, %v103_v0  ;;  %v194_v13 = vld [vmem:[%s10793_s1] sm:$0xff]  ;;  %v195_v14 = vld [vmem:[%s10793_s1 + $0x8] sm:$0xff]  ;;  %vm87_vm4 = vcmp.ge.s32.totalorder %v9666_v23, 8  ;;  %vm90_vm5 = vcmp.lt.s32.totalorder %v9666_v23, 16  ;;  %vm78_vm6 = vcmp.lt.s32.totalorder %v9666_v23, 8  ;;  %s9563_s1 = smov 64  }
  0x29   :  { %8614 = vmatprep.subr.mxu0 %v281_v4  ;;  %8609 = vmatprep.mubr.msk.f32.mxu1 %vm108_vm1, %v194_v13  ;;  %v7971_v15 = vld [vmem:[%s10797_s5] ss:$0 sm:$0xff]  ;;  %vm9675_vm7 = vmand %vm87_vm4, %vm90_vm5  ;;  %v9682_v29 = vsel %vm78_vm6, 0.0, %v9562_v28  ;;  %s9566_s23 = smov 56   ;;  %s9567_s24 = smov 80   ;;  %vm1456_vm10 = vcmask 523264  }
  0x2a   :  { %8615 = vmatpush3.msra.mxu0 %v281_v4  ;;  %8610 = vmatmul.mubr.msk.f32.vlgmr.msra.gmra.mxu1 %vm108_vm1, %v195_v14  ;;  %v9687_v30 = vsel %vm9675_vm7, 0.0, %v9562_v28  ;;  %s9568_s25 = smov 112   ;;  %s9569_s26 = smov 48  }
  0x2b   :  { %8616 = vmatprep.subr.mxu0 %v280_v5  ;;  %s9570_s28 = smov 72   ;;  %s9571_s29 = smov 104  }
  0x2c   :  { %8617 = vmatpush3.msra.mxu0 %v280_v5  ;;  %s9572_s30 = smov 40   ;;  %s9573_s7 = smov 16  }
  0x2d   :  { %8618 = vmatprep.subr.mxu0 %v279_v6  ;;  %s9574_s8 = smov 24  }
  0x2e   :  { %8619 = vmatpush3.msra.mxu0 %v279_v6 }
  0xe7   :  { %v8606_v7 = vpop.f32.mrf.mxu0 }
  0xe8   :  { %v9632_v12 = vadd.f32 %v8606_v7, %v107_v9 }
  0xe9   :  { %v185_v10 = vpop.f32.mrf.mxu0 }
  0xea   :  { %v9630_v11 = vadd.f32 %v185_v10, %v106_v8  ;;  %v9668_v24 = vpop.f32.mrf.mxu1 }
  0xec   :  { %8620 = vmatprep.mubr.msk.f32.mxu0 %vm290_vm2, %v9630_v11  ;;  %v9673_v25 = vpop.f32.mrf.mxu1 }
  0xed   :  { %8621 = vmatmul.mubr.msk.f32.vlgmr.msra.gmra.mxu0 %vm290_vm2, %v9632_v12 }
 0x1ad   :  { %v8622_v16 = vpop.f32.mrf.mxu0 }
 0x1ae   :  { %v9649_v17 = vadd.f32 %v8622_v16, %v7971_v15 }
 0x1af   :  { %v363_v18 = vpop.f32.mrf.mxu0 }
 0x1b0   :  { %v9651_v19 = vadd.f32 %v7971_v15, %v363_v18  ;;  %376 = vrot.lane.b32.xlu0 %v9649_v17, %s9561_s20 }
 0x1b2   :  { %8627 = vmatprep.mubr.msk.f32.mxu1 %vm378_vm3, %v9651_v19 }
 0x1b4   :  { %374 = vrot.lane.b32.xlu0 %v9651_v19, %s9561_s20 }
 0x222   :  { %v377_v20 = vpop.permute.xlu0 %376 }
 0x223   :  { %8623 = vmatprep.subr.msk.mxu1 %vm378_vm3, %v377_v20 }
 0x224   :  { %8624 = vmatpush3.xpose.msk.msra.mxu1 %vm378_vm3, %v377_v20 }
 0x226   :  { %v375_v21 = vpop.permute.xlu0 %374 }
 0x227   :  { %8625 = vmatprep.subr.msk.mxu1 %vm378_vm3, %v375_v21 }
 0x228   :  { %8626 = vmatpush3.xpose.msk.msra.mxu1 %vm378_vm3, %v375_v21 }
 0x22b   :  { %8628 = vmatmul.mubr.msk.f32.vlgmr.msra.gmra.mxu1 %vm378_vm3, %v9649_v17 }
 0x2eb   :  { %v8629_v27 = vpop.f32.mrf.mxu1 }
 0x2ec   :  { %v459_v33 = vadd.f32 %v8629_v27, %v9687_v30 }
 0x2ed   :  { %v453_v31 = vpop.f32.mrf.mxu1 }
 0x2ee   :  { %v454_v32 = vadd.f32 %v453_v31, %v9682_v29  ;;  %v466_v35 = vsel %vm462_vm8, %v459_v33, -inf }
 0x2f0   :  { %v463_v34 = vsel %vm462_vm8, %v454_v32, -inf }
 0x2f1   :  { %464 = vmax.xlane.f32.xlu1 %v463_v34 }
 0x2f5   :  { %467 = vmax.xlane.f32.xlu1 %v466_v35 }
 0x37a   :  { %v465_v36 = vpop.xlane.xlu1 %464 }
 0x37b   :  { %v469_v37 = vsub.f32 %v454_v32, %v465_v36 }
 0x37d   :  { %v471_v38 = vmul.f32 1.442695, %v469_v37 }
 0x37e   :  { %v468_v39 = vpop.xlane.xlu1 %467 }
 0x37f   :  { %9252 = vpow2.f32 %v471_v38  ;;  %v470_v40 = vsub.f32 %v459_v33, %v468_v39 }
 0x381   :  { %v473_v41 = vmul.f32 1.442695, %v470_v40 }
 0x383   :  { %9254 = vpow2.f32 %v473_v41 }
 0x38c   :  { %v9253_v42 = vpop.eup %9252 }
 0x38d   :  { %v475_v43 = vsel %vm462_vm8, %v9253_v42, 0.0 }
 0x38e   :  { %476 = vadd.xlane.f32.xlu0 %v475_v43 }
 0x390   :  { %v9255_v44 = vpop.eup %9254 }
 0x391   :  { %v478_v45 = vsel %vm462_vm8, %v9255_v44, 0.0 }
 0x392   :  { %479 = vadd.xlane.f32.xlu1 %v478_v45 }
 0x3a3   :  { %487 = vrot.lane.b32.xlu1 %v9649_v17, %s9563_s1 }
 0x3a4   :  { %572 = vrot.lane.b32.xlu0 %v9651_v19, %s9564_s21 }
 0x3a7   :  { %485 = vrot.lane.b32.xlu1 %v9651_v19, %s9563_s1 }
 0x3ab   :  { %578 = vrot.lane.b32.xlu1 %v9649_v17, %s9565_s22 }
 0x3af   :  { %576 = vrot.lane.b32.xlu1 %v9651_v19, %s9565_s22 }
 0x3b3   :  { %574 = vrot.lane.b32.xlu1 %v9649_v17, %s9564_s21 }
 0x417   :  { %v477_v46 = vpop.xlane.xlu0 %476 }
 0x418   :  { %9256 = vrcp.f32 %v477_v46 }
 0x41b   :  { %v480_v47 = vpop.xlane.xlu1 %479  ;;  %v573_v56 = vpop.permute.xlu0 %572 }
 0x41c   :  { %9258 = vrcp.f32 %v480_v47 }
 0x41f   :  { %v488_v48 = vpop.permute.xlu1 %487 }
 0x420   :  { %8630 = vmatprep.subr.mxu1 %v488_v48 }
 0x421   :  { %8631 = vmatpush3.msra.mxu1 %v488_v48 }
 0x423   :  { %v486_v49 = vpop.permute.xlu1 %485 }
 0x424   :  { %8632 = vmatprep.subr.mxu1 %v486_v49 }
 0x425   :  { %v9257_v50 = vpop.eup %9256  ;;  %8633 = vmatpush3.msra.mxu1 %v486_v49 }
 0x426   :  { %v482_v51 = vmul.f32 %v9257_v50, %v9253_v42 }
 0x427   :  { %v579_v52 = vpop.permute.xlu1 %578 }
 0x428   :  { %8634 = vmatprep.mubr.msk.f32.mxu1 %vm462_vm8, %v482_v51  ;;  %8637 = vmatprep.subr.msk.mxu1 %vm378_vm3, %v579_v52 }
 0x429   :  { %v9259_v53 = vpop.eup %9258 }
 0x42a   :  { %v484_v54 = vmul.f32 %v9259_v53, %v9255_v44 }
 0x42b   :  { %v577_v55 = vpop.permute.xlu1 %576 }
 0x42c   :  { %8635 = vmatmul.mubr.msk.f32.vlgmr.msra.gmra.mxu1 %vm462_vm8, %v484_v54 }
 0x42d   :  { %8638 = vmatpush3.xpose.msk.msra.mxu1 %vm378_vm3, %v579_v52  ;;  %8641 = vmatprep.mubr.msk.f32.mxu1 %vm378_vm3, %v573_v56 }
 0x42e   :  { %8639 = vmatprep.subr.msk.mxu1 %vm378_vm3, %v577_v55 }
 0x42f   :  { %v575_v57 = vpop.permute.xlu1 %574 }
 0x431   :  { %8640 = vmatpush3.xpose.msk.msra.mxu1 %vm378_vm3, %v577_v55 }
 0x434   :  { %8642 = vmatmul.mubr.msk.f32.vlgmr.msra.gmra.mxu1 %vm378_vm3, %v575_v57 }
 0x4ec   :  { %v9715_v58 = vpop.f32.mrf.mxu1 }
 0x4ee   :  { %v9717_v59 = vpop.f32.mrf.mxu1 }
 0x4f4   :  { %v8643_v60 = vpop.f32.mrf.mxu1 }
 0x4f5   :  { %v660_v61 = vadd.f32 %v8643_v60, %v9687_v30 }
 0x4f6   :  { %v654_v62 = vpop.f32.mrf.mxu1 }
 0x4f7   :  { %v655_v63 = vadd.f32 %v654_v62, %v9682_v29  ;;  %v666_v0 = vsel %vm462_vm8, %v660_v61, -inf }
 0x4f8   :  { %667 = vmax.xlane.f32.xlu0 %v666_v0 }
 0x4f9   :  { %v663_v1 = vsel %vm462_vm8, %v655_v63, -inf }
 0x4fa   :  { %664 = vmax.xlane.f32.xlu1 %v663_v1 }
 0x50b   :  { %687 = vrot.lane.b32.xlu1 %v9649_v17, %s9566_s23 }
 0x50e   :  { %685 = vrot.lane.b32.xlu0 %v9651_v19, %s9566_s23 }
 0x50f   :  { %778 = vrot.lane.b32.xlu1 %v9649_v17, %s9567_s24 }
 0x512   :  { %772 = vrot.lane.b32.xlu0 %v9651_v19, %s9568_s25 }
 0x513   :  { %776 = vrot.lane.b32.xlu1 %v9651_v19, %s9567_s24 }
 0x581   :  { %v668_v2 = vpop.xlane.xlu0 %667 }
 0x582   :  { %v670_v3 = vsub.f32 %v660_v61, %v668_v2 }
 0x583   :  { %v665_v4 = vpop.xlane.xlu1 %664 }
 0x584   :  { %v673_v5 = vmul.f32 1.442695, %v670_v3  ;;  %v669_v6 = vsub.f32 %v655_v63, %v665_v4 }
 0x585   :  { %v686_v9 = vpop.permute.xlu0 %685 }
 0x586   :  { %9260 = vpow2.f32 %v673_v5  ;;  %v671_v7 = vmul.f32 1.442695, %v669_v6 }
 0x587   :  { %v688_v8 = vpop.permute.xlu1 %687 }
 0x588   :  { %9262 = vpow2.f32 %v671_v7  ;;  %8644 = vmatprep.subr.mxu0 %v688_v8 }
 0x589   :  { %8645 = vmatpush3.msra.mxu0 %v688_v8  ;;  %v773_v34 = vpop.permute.xlu0 %772 }
 0x58a   :  { %8646 = vmatprep.subr.mxu0 %v686_v9 }
 0x58b   :  { %8647 = vmatpush3.msra.mxu0 %v686_v9  ;;  %v779_v10 = vpop.permute.xlu1 %778 }
 0x58c   :  { %8651 = vmatprep.subr.msk.mxu0 %vm378_vm3, %v779_v10 }
 0x58f   :  { %v777_v18 = vpop.permute.xlu1 %776 }
 0x593   :  { %v9261_v13 = vpop.eup %9260 }
 0x594   :  { %v678_v14 = vsel %vm462_vm8, %v9261_v13, 0.0 }
 0x595   :  { %v9263_v15 = vpop.eup %9262  ;;  %679 = vadd.xlane.f32.xlu1 %v678_v14 }
 0x596   :  { %v675_v16 = vsel %vm462_vm8, %v9263_v15, 0.0 }
 0x599   :  { %676 = vadd.xlane.f32.xlu1 %v675_v16 }
 0x5aa   :  { %774 = vrot.lane.b32.xlu1 %v9649_v17, %s9568_s25 }
 0x61e   :  { %v680_v20 = vpop.xlane.xlu1 %679 }
 0x61f   :  { %9264 = vrcp.f32 %v680_v20 }
 0x622   :  { %v677_v21 = vpop.xlane.xlu1 %676 }
 0x623   :  { %9266 = vrcp.f32 %v677_v21 }
 0x626   :  { %v775_v35 = vpop.permute.xlu1 %774 }
 0x62c   :  { %v9265_v27 = vpop.eup %9264 }
 0x62d   :  { %v684_v33 = vmul.f32 %v9265_v27, %v9261_v13 }
 0x630   :  { %v9267_v31 = vpop.eup %9266 }
 0x631   :  { %v682_v32 = vmul.f32 %v9267_v31, %v9263_v15 }
 0x633   :  { %8648 = vmatprep.mubr.msk.f32.mxu0 %vm462_vm8, %v682_v32 }
 0x634   :  { %8649 = vmatmul.mubr.msk.f32.vlgmr.msra.gmra.mxu0 %vm462_vm8, %v684_v33 }
 0x635   :  { %8652 = vmatpush3.xpose.msk.msra.mxu0 %vm378_vm3, %v779_v10  ;;  %8655 = vmatprep.mubr.msk.f32.mxu0 %vm378_vm3, %v773_v34 }
 0x636   :  { %8653 = vmatprep.subr.msk.mxu0 %vm378_vm3, %v777_v18 }
 0x639   :  { %8654 = vmatpush3.xpose.msk.msra.mxu0 %vm378_vm3, %v777_v18 }
 0x63c   :  { %8656 = vmatmul.mubr.msk.f32.vlgmr.msra.gmra.mxu0 %vm378_vm3, %v775_v35 }
 0x6f4   :  { %v9745_v36 = vpop.f32.mrf.mxu0 }
 0x6f6   :  { %v9747_v37 = vpop.f32.mrf.mxu0 }
 0x6fc   :  { %v8657_v38 = vpop.f32.mrf.mxu0 }
 0x6fd   :  { %v860_v39 = vadd.f32 %v8657_v38, %v9687_v30 }
 0x6fe   :  { %v854_v40 = vpop.f32.mrf.mxu0 }
 0x6ff   :  { %v855_v41 = vadd.f32 %v854_v40, %v9682_v29  ;;  %v866_v42 = vsel %vm462_vm8, %v860_v39, -inf }
 0x700   :  { %867 = vmax.xlane.f32.xlu1 %v866_v42  ;;  %v1205_v42 = vld [vmem:[#allocation6 + $0x30] sm:$0xff] }
 0x701   :  { %v863_v43 = vsel %vm462_vm8, %v855_v41, -inf }
 0x702   :  { %864 = vmax.xlane.f32.xlu0 %v863_v43  ;;  %v1203_v43 = vld [vmem:[#allocation6 + $0x20] sm:$0xff] }
 0x711   :  { %887 = vrot.lane.b32.xlu1 %v9649_v17, %s9569_s26 }
 0x715   :  { %978 = vrot.lane.b32.xlu1 %v9649_v17, %s9570_s28 }
 0x719   :  { %976 = vrot.lane.b32.xlu1 %v9651_v19, %s9570_s28 }
 0x71d   :  { %974 = vrot.lane.b32.xlu1 %v9649_v17, %s9571_s29 }
 0x789   :  { %v868_v44 = vpop.xlane.xlu1 %867 }
 0x78a   :  { %v870_v45 = vsub.f32 %v860_v39, %v868_v44 }
 0x78b   :  { %v865_v46 = vpop.xlane.xlu0 %864 }
 0x78c   :  { %v873_v47 = vmul.f32 1.442695, %v870_v45  ;;  %v869_v48 = vsub.f32 %v855_v41, %v865_v46  ;;  %v1206_v41 = vld [vmem:[#allocation6 + $0x38] sm:$0xff] }
 0x78d   :  { %v888_v49 = vpop.permute.xlu1 %887 }
 0x78e   :  { %9268 = vpow2.f32 %v873_v47  ;;  %v871_v50 = vmul.f32 1.442695, %v869_v48  ;;  %8658 = vmatprep.subr.mxu1 %v888_v49 }
 0x78f   :  { %8659 = vmatpush3.msra.mxu1 %v888_v49 }
 0x790   :  { %9270 = vpow2.f32 %v871_v50 }
 0x791   :  { %v979_v60 = vpop.permute.xlu1 %978 }
 0x795   :  { %v977_v2 = vpop.permute.xlu1 %976 }
 0x799   :  { %v975_v3 = vpop.permute.xlu1 %974 }
 0x79b   :  { %v9269_v51 = vpop.eup %9268 }
 0x79c   :  { %v878_v52 = vsel %vm462_vm8, %v9269_v51, 0.0 }
 0x79d   :  { %v9271_v53 = vpop.eup %9270  ;;  %879 = vadd.xlane.f32.xlu0 %v878_v52 }
 0x79e   :  { %v875_v54 = vsel %vm462_vm8, %v9271_v53, 0.0 }
 0x7a1   :  { %876 = vadd.xlane.f32.xlu0 %v875_v54 }
 0x7b7   :  { %885 = vrot.lane.b32.xlu0 %v9651_v19, %s9569_s26 }
 0x7bb   :  { %972 = vrot.lane.b32.xlu0 %v9651_v19, %s9571_s29 }
 0x826   :  { %v880_v55 = vpop.xlane.xlu0 %879 }
 0x827   :  { %9272 = vrcp.f32 %v880_v55 }
 0x82a   :  { %v877_v56 = vpop.xlane.xlu0 %876 }
 0x82b   :  { %9274 = vrcp.f32 %v877_v56 }
 0x82e   :  { %v886_v57 = vpop.permute.xlu0 %885 }
 0x82f   :  { %8660 = vmatprep.subr.mxu1 %v886_v57 }
 0x830   :  { %8661 = vmatpush3.msra.mxu1 %v886_v57 }
 0x831   :  { %8665 = vmatprep.subr.msk.mxu1 %vm378_vm3, %v979_v60 }
 0x832   :  { %v973_v1 = vpop.permute.xlu0 %972 }
 0x834   :  { %v9273_v61 = vpop.eup %9272 }
 0x835   :  { %v884_v0 = vmul.f32 %v9273_v61, %v9269_v51 }
 0x838   :  { %v9275_v62 = vpop.eup %9274 }
 0x839   :  { %v882_v63 = vmul.f32 %v9275_v62, %v9271_v53 }
 0x83b   :  { %8662 = vmatprep.mubr.msk.f32.mxu1 %vm462_vm8, %v882_v63 }
 0x83c   :  { %8663 = vmatmul.mubr.msk.f32.vlgmr.msra.gmra.mxu1 %vm462_vm8, %v884_v0 }
 0x83d   :  { %8666 = vmatpush3.xpose.msk.msra.mxu1 %vm378_vm3, %v979_v60  ;;  %8669 = vmatprep.mubr.msk.f32.mxu1 %vm378_vm3, %v973_v1 }
 0x83e   :  { %8667 = vmatprep.subr.msk.mxu1 %vm378_vm3, %v977_v2 }
 0x841   :  { %8668 = vmatpush3.xpose.msk.msra.mxu1 %vm378_vm3, %v977_v2 }
 0x844   :  { %8670 = vmatmul.mubr.msk.f32.vlgmr.msra.gmra.mxu1 %vm378_vm3, %v975_v3 }
 0x8fc   :  { %v8664_v4 = vpop.f32.mrf.mxu1 }
 0x8fe   :  { %v963_v5 = vpop.f32.mrf.mxu1 }
 0x904   :  { %v8671_v6 = vpop.f32.mrf.mxu1 }
 0x905   :  { %v1060_v7 = vadd.f32 %v8671_v6, %v9687_v30 }
 0x906   :  { %v1054_v8 = vpop.f32.mrf.mxu1 }
 0x907   :  { %v1055_v9 = vadd.f32 %v1054_v8, %v9682_v29  ;;  %v1066_v10 = vsel %vm462_vm8, %v1060_v7, -inf }
 0x908   :  { %1067 = vmax.xlane.f32.xlu1 %v1066_v10 }
 0x909   :  { %v1063_v13 = vsel %vm462_vm8, %v1055_v9, -inf }
 0x90a   :  { %1064 = vmax.xlane.f32.xlu0 %v1063_v13 }
 0x919   :  { %1087 = vrot.lane.b32.xlu1 %v9649_v17, %s9572_s30 }
 0x91d   :  { %1174 = vrot.lane.b32.xlu1 %v9747_v37, %s9559_s27 }
 0x921   :  { %1176 = vrot.lane.b32.xlu1 %v9745_v36, %s9559_s27 }
 0x925   :  { %1184 = vrot.lane.b32.xlu1 %v8664_v4, %s9573_s7 }
 0x991   :  { %v1068_v14 = vpop.xlane.xlu1 %1067 }
 0x992   :  { %v1070_v15 = vsub.f32 %v1060_v7, %v1068_v14  ;;  %v1348_v14 = vld [vmem:[#allocation6 + $0x58] sm:$0xff] }
 0x993   :  { %v1065_v16 = vpop.xlane.xlu0 %1064  ;;  %8690 = vmatprep.subr.mxu1 %v1348_v14 }
 0x994   :  { %v1073_v18 = vmul.f32 1.442695, %v1070_v15  ;;  %v1069_v20 = vsub.f32 %v1055_v9, %v1065_v16  ;;  %8691 = vmatpush3.msra.mxu1 %v1348_v14  ;;  %v1346_v15 = vld [vmem:[#allocation6 + $0x48] sm:$0xff]  ;;  %v1345_v16 = vld [vmem:[#allocation6 + $0x40] sm:$0xff] }
 0x995   :  { %v1088_v21 = vpop.permute.xlu1 %1087  ;;  %v1587_v14 = vld [vmem:[#allocation6 + $0xa8] sm:$0xff] }
 0x996   :  { %9276 = vpow2.f32 %v1073_v18  ;;  %v1071_v27 = vmul.f32 1.442695, %v1069_v20  ;;  %8672 = vmatprep.subr.mxu0 %v1088_v21  ;;  %v1447_v18 = vld [vmem:[#allocation6 + $0x98] sm:$0xff]  ;;  %v1446_v20 = vld [vmem:[#allocation6 + $0x90] sm:$0xff] }
 0x997   :  { %8673 = vmatpush3.msra.mxu0 %v1088_v21  ;;  %v1445_v21 = vld [vmem:[#allocation6 + $0x88] sm:$0xff] }
 0x998   :  { %9278 = vpow2.f32 %v1071_v27  ;;  %v1444_v27 = vld [vmem:[#allocation6 + $0x80] sm:$0xff] }
 0x999   :  { %v1175_v46 = vpop.permute.xlu1 %1174 }
 0x99a   :  { %v1196_v50 = vsel %vm378_vm3, %v9717_v59, %v1175_v46  ;;  %v7999_v59 = vld [vmem:[%s10797_s5 + $0x1] ss:$0 sm:$0xff]  ;;  %v1442_v46 = vld [vmem:[#allocation6 + $0x70] sm:$0xff] }
 0x99d   :  { %v1177_v47 = vpop.permute.xlu1 %1176 }
 0x99e   :  { %v1197_v52 = vsel %vm378_vm3, %v9715_v58, %v1177_v47  ;;  %v1441_v47 = vld [vmem:[#allocation6 + $0x68] sm:$0xff] }
 0x9a1   :  { %v1185_v48 = vpop.permute.xlu1 %1184 }
 0x9a2   :  { %v1199_v55 = vsel %vm462_vm8, %v1197_v52, %v1185_v48  ;;  %v1440_v48 = vld [vmem:[#allocation6 + $0x60] sm:$0xff] }
 0x9a3   :  { %v9277_v17 = vpop.eup %9276 }
 0x9a4   :  { %v1078_v31 = vsel %vm462_vm8, %v9277_v17, 0.0 }
 0x9a5   :  { %v9279_v32 = vpop.eup %9278  ;;  %1079 = vadd.xlane.f32.xlu0 %v1078_v31 }
 0x9a6   :  { %v1075_v33 = vsel %vm462_vm8, %v9279_v32, 0.0 }
 0x9a9   :  { %1076 = vadd.xlane.f32.xlu0 %v1075_v33 }
 0x9bf   :  { %1085 = vrot.lane.b32.xlu0 %v9651_v19, %s9572_s30  ;;  %v1204_v19 = vld [vmem:[#allocation6 + $0x28] sm:$0xff] }
 0x9c3   :  { %1182 = vrot.lane.b32.xlu0 %v963_v5, %s9573_s7 }
 0xa2e   :  { %v1080_v34 = vpop.xlane.xlu0 %1079 }
 0xa2f   :  { %9280 = vrcp.f32 %v1080_v34 }
 0xa32   :  { %v1077_v35 = vpop.xlane.xlu0 %1076 }
 0xa33   :  { %9282 = vrcp.f32 %v1077_v35 }
 0xa36   :  { %v1086_v36 = vpop.permute.xlu0 %1085 }
 0xa37   :  { %8674 = vmatprep.subr.mxu0 %v1086_v36 }
 0xa38   :  { %8675 = vmatpush3.msra.mxu0 %v1086_v36 }
 0xa39   :  { %8679 = vmatprep.subr.mxu0 %v1206_v41 }
 0xa3a   :  { %v1183_v49 = vpop.permute.xlu0 %1182 }
 0xa3b   :  { %v1198_v53 = vsel %vm462_vm8, %v1196_v50, %v1183_v49  ;;  %v8007_v49 = vld [vmem:[%s10797_s5 + $0x2] ss:$0 sm:$0xff] }
 0xa3c   :  { %v9281_v37 = vpop.eup %9280 }
 0xa3d   :  { %v1084_v40 = vmul.f32 %v9281_v37, %v9277_v17  ;;  %v8004_v37 = vld [vmem:[%s10797_s5 + $0x4] ss:$0 sm:$0xff] }
 0xa40   :  { %v9283_v38 = vpop.eup %9282 }
 0xa41   :  { %v1082_v39 = vmul.f32 %v9283_v38, %v9279_v32 }
 0xa43   :  { %8676 = vmatprep.mubr.msk.f32.mxu0 %vm462_vm8, %v1082_v39  ;;  %v8005_v39 = vld [vmem:[%s10797_s5 + $0x5] ss:$0 sm:$0xff] }
 0xa44   :  { %8677 = vmatmul.mubr.msk.f32.vlgmr.msra.gmra.mxu0 %vm462_vm8, %v1084_v40 }
 0xa45   :  { %8680 = vmatpush3.msra.mxu0 %v1206_v41 }
 0xa46   :  { %8681 = vmatprep.subr.mxu0 %v1205_v42 }
 0xa47   :  { %8682 = vmatpush3.msra.mxu0 %v1205_v42 }
 0xa48   :  { %8683 = vmatprep.subr.mxu0 %v1204_v19 }
 0xa49   :  { %8684 = vmatpush3.msra.mxu0 %v1204_v19 }
 0xa4a   :  { %8685 = vmatprep.subr.mxu0 %v1203_v43 }
 0xa4b   :  { %8686 = vmatpush3.msra.mxu0 %v1203_v43 }
 0xa4c   :  { %8701 = vmatprep.subr.mxu0 %v1447_v18 }
 0xb04   :  { %v8678_v44 = vpop.f32.mrf.mxu0 }
 0xb05   :  { %1192 = vrot.lane.b32.xlu1 %v8678_v44, %s9574_s8 }
 0xb06   :  { %v1163_v45 = vpop.f32.mrf.mxu0 }
 0xb07   :  { %1190 = vrot.lane.b32.xlu0 %v1163_v45, %s9574_s8  ;;  %v1443_v45 = vld [vmem:[#allocation6 + $0x78] sm:$0xff] }
 0xb77   :  { %v1193_v51 = vpop.permute.xlu1 %1192 }
 0xb78   :  { %v1202_v57 = vsel %vm1200_vm9, %v1199_v55, %v1193_v51 }
 0xb79   :  { %v1191_v54 = vpop.permute.xlu0 %1190 }
 0xb7a   :  { %v1201_v56 = vsel %vm1200_vm9, %v1198_v53, %v1191_v54 }
 0xb7b   :  { %8687 = vmatprep.mubr.msk.f32.mxu0 %vm290_vm2, %v1201_v56  ;;  %v8011_v56 = vld [vmem:[%s10797_s5 + $0x3] ss:$0 sm:$0xff] }
 0xb7c   :  { %8688 = vmatmul.mubr.msk.f32.vlgmr.msra.gmra.mxu0 %vm290_vm2, %v1202_v57 }
 0xb7d   :  { %8702 = vmatpush3.msra.mxu0 %v1447_v18 }
 0xb7e   :  { %8703 = vmatprep.subr.mxu0 %v1446_v20 }
 0xb7f   :  { %8704 = vmatpush3.msra.mxu0 %v1446_v20 }
 0xb80   :  { %8705 = vmatprep.subr.mxu0 %v1445_v21 }
 0xb81   :  { %8706 = vmatpush3.msra.mxu0 %v1445_v21 }
 0xb82   :  { %8707 = vmatprep.subr.mxu0 %v1444_v27 }
 0xb83   :  { %8708 = vmatpush3.msra.mxu0 %v1444_v27 }
 0xb84   :  { %8709 = vmatprep.subr.mxu0 %v1443_v45 }
 0xb85   :  { %8710 = vmatpush3.msra.mxu0 %v1443_v45 }
 0xb86   :  { %8711 = vmatprep.subr.mxu0 %v1442_v46 }
 0xb87   :  { %8712 = vmatpush3.msra.mxu0 %v1442_v46 }
 0xb88   :  { %8713 = vmatprep.subr.mxu0 %v1441_v47 }
 0xb89   :  { %8714 = vmatpush3.msra.mxu0 %v1441_v47 }
 0xb8a   :  { %8715 = vmatprep.subr.mxu0 %v1440_v48 }
 0xb8b   :  { %8716 = vmatpush3.msra.mxu0 %v1440_v48 }
 0xc3c   :  { %v8689_v60 = vpop.f32.mrf.mxu0 }
 0xc3d   :  { %v1293_v61 = vadd.f32 %v8689_v60, %v7999_v59 }
 0xc3e   :  { %v1287_v58 = vpop.f32.mrf.mxu0 }
 0xc3f   :  { %v1288_v62 = vadd.f32 %v7999_v59, %v1287_v58  ;;  %v1297_v63 = vadd.f32 %v1293_v61, %v9632_v12 }
 0xc41   :  { %v1305_v0 = vsel %vm290_vm2, %v1297_v63, 0.0  ;;  %v1296_v1 = vadd.f32 %v1288_v62, %v9630_v11  ;;  %v1347_v11 = vld [vmem:[#allocation6 + $0x50] sm:$0xff] }
 0xc42   :  { %1306 = vadd.xlane.f32.xlu1 %v1305_v0  ;;  %8692 = vmatprep.subr.mxu1 %v1347_v11 }
 0xc43   :  { %v1302_v2 = vsel %vm290_vm2, %v1296_v1, 0.0  ;;  %8693 = vmatpush3.msra.mxu1 %v1347_v11  ;;  %v1586_v11 = vld [vmem:[#allocation6 + $0xa0] sm:$0xff] }
 0xc44   :  { %1303 = vadd.xlane.f32.xlu0 %v1302_v2  ;;  %8694 = vmatprep.subr.mxu1 %v1346_v15 }
 0xc45   :  { %8695 = vmatpush3.msra.mxu1 %v1346_v15 }
 0xc46   :  { %8696 = vmatprep.subr.mxu1 %v1345_v16 }
 0xc47   :  { %8697 = vmatpush3.msra.mxu1 %v1345_v16 }
 0xccb   :  { %v1307_v3 = vpop.xlane.xlu1 %1306 }
 0xccc   :  { %v1310_v4 = vmul.f32 0.03125, %v1307_v3 }
 0xccd   :  { %v1304_v5 = vpop.xlane.xlu0 %1303 }
 0xcce   :  { %v1309_v6 = vmul.f32 0.03125, %v1304_v5  ;;  %v1312_v7 = vsub.f32 %v1297_v63, %v1310_v4 }
 0xcd0   :  { %v1311_v8 = vsub.f32 %v1296_v1, %v1309_v6  ;;  %v1314_v13 = vmul.f32 %v1312_v7, %v1312_v7 }
 0xcd2   :  { %v1313_v9 = vmul.f32 %v1311_v8, %v1311_v8  ;;  %v1318_v12 = vsel %vm290_vm2, %v1314_v13, 0.0  ;;  %v1589_v13 = vld [vmem:[#allocation6 + $0xb8] sm:$0xff] }
 0xcd3   :  { %8720 = vmatprep.subr.mxu1 %v1589_v13 }
 0xcd4   :  { %v1315_v10 = vsel %vm290_vm2, %v1313_v9, 0.0 }
 0xcd5   :  { %1316 = vadd.xlane.f32.xlu0 %v1315_v10 }
 0xcd9   :  { %1319 = vadd.xlane.f32.xlu0 %v1318_v12  ;;  %v1588_v12 = vld [vmem:[#allocation6 + $0xb0] sm:$0xff] }
 0xd5e   :  { %v1317_v17 = vpop.xlane.xlu0 %1316 }
 0xd5f   :  { %v1321_v31 = vmul.f32 0.03125, %v1317_v17 }
 0xd61   :  { %v1323_v32 = vadd.f32 1e-05, %v1321_v31  ;;  %v8016_v31 = vld [vmem:[%s10797_s5 + $0x6] ss:$0 sm:$0xff] }
 0xd62   :  { %v1320_v33 = vpop.xlane.xlu0 %1319 }
 0xd63   :  { %9284 = vrsqrt.f32 %v1323_v32  ;;  %v1322_v34 = vmul.f32 0.03125, %v1320_v33 }
 0xd65   :  { %v1324_v35 = vadd.f32 1e-05, %v1322_v34 }
 0xd67   :  { %9286 = vrsqrt.f32 %v1324_v35 }
 0xd70   :  { %v9285_v36 = vpop.eup %9284 }
 0xd71   :  { %v1327_v38 = vmul.f32 %v9285_v36, %v1311_v8  ;;  %v8017_v36 = vld [vmem:[%s10797_s5 + $0x7] ss:$0 sm:$0xff] }
 0xd73   :  { %v1335_v40 = vmul.f32 %v8004_v37, %v1327_v38 }
 0xd74   :  { %v9287_v41 = vpop.eup %9286 }
 0xd75   :  { %v1328_v42 = vmul.f32 %v9287_v41, %v1312_v7  ;;  %v1343_v19 = vadd.f32 %v8005_v39, %v1335_v40  ;;  %v8019_v40 = vld [vmem:[%s10797_s5 + $0x8] ss:$0 sm:$0xff] }
 0xd77   :  { %v1336_v43 = vmul.f32 %v8004_v37, %v1328_v42  ;;  %8698 = vmatprep.mubr.msk.f32.mxu1 %vm290_vm2, %v1343_v19 }
 0xd79   :  { %v1344_v44 = vadd.f32 %v8005_v39, %v1336_v43 }
 0xd7b   :  { %8699 = vmatmul.mubr.msk.f32.vlgmr.msra.gmra.mxu1 %vm290_vm2, %v1344_v44 }
 0xd7c   :  { %8721 = vmatpush3.msra.mxu1 %v1589_v13 }
 0xd7d   :  { %8722 = vmatprep.subr.mxu1 %v1588_v12 }
 0xd7e   :  { %8723 = vmatpush3.msra.mxu1 %v1588_v12 }
 0xd7f   :  { %8724 = vmatprep.subr.mxu1 %v1587_v14 }
 0xd80   :  { %8725 = vmatpush3.msra.mxu1 %v1587_v14 }
 0xd81   :  { %8726 = vmatprep.subr.mxu1 %v1586_v11 }
 0xd82   :  { %8727 = vmatpush3.msra.mxu1 %v1586_v11 }
 0xe3b   :  { %v8700_v50 = vpop.f32.mrf.mxu1 }
 0xe3c   :  { %v1435_v51 = vadd.f32 %v8700_v50, %v8007_v49 }
 0xe3d   :  { %v1429_v52 = vpop.f32.mrf.mxu1 }
 0xe3e   :  { %v1430_v53 = vadd.f32 %v8007_v49, %v1429_v52  ;;  %v1439_v55 = vmax.f32 %v1435_v51, 0.0 }
 0xe40   :  { %v1438_v54 = vmax.f32 %v1430_v53, 0.0 }
 0xe42   :  { %8717 = vmatprep.mubr.msk.f32.mxu0 %vm1456_vm10, %v1438_v54 }
 0xe43   :  { %8718 = vmatmul.mubr.msk.f32.vlgmr.msra.gmra.mxu0 %vm1456_vm10, %v1439_v55 }
 0xf03   :  { %v8719_v57 = vpop.f32.mrf.mxu0 }
 0xf04   :  { %v1535_v59 = vadd.f32 %v8719_v57, %v8011_v56 }
 0xf05   :  { %v1529_v60 = vpop.f32.mrf.mxu0 }
 0xf06   :  { %v1530_v61 = vadd.f32 %v8011_v56, %v1529_v60  ;;  %v1539_v58 = vadd.f32 %v1535_v59, %v1344_v44 }
 0xf08   :  { %v1547_v62 = vsel %vm290_vm2, %v1539_v58, 0.0  ;;  %v1538_v63 = vadd.f32 %v1530_v61, %v1343_v19 }
 0xf09   :  { %1548 = vadd.xlane.f32.xlu0 %v1547_v62 }
 0xf0a   :  { %v1544_v0 = vsel %vm290_vm2, %v1538_v63, 0.0 }
 0xf0b   :  { %1545 = vadd.xlane.f32.xlu1 %v1544_v0 }
 0xf92   :  { %v1549_v1 = vpop.xlane.xlu0 %1548 }
 0xf93   :  { %v1551_v2 = vmul.f32 0.03125, %v1549_v1 }
 0xf94   :  { %v1546_v3 = vpop.xlane.xlu1 %1545 }
 0xf95   :  { %v1553_v4 = vsub.f32 %v1539_v58, %v1551_v2  ;;  %v1550_v5 = vmul.f32 0.03125, %v1546_v3 }
 0xf97   :  { %v1552_v6 = vsub.f32 %v1538_v63, %v1550_v5  ;;  %v1555_v7 = vmul.f32 %v1553_v4, %v1553_v4 }
 0xf99   :  { %v1559_v8 = vsel %vm290_vm2, %v1555_v7, 0.0  ;;  %v1554_v9 = vmul.f32 %v1552_v6, %v1552_v6 }
 0xf9a   :  { %1560 = vadd.xlane.f32.xlu0 %v1559_v8 }
 0xf9b   :  { %v1556_v10 = vsel %vm290_vm2, %v1554_v9, 0.0 }
 0xf9c   :  { %1557 = vadd.xlane.f32.xlu1 %v1556_v10 }
0x1023   :  { %v1561_v15 = vpop.xlane.xlu0 %1560 }
0x1024   :  { %v1563_v16 = vmul.f32 0.03125, %v1561_v15 }
0x1025   :  { %v1558_v18 = vpop.xlane.xlu1 %1557 }
0x1026   :  { %v1565_v20 = vadd.f32 1e-05, %v1563_v16  ;;  %v1562_v21 = vmul.f32 0.03125, %v1558_v18 }
0x1028   :  { %9288 = vrsqrt.f32 %v1565_v20  ;;  %v1564_v27 = vadd.f32 1e-05, %v1562_v21 }
0x102a   :  { %9290 = vrsqrt.f32 %v1564_v27 }
0x1035   :  { %v9289_v17 = vpop.eup %9288 }
0x1036   :  { %v1569_v32 = vmul.f32 %v9289_v17, %v1553_v4 }
0x1037   :  { %v9291_v33 = vpop.eup %9290 }
0x1038   :  { %v1568_v34 = vmul.f32 %v9291_v33, %v1552_v6  ;;  %v1577_v35 = vmul.f32 %v8016_v31, %v1569_v32 }
0x103a   :  { %v1576_v37 = vmul.f32 %v8016_v31, %v1568_v34  ;;  %v9842_v39 = vadd.f32 %v8017_v36, %v1577_v35 }
0x103c   :  { %v9840_v38 = vadd.f32 %v8017_v36, %v1576_v37 }
0x103e   :  { %8728 = vmatprep.mubr.msk.f32.mxu1 %vm290_vm2, %v9840_v38 }
0x103f   :  { %8729 = vmatmul.mubr.msk.f32.vlgmr.msra.gmra.mxu1 %vm290_vm2, %v9842_v39 }
0x10ff   :  { %v8730_v41 = vpop.f32.mrf.mxu1 }
0x1100   :  { %v9851_v42 = vadd.f32 %v8730_v41, %v8019_v40 }
0x1101   :  { %v1670_v19 = vpop.f32.mrf.mxu1 }
0x1102   :  { %v9853_v43 = vadd.f32 %v8019_v40, %v1670_v19  ;;  %1683 = vrot.lane.b32.xlu1 %v9851_v42, %s9561_s20 }
0x1104   :  { %1681 = vrot.lane.b32.xlu0 %v9853_v43, %s9561_s20  ;;  %8735 = vmatprep.mubr.msk.f32.mxu1 %vm378_vm3, %v9853_v43 }
0x1106   :  { %1883 = vrot.lane.b32.xlu1 %v9851_v42, %s9565_s22 }
0x1108   :  { %1877 = vrot.lane.b32.xlu0 %v9853_v43, %s9564_s21 }
0x110a   :  { %1881 = vrot.lane.b32.xlu1 %v9853_v43, %s9565_s22 }
0x110e   :  { %1879 = vrot.lane.b32.xlu1 %v9851_v42, %s9564_s21 }
0x1174   :  { %v1684_v44 = vpop.permute.xlu1 %1683 }
0x1175   :  { %8731 = vmatprep.subr.msk.mxu1 %vm378_vm3, %v1684_v44 }
0x1176   :  { %8732 = vmatpush3.xpose.msk.msra.mxu1 %vm378_vm3, %v1684_v44  ;;  %v1682_v45 = vpop.permute.xlu0 %1681 }
0x1177   :  { %8733 = vmatprep.subr.msk.mxu1 %vm378_vm3, %v1682_v45 }
0x1178   :  { %v1884_v46 = vpop.permute.xlu1 %1883 }
0x117a   :  { %8734 = vmatpush3.xpose.msk.msra.mxu1 %vm378_vm3, %v1682_v45  ;;  %v1878_v47 = vpop.permute.xlu0 %1877 }
0x117b   :  { %8745 = vmatprep.subr.msk.mxu1 %vm378_vm3, %v1884_v46 }
0x117c   :  { %v1882_v48 = vpop.permute.xlu1 %1881 }
0x117d   :  { %8736 = vmatmul.mubr.msk.f32.vlgmr.msra.gmra.mxu1 %vm378_vm3, %v9851_v42 }
0x117e   :  { %8746 = vmatpush3.xpose.msk.msra.mxu1 %vm378_vm3, %v1884_v46  ;;  %8749 = vmatprep.mubr.msk.f32.mxu1 %vm378_vm3, %v1878_v47 }
0x117f   :  { %8747 = vmatprep.subr.msk.mxu1 %vm378_vm3, %v1882_v48 }
0x1180   :  { %v1880_v49 = vpop.permute.xlu1 %1879 }
0x1182   :  { %8748 = vmatpush3.xpose.msk.msra.mxu1 %vm378_vm3, %v1882_v48 }
0x1185   :  { %8750 = vmatmul.mubr.msk.f32.vlgmr.msra.gmra.mxu1 %vm378_vm3, %v1880_v49 }
0x123d   :  { %v8737_v50 = vpop.f32.mrf.mxu1 }
0x123e   :  { %v1765_v51 = vadd.f32 %v8737_v50, %v9687_v30 }
0x123f   :  { %v1759_v52 = vpop.f32.mrf.mxu1 }
0x1240   :  { %v1760_v53 = vadd.f32 %v1759_v52, %v9682_v29  ;;  %v1771_v54 = vsel %vm462_vm8, %v1765_v51, -inf }
0x1241   :  { %1772 = vmax.xlane.f32.xlu1 %v1771_v54 }
0x1242   :  { %v1768_v55 = vsel %vm462_vm8, %v1760_v53, -inf }
0x1243   :  { %1769 = vmax.xlane.f32.xlu0 %v1768_v55 }
0x1245   :  { %v8751_v56 = vpop.f32.mrf.mxu1 }
0x1246   :  { %v1965_v60 = vadd.f32 %v8751_v56, %v9687_v30 }
0x1247   :  { %v1959_v57 = vpop.f32.mrf.mxu1 }
0x1248   :  { %v1960_v59 = vadd.f32 %v1959_v57, %v9682_v29  ;;  %v1971_v58 = vsel %vm462_vm8, %v1965_v60, -inf }
0x124a   :  { %v1968_v61 = vsel %vm462_vm8, %v1960_v59, -inf }
0x124b   :  { %1969 = vmax.xlane.f32.xlu0 %v1968_v61 }
0x124f   :  { %1972 = vmax.xlane.f32.xlu0 %v1971_v58 }
0x1252   :  { %1792 = vrot.lane.b32.xlu1 %v9851_v42, %s9563_s1 }
0x1256   :  { %1992 = vrot.lane.b32.xlu1 %v9851_v42, %s9566_s23 }
0x125a   :  { %1990 = vrot.lane.b32.xlu1 %v9853_v43, %s9566_s23 }
0x1265   :  { %1790 = vrot.lane.b32.xlu0 %v9853_v43, %s9563_s1 }
0x12ca   :  { %v1773_v62 = vpop.xlane.xlu1 %1772 }
0x12cb   :  { %v1775_v63 = vsub.f32 %v1765_v51, %v1773_v62 }
0x12cc   :  { %v1770_v0 = vpop.xlane.xlu0 %1769 }
0x12cd   :  { %v1778_v1 = vmul.f32 1.442695, %v1775_v63  ;;  %v1774_v2 = vsub.f32 %v1760_v53, %v1770_v0 }
0x12ce   :  { %v1793_v3 = vpop.permute.xlu1 %1792 }
0x12cf   :  { %9292 = vpow2.f32 %v1778_v1  ;;  %v1776_v4 = vmul.f32 1.442695, %v1774_v2  ;;  %8738 = vmatprep.subr.mxu0 %v1793_v3 }
0x12d0   :  { %8739 = vmatpush3.msra.mxu0 %v1793_v3 }
0x12d1   :  { %9294 = vpow2.f32 %v1776_v4 }
0x12d2   :  { %v1993_v14 = vpop.permute.xlu1 %1992 }
0x12d4   :  { %v1970_v5 = vpop.xlane.xlu0 %1969 }
0x12d5   :  { %v1974_v18 = vsub.f32 %v1960_v59, %v1970_v5 }
0x12d6   :  { %v1991_v17 = vpop.permute.xlu1 %1990 }
0x12d7   :  { %v1976_v20 = vmul.f32 1.442695, %v1974_v18 }
0x12d8   :  { %v1973_v6 = vpop.xlane.xlu0 %1972 }
0x12d9   :  { %v1975_v7 = vsub.f32 %v1965_v60, %v1973_v6 }
0x12db   :  { %v1978_v8 = vmul.f32 1.442695, %v1975_v7 }
0x12dc   :  { %v9293_v9 = vpop.eup %9292  ;;  %v1791_v10 = vpop.permute.xlu0 %1790 }
0x12dd   :  { %9296 = vpow2.f32 %v1978_v8  ;;  %8740 = vmatprep.subr.mxu0 %v1791_v10  ;;  %v1783_v13 = vsel %vm462_vm8, %v9293_v9, 0.0 }
0x12de   :  { %v9295_v12 = vpop.eup %9294  ;;  %1784 = vadd.xlane.f32.xlu0 %v1783_v13  ;;  %8741 = vmatpush3.msra.mxu0 %v1791_v10  ;;  %9298 = vpow2.f32 %v1976_v20 }
0x12df   :  { %8752 = vmatprep.subr.mxu0 %v1993_v14  ;;  %v1780_v11 = vsel %vm462_vm8, %v9295_v12, 0.0 }
0x12e0   :  { %1781 = vadd.xlane.f32.xlu1 %v1780_v11 }
0x12ea   :  { %v9297_v15 = vpop.eup %9296 }
0x12eb   :  { %v1983_v16 = vsel %vm462_vm8, %v9297_v15, 0.0  ;;  %v9299_v21 = vpop.eup %9298 }
0x12ec   :  { %1984 = vadd.xlane.f32.xlu0 %v1983_v16  ;;  %v1980_v27 = vsel %vm462_vm8, %v9299_v21, 0.0 }
0x12f1   :  { %2081 = vrot.lane.b32.xlu1 %v9853_v43, %s9567_s24 }
0x1302   :  { %2083 = vrot.lane.b32.xlu0 %v9851_v42, %s9567_s24 }
0x1306   :  { %2077 = vrot.lane.b32.xlu0 %v9853_v43, %s9568_s25 }
0x1315   :  { %1981 = vadd.xlane.f32.xlu1 %v1980_v27 }
0x1326   :  { %2079 = vrot.lane.b32.xlu1 %v9851_v42, %s9568_s25 }
0x1367   :  { %v1785_v31 = vpop.xlane.xlu0 %1784 }
0x1368   :  { %9300 = vrcp.f32 %v1785_v31 }
0x1369   :  { %v1782_v32 = vpop.xlane.xlu1 %1781 }
0x136a   :  { %9302 = vrcp.f32 %v1782_v32 }
0x136d   :  { %v2082_v41 = vpop.permute.xlu1 %2081 }
0x1375   :  { %v9301_v33 = vpop.eup %9300  ;;  %v1985_v35 = vpop.xlane.xlu0 %1984 }
0x1376   :  { %v1789_v37 = vmul.f32 %v9301_v33, %v9293_v9  ;;  %9304 = vrcp.f32 %v1985_v35 }
0x1377   :  { %v9303_v34 = vpop.eup %9302 }
0x1378   :  { %v1787_v36 = vmul.f32 %v9303_v34, %v9295_v12 }
0x1379   :  { %v2084_v40 = vpop.permute.xlu0 %2083 }
0x137a   :  { %8742 = vmatprep.mubr.msk.f32.mxu0 %vm462_vm8, %v1787_v36 }
0x137b   :  { %8743 = vmatmul.mubr.msk.f32.vlgmr.msra.gmra.mxu0 %vm462_vm8, %v1789_v37 }
0x137c   :  { %8753 = vmatpush3.msra.mxu0 %v1993_v14 }
0x137d   :  { %8754 = vmatprep.subr.mxu0 %v1991_v17  ;;  %v2078_v48 = vpop.permute.xlu0 %2077 }
0x137e   :  { %8755 = vmatpush3.msra.mxu0 %v1991_v17 }
0x137f   :  { %8759 = vmatprep.subr.msk.mxu0 %vm378_vm3, %v2084_v40 }
0x1383   :  { %v9305_v44 = vpop.eup %9304 }
0x1384   :  { %v1989_v47 = vmul.f32 %v9305_v44, %v9297_v15 }
0x139e   :  { %v1982_v19 = vpop.xlane.xlu1 %1981 }
0x139f   :  { %9306 = vrcp.f32 %v1982_v19 }
0x13a2   :  { %v2080_v49 = vpop.permute.xlu1 %2079 }
0x13ac   :  { %v9307_v45 = vpop.eup %9306 }
0x13ad   :  { %v1987_v46 = vmul.f32 %v9307_v45, %v9299_v21 }
0x13af   :  { %8756 = vmatprep.mubr.msk.f32.mxu0 %vm462_vm8, %v1987_v46 }
0x13b0   :  { %8757 = vmatmul.mubr.msk.f32.vlgmr.msra.gmra.mxu0 %vm462_vm8, %v1989_v47 }
0x13b1   :  { %8760 = vmatpush3.xpose.msk.msra.mxu0 %vm378_vm3, %v2084_v40  ;;  %8763 = vmatprep.mubr.msk.f32.mxu0 %vm378_vm3, %v2078_v48 }
0x13b2   :  { %8761 = vmatprep.subr.msk.mxu0 %vm378_vm3, %v2082_v41 }
0x13b5   :  { %8762 = vmatpush3.xpose.msk.msra.mxu0 %vm378_vm3, %v2082_v41 }
0x13b8   :  { %8764 = vmatmul.mubr.msk.f32.vlgmr.msra.gmra.mxu0 %vm378_vm3, %v2080_v49 }
0x143b   :  { %v9919_v50 = vpop.f32.mrf.mxu0 }
0x143d   :  { %v9921_v51 = vpop.f32.mrf.mxu0 }
0x1470   :  { %v9923_v52 = vpop.f32.mrf.mxu0 }
0x1472   :  { %v9925_v53 = vpop.f32.mrf.mxu0 }
0x1478   :  { %v8765_v54 = vpop.f32.mrf.mxu0 }
0x1479   :  { %v2165_v55 = vadd.f32 %v8765_v54, %v9687_v30 }
0x147a   :  { %v2159_v56 = vpop.f32.mrf.mxu0 }
0x147b   :  { %v2160_v57 = vadd.f32 %v2159_v56, %v9682_v29  ;;  %v2171_v59 = vsel %vm462_vm8, %v2165_v55, -inf }
0x147c   :  { %2172 = vmax.xlane.f32.xlu1 %v2171_v59  ;;  %v2509_v59 = vld [vmem:[#allocation6 + $0xd0] sm:$0xff] }
0x147d   :  { %v2168_v60 = vsel %vm462_vm8, %v2160_v57, -inf }
0x147e   :  { %2169 = vmax.xlane.f32.xlu0 %v2168_v60  ;;  %v2507_v60 = vld [vmem:[#allocation6 + $0xc0] sm:$0xff] }
0x148d   :  { %2192 = vrot.lane.b32.xlu1 %v9851_v42, %s9569_s26 }
0x1491   :  { %2283 = vrot.lane.b32.xlu1 %v9851_v42, %s9570_s28 }
0x1495   :  { %2281 = vrot.lane.b32.xlu1 %v9853_v43, %s9570_s28 }
0x1499   :  { %2279 = vrot.lane.b32.xlu1 %v9851_v42, %s9571_s29 }
0x1505   :  { %v2173_v61 = vpop.xlane.xlu1 %2172 }
0x1506   :  { %v2175_v58 = vsub.f32 %v2165_v55, %v2173_v61 }
0x1507   :  { %v2170_v62 = vpop.xlane.xlu0 %2169 }
0x1508   :  { %v2178_v63 = vmul.f32 1.442695, %v2175_v58  ;;  %v2174_v0 = vsub.f32 %v2160_v57, %v2170_v62  ;;  %v2510_v57 = vld [vmem:[#allocation6 + $0xd8] sm:$0xff] }
0x1509   :  { %v2193_v1 = vpop.permute.xlu1 %2192 }
0x150a   :  { %9308 = vpow2.f32 %v2178_v63  ;;  %v2176_v2 = vmul.f32 1.442695, %v2174_v0  ;;  %8766 = vmatprep.subr.mxu1 %v2193_v1 }
0x150b   :  { %8767 = vmatpush3.msra.mxu1 %v2193_v1 }
0x150c   :  { %9310 = vpow2.f32 %v2176_v2 }
0x150d   :  { %v2284_v10 = vpop.permute.xlu1 %2283 }
0x1511   :  { %v2282_v16 = vpop.permute.xlu1 %2281 }
0x1515   :  { %v2280_v18 = vpop.permute.xlu1 %2279 }
0x1517   :  { %v9309_v3 = vpop.eup %9308 }
0x1518   :  { %v2183_v4 = vsel %vm462_vm8, %v9309_v3, 0.0 }
0x1519   :  { %v9311_v5 = vpop.eup %9310  ;;  %2184 = vadd.xlane.f32.xlu0 %v2183_v4 }
0x151a   :  { %v2180_v6 = vsel %vm462_vm8, %v9311_v5, 0.0 }
0x151d   :  { %2181 = vadd.xlane.f32.xlu0 %v2180_v6 }
0x1533   :  { %2190 = vrot.lane.b32.xlu0 %v9853_v43, %s9569_s26 }
0x1537   :  { %2277 = vrot.lane.b32.xlu0 %v9853_v43, %s9571_s29 }
0x15a2   :  { %v2185_v7 = vpop.xlane.xlu0 %2184 }
0x15a3   :  { %9312 = vrcp.f32 %v2185_v7 }
0x15a6   :  { %v2182_v8 = vpop.xlane.xlu0 %2181 }
0x15a7   :  { %9314 = vrcp.f32 %v2182_v8 }
0x15aa   :  { %v2191_v9 = vpop.permute.xlu0 %2190 }
0x15ab   :  { %8768 = vmatprep.subr.mxu1 %v2191_v9 }
0x15ac   :  { %8769 = vmatpush3.msra.mxu1 %v2191_v9 }
0x15ad   :  { %8773 = vmatprep.subr.msk.mxu1 %vm378_vm3, %v2284_v10 }
0x15ae   :  { %v2278_v15 = vpop.permute.xlu0 %2277 }
0x15b0   :  { %v9313_v13 = vpop.eup %9312 }
0x15b1   :  { %v2189_v11 = vmul.f32 %v9313_v13, %v9309_v3 }
0x15b4   :  { %v9315_v12 = vpop.eup %9314 }
0x15b5   :  { %v2187_v14 = vmul.f32 %v9315_v12, %v9311_v5 }
0x15b7   :  { %8770 = vmatprep.mubr.msk.f32.mxu1 %vm462_vm8, %v2187_v14 }
0x15b8   :  { %8771 = vmatmul.mubr.msk.f32.vlgmr.msra.gmra.mxu1 %vm462_vm8, %v2189_v11 }
0x15b9   :  { %8774 = vmatpush3.xpose.msk.msra.mxu1 %vm378_vm3, %v2284_v10  ;;  %8777 = vmatprep.mubr.msk.f32.mxu1 %vm378_vm3, %v2278_v15 }
0x15ba   :  { %8775 = vmatprep.subr.msk.mxu1 %vm378_vm3, %v2282_v16 }
0x15bd   :  { %8776 = vmatpush3.xpose.msk.msra.mxu1 %vm378_vm3, %v2282_v16 }
0x15c0   :  { %8778 = vmatmul.mubr.msk.f32.vlgmr.msra.gmra.mxu1 %vm378_vm3, %v2280_v18 }
0x1678   :  { %v8772_v20 = vpop.f32.mrf.mxu1 }
0x167a   :  { %v2268_v21 = vpop.f32.mrf.mxu1 }
0x1680   :  { %v8779_v27 = vpop.f32.mrf.mxu1 }
0x1681   :  { %v2365_v17 = vadd.f32 %v8779_v27, %v9687_v30 }
0x1682   :  { %v2359_v31 = vpop.f32.mrf.mxu1 }
0x1683   :  { %v2360_v32 = vadd.f32 %v2359_v31, %v9682_v29  ;;  %v2371_v33 = vsel %vm462_vm8, %v2365_v17, -inf }
0x1684   :  { %2372 = vmax.xlane.f32.xlu1 %v2371_v33 }
0x1685   :  { %v2368_v34 = vsel %vm462_vm8, %v2360_v32, -inf }
0x1686   :  { %2369 = vmax.xlane.f32.xlu0 %v2368_v34 }
0x1695   :  { %2392 = vrot.lane.b32.xlu1 %v9851_v42, %s9572_s30 }
0x1699   :  { %2479 = vrot.lane.b32.xlu1 %v9925_v53, %s9559_s27 }
0x169d   :  { %2481 = vrot.lane.b32.xlu1 %v9923_v52, %s9559_s27 }
0x16a1   :  { %2489 = vrot.lane.b32.xlu1 %v8772_v20, %s9573_s7 }
0x170d   :  { %v2373_v35 = vpop.xlane.xlu1 %2372 }
0x170e   :  { %v2375_v36 = vsub.f32 %v2365_v17, %v2373_v35  ;;  %v2651_v35 = vld [vmem:[#allocation6 + $0xf8] sm:$0xff] }
0x170f   :  { %v2370_v37 = vpop.xlane.xlu0 %2369  ;;  %8798 = vmatprep.subr.mxu1 %v2651_v35 }
0x1710   :  { %v2378_v40 = vmul.f32 1.442695, %v2375_v36  ;;  %v2374_v41 = vsub.f32 %v2360_v32, %v2370_v37  ;;  %8799 = vmatpush3.msra.mxu1 %v2651_v35  ;;  %v2649_v36 = vld [vmem:[#allocation6 + $0xe8] sm:$0xff]  ;;  %v2648_v37 = vld [vmem:[#allocation6 + $0xe0] sm:$0xff] }
0x1711   :  { %v2393_v19 = vpop.permute.xlu1 %2392 }
0x1712   :  { %9316 = vpow2.f32 %v2378_v40  ;;  %v2376_v44 = vmul.f32 1.442695, %v2374_v41  ;;  %8780 = vmatprep.subr.mxu0 %v2393_v19  ;;  %v2937_v40 = vld [vmem:[#allocation6 + $0x158] sm:$0xff] }
0x1713   :  { %8781 = vmatpush3.msra.mxu0 %v2393_v19  ;;  %v2750_v41 = vld [vmem:[#allocation6 + $0x138] sm:$0xff]  ;;  %v2749_v19 = vld [vmem:[#allocation6 + $0x130] sm:$0xff] }
0x1714   :  { %9318 = vpow2.f32 %v2376_v44  ;;  %v2748_v44 = vld [vmem:[#allocation6 + $0x128] sm:$0xff] }
0x1715   :  { %v2480_v62 = vpop.permute.xlu1 %2479 }
0x1716   :  { %v2501_v2 = vsel %vm378_vm3, %v9921_v51, %v2480_v62  ;;  %v8047_v51 = vld [vmem:[%s10797_s5 + $0x9] ss:$0 sm:$0xff] }
0x1719   :  { %v2482_v63 = vpop.permute.xlu1 %2481 }
0x171a   :  { %v2502_v4 = vsel %vm378_vm3, %v9919_v50, %v2482_v63 }
0x171d   :  { %v2490_v0 = vpop.permute.xlu1 %2489 }
0x171e   :  { %v2504_v7 = vsel %vm462_vm8, %v2502_v4, %v2490_v0  ;;  %v2936_v0 = vld [vmem:[#allocation6 + $0x150] sm:$0xff] }
0x171f   :  { %v9317_v42 = vpop.eup %9316 }
0x1720   :  { %v2383_v45 = vsel %vm462_vm8, %v9317_v42, 0.0 }
0x1721   :  { %v9319_v46 = vpop.eup %9318  ;;  %2384 = vadd.xlane.f32.xlu0 %v2383_v45 }
0x1722   :  { %v2380_v47 = vsel %vm462_vm8, %v9319_v46, 0.0 }
0x1725   :  { %2381 = vadd.xlane.f32.xlu0 %v2380_v47 }
0x173b   :  { %2390 = vrot.lane.b32.xlu0 %v9853_v43, %s9572_s30  ;;  %v2508_v43 = vld [vmem:[#allocation6 + $0xc8] sm:$0xff] }
0x173f   :  { %2487 = vrot.lane.b32.xlu0 %v2268_v21, %s9573_s7 }
0x17aa   :  { %v2385_v48 = vpop.xlane.xlu0 %2384 }
0x17ab   :  { %9320 = vrcp.f32 %v2385_v48 }
0x17ae   :  { %v2382_v49 = vpop.xlane.xlu0 %2381 }
0x17af   :  { %9322 = vrcp.f32 %v2382_v49 }
0x17b2   :  { %v2391_v52 = vpop.permute.xlu0 %2390 }
0x17b3   :  { %8782 = vmatprep.subr.mxu0 %v2391_v52 }
0x17b4   :  { %8783 = vmatpush3.msra.mxu0 %v2391_v52 }
0x17b5   :  { %8787 = vmatprep.subr.mxu0 %v2510_v57 }
0x17b6   :  { %v2488_v1 = vpop.permute.xlu0 %2487 }
0x17b7   :  { %v2503_v5 = vsel %vm462_vm8, %v2501_v2, %v2488_v1  ;;  %v2935_v1 = vld [vmem:[#allocation6 + $0x148] sm:$0xff]  ;;  %v197_v2 = vld [vmem:[#allocation4 + $0x8] sm:$0xff] }
0x17b8   :  { %v9321_v53 = vpop.eup %9320  ;;  %v10012_v4 = vadd.f32 %v9668_v24, %v197_v2  ;;  %v8055_v24 = vld [vmem:[%s10797_s5 + $0xa] ss:$0 sm:$0xff] }
0x17b9   :  { %v2389_v56 = vmul.f32 %v9321_v53, %v9317_v42  ;;  %v2747_v42 = vld [vmem:[#allocation6 + $0x120] sm:$0xff] }
0x17bc   :  { %v9323_v54 = vpop.eup %9322 }
0x17bd   :  { %v2387_v55 = vmul.f32 %v9323_v54, %v9319_v46  ;;  %v8052_v54 = vld [vmem:[%s10797_s5 + $0xc] ss:$0 sm:$0xff] }
0x17bf   :  { %8784 = vmatprep.mubr.msk.f32.mxu0 %vm462_vm8, %v2387_v55 }
0x17c0   :  { %8785 = vmatmul.mubr.msk.f32.vlgmr.msra.gmra.mxu0 %vm462_vm8, %v2389_v56  ;;  %v8053_v56 = vld [vmem:[%s10797_s5 + $0xd] ss:$0 sm:$0xff] }
0x17c1   :  { %8788 = vmatpush3.msra.mxu0 %v2510_v57 }
0x17c2   :  { %8789 = vmatprep.subr.mxu0 %v2509_v59 }
0x17c3   :  { %8790 = vmatpush3.msra.mxu0 %v2509_v59 }
0x17c4   :  { %8791 = vmatprep.subr.mxu0 %v2508_v43 }
0x17c5   :  { %8792 = vmatpush3.msra.mxu0 %v2508_v43 }
0x17c6   :  { %8793 = vmatprep.subr.mxu0 %v2507_v60 }
0x17c7   :  { %8794 = vmatpush3.msra.mxu0 %v2507_v60 }
0x17c8   :  { %8809 = vmatprep.subr.mxu0 %v2750_v41 }
0x1880   :  { %v8786_v61 = vpop.f32.mrf.mxu0 }
0x1881   :  { %2497 = vrot.lane.b32.xlu1 %v8786_v61, %s9574_s8  ;;  %v196_v61 = vld [vmem:[#allocation4] sm:$0xff] }
0x1882   :  { %v2468_v58 = vpop.f32.mrf.mxu0  ;;  %v10005_v63 = vadd.f32 %v9673_v25, %v196_v61  ;;  %v2746_v25 = vld [vmem:[#allocation6 + $0x118] sm:$0xff] }
0x1883   :  { %2495 = vrot.lane.b32.xlu0 %v2468_v58, %s9574_s8 }
0x18f3   :  { %v2498_v3 = vpop.permute.xlu1 %2497 }
0x18f4   :  { %v2506_v9 = vsel %vm1200_vm9, %v2504_v7, %v2498_v3  ;;  %v2934_v3 = vld [vmem:[#allocation6 + $0x140] sm:$0xff] }
0x18f5   :  { %v2496_v6 = vpop.permute.xlu0 %2495  ;;  %v2743_v7 = vld [vmem:[#allocation6 + $0x100] sm:$0xff] }
0x18f6   :  { %v2505_v8 = vsel %vm1200_vm9, %v2503_v5, %v2496_v6  ;;  %v2745_v5 = vld [vmem:[#allocation6 + $0x110] sm:$0xff]  ;;  %v2744_v6 = vld [vmem:[#allocation6 + $0x108] sm:$0xff] }
0x18f7   :  { %8795 = vmatprep.mubr.msk.f32.mxu0 %vm290_vm2, %v2505_v8 }
0x18f8   :  { %8796 = vmatmul.mubr.msk.f32.vlgmr.msra.gmra.mxu0 %vm290_vm2, %v2506_v9 }
0x18f9   :  { %8810 = vmatpush3.msra.mxu0 %v2750_v41 }
0x18fa   :  { %8811 = vmatprep.subr.mxu0 %v2749_v19 }
0x18fb   :  { %8812 = vmatpush3.msra.mxu0 %v2749_v19 }
0x18fc   :  { %8813 = vmatprep.subr.mxu0 %v2748_v44 }
0x18fd   :  { %8814 = vmatpush3.msra.mxu0 %v2748_v44 }
0x18fe   :  { %8815 = vmatprep.subr.mxu0 %v2747_v42 }
0x18ff   :  { %8816 = vmatpush3.msra.mxu0 %v2747_v42 }
0x1900   :  { %8817 = vmatprep.subr.mxu0 %v2746_v25 }
0x1901   :  { %8818 = vmatpush3.msra.mxu0 %v2746_v25 }
0x1902   :  { %8819 = vmatprep.subr.mxu0 %v2745_v5 }
0x1903   :  { %8820 = vmatpush3.msra.mxu0 %v2745_v5 }
0x1904   :  { %8821 = vmatprep.subr.mxu0 %v2744_v6 }
0x1905   :  { %8822 = vmatpush3.msra.mxu0 %v2744_v6 }
0x1906   :  { %8823 = vmatprep.subr.mxu0 %v2743_v7 }
0x1907   :  { %8824 = vmatpush3.msra.mxu0 %v2743_v7 }
0x19b8   :  { %v8797_v10 = vpop.f32.mrf.mxu0 }
0x19b9   :  { %v2597_v13 = vadd.f32 %v8797_v10, %v8047_v51 }
0x19ba   :  { %v2591_v50 = vpop.f32.mrf.mxu0 }
0x19bb   :  { %v2601_v12 = vadd.f32 %v2597_v13, %v9842_v39  ;;  %v2592_v14 = vadd.f32 %v8047_v51, %v2591_v50 }
0x19bd   :  { %v2609_v11 = vsel %vm290_vm2, %v2601_v12, 0.0  ;;  %v2600_v15 = vadd.f32 %v2592_v14, %v9840_v38  ;;  %v2650_v38 = vld [vmem:[#allocation6 + $0xf0] sm:$0xff] }
0x19be   :  { %2610 = vadd.xlane.f32.xlu1 %v2609_v11  ;;  %8800 = vmatprep.subr.mxu1 %v2650_v38 }
0x19bf   :  { %v2606_v16 = vsel %vm290_vm2, %v2600_v15, 0.0  ;;  %8801 = vmatpush3.msra.mxu1 %v2650_v38 }
0x19c0   :  { %2607 = vadd.xlane.f32.xlu0 %v2606_v16  ;;  %8802 = vmatprep.subr.mxu1 %v2649_v36 }
0x19c1   :  { %8803 = vmatpush3.msra.mxu1 %v2649_v36 }
0x19c2   :  { %8804 = vmatprep.subr.mxu1 %v2648_v37 }
0x19c3   :  { %8805 = vmatpush3.msra.mxu1 %v2648_v37 }
0x19c4   :  { %8828 = vmatprep.subr.mxu1 %v2937_v40 }
0x1a47   :  { %v2611_v18 = vpop.xlane.xlu1 %2610 }
0x1a48   :  { %v2613_v20 = vmul.f32 0.03125, %v2611_v18 }
0x1a49   :  { %v2608_v21 = vpop.xlane.xlu0 %2607 }
0x1a4a   :  { %v2612_v27 = vmul.f32 0.03125, %v2608_v21  ;;  %v2615_v17 = vsub.f32 %v2601_v12, %v2613_v20  ;;  %v8071_v12 = vld [vmem:[%s10797_s5 + $0x12] ss:$0 sm:$0xff] }
0x1a4c   :  { %v2614_v31 = vsub.f32 %v2600_v15, %v2612_v27  ;;  %v2617_v34 = vmul.f32 %v2615_v17, %v2615_v17 }
0x1a4e   :  { %v2616_v32 = vmul.f32 %v2614_v31, %v2614_v31  ;;  %v2621_v39 = vsel %vm290_vm2, %v2617_v34, 0.0 }
0x1a50   :  { %v2618_v33 = vsel %vm290_vm2, %v2616_v32, 0.0  ;;  %v65_v32 = vshrl.u32 %v64_v22, 7 }
0x1a51   :  { %2619 = vadd.xlane.f32.xlu0 %v2618_v33 }
0x1a52   :  { %v66_v33 = vadd.s32 8, %v65_v32  ;;  %vm97_vm12 = vcmp.le.s32.totalorder %v9666_v23, %v65_v32 }
0x1a53   :  { %vm99_vm14 = vmand %vm78_vm6, %vm97_vm12 }
0x1a54   :  { %vm98_vm11 = vcmp.le.s32.totalorder %v9666_v23, %v66_v33  ;;  %v10065_v35 = vsel %vm99_vm14, 0.0, %v9562_v28 }
0x1a55   :  { %2622 = vadd.xlane.f32.xlu0 %v2621_v39  ;;  %vm100_vm13 = vmand %vm9675_vm7, %vm98_vm11 }
0x1a56   :  { %v10062_v34 = vsel %vm100_vm13, 0.0, %v9562_v28 }
0x1ada   :  { %v2620_v45 = vpop.xlane.xlu0 %2619 }
0x1adb   :  { %v2624_v46 = vmul.f32 0.03125, %v2620_v45 }
0x1add   :  { %v2626_v47 = vadd.f32 1e-05, %v2624_v46 }
0x1ade   :  { %v2623_v48 = vpop.xlane.xlu0 %2622 }
0x1adf   :  { %9324 = vrsqrt.f32 %v2626_v47  ;;  %v2625_v49 = vmul.f32 0.03125, %v2623_v48 }
0x1ae1   :  { %v2627_v52 = vadd.f32 1e-05, %v2625_v49 }
0x1ae3   :  { %9326 = vrsqrt.f32 %v2627_v52 }
0x1aec   :  { %v9325_v53 = vpop.eup %9324 }
0x1aed   :  { %v2630_v55 = vmul.f32 %v9325_v53, %v2614_v31 }
0x1aef   :  { %v2638_v57 = vmul.f32 %v8052_v54, %v2630_v55 }
0x1af0   :  { %v9327_v59 = vpop.eup %9326 }
0x1af1   :  { %v2631_v43 = vmul.f32 %v9327_v59, %v2615_v17  ;;  %v9998_v60 = vadd.f32 %v8053_v56, %v2638_v57 }
0x1af3   :  { %v2639_v58 = vmul.f32 %v8052_v54, %v2631_v43  ;;  %8806 = vmatprep.mubr.msk.f32.mxu1 %vm290_vm2, %v9998_v60 }
0x1af5   :  { %v10002_v62 = vadd.f32 %v8053_v56, %v2639_v58 }
0x1af7   :  { %8807 = vmatmul.mubr.msk.f32.vlgmr.msra.gmra.mxu1 %vm290_vm2, %v10002_v62 }
0x1af8   :  { %8829 = vmatpush3.msra.mxu1 %v2937_v40  ;;  %8836 = vmatprep.mubr.msk.f32.mxu1 %vm290_vm2, %v10005_v63 }
0x1af9   :  { %8830 = vmatprep.subr.mxu1 %v2936_v0 }
0x1afa   :  { %8831 = vmatpush3.msra.mxu1 %v2936_v0 }
0x1afb   :  { %8832 = vmatprep.subr.mxu1 %v2935_v1 }
0x1afc   :  { %8833 = vmatpush3.msra.mxu1 %v2935_v1 }
0x1afd   :  { %8834 = vmatprep.subr.mxu1 %v2934_v3 }
0x1afe   :  { %8835 = vmatpush3.msra.mxu1 %v2934_v3 }
0x1aff   :  { %8837 = vmatmul.mubr.msk.f32.vlgmr.msra.gmra.mxu1 %vm290_vm2, %v10012_v4 }
0x1bb7   :  { %v8808_v8 = vpop.f32.mrf.mxu1 }
0x1bb8   :  { %v2738_v9 = vadd.f32 %v8808_v8, %v8055_v24 }
0x1bb9   :  { %v2732_v51 = vpop.f32.mrf.mxu1 }
0x1bba   :  { %v2733_v10 = vadd.f32 %v8055_v24, %v2732_v51  ;;  %v2742_v50 = vmax.f32 %v2738_v9, 0.0 }
0x1bbc   :  { %v2741_v13 = vmax.f32 %v2733_v10, 0.0 }
0x1bbe   :  { %8825 = vmatprep.mubr.msk.f32.mxu0 %vm1456_vm10, %v2741_v13 }
0x1bbf   :  { %v8838_v14 = vpop.f32.mrf.mxu1  ;;  %8826 = vmatmul.mubr.msk.f32.vlgmr.msra.gmra.mxu0 %vm1456_vm10, %v2742_v50 }
0x1bc0   :  { %v10024_v11 = vadd.f32 %v8838_v14, %v8071_v12 }
0x1bc1   :  { %v3018_v15 = vpop.f32.mrf.mxu1 }
0x1bc2   :  { %v10026_v16 = vadd.f32 %v8071_v12, %v3018_v15  ;;  %3031 = vrot.lane.b32.xlu1 %v10024_v11, %s9561_s20 }
0x1bc4   :  { %3029 = vrot.lane.b32.xlu0 %v10026_v16, %s9561_s20  ;;  %8843 = vmatprep.mubr.msk.f32.mxu1 %vm378_vm3, %v10026_v16 }
0x1bc6   :  { %3231 = vrot.lane.b32.xlu1 %v10024_v11, %s9565_s22 }
0x1bc8   :  { %3225 = vrot.lane.b32.xlu0 %v10026_v16, %s9564_s21 }
0x1bca   :  { %3229 = vrot.lane.b32.xlu1 %v10026_v16, %s9565_s22 }
0x1bce   :  { %3227 = vrot.lane.b32.xlu1 %v10024_v11, %s9564_s21 }
0x1c34   :  { %v3032_v18 = vpop.permute.xlu1 %3031 }
0x1c35   :  { %8839 = vmatprep.subr.msk.mxu1 %vm378_vm3, %v3032_v18 }
0x1c36   :  { %8840 = vmatpush3.xpose.msk.msra.mxu1 %vm378_vm3, %v3032_v18  ;;  %v3030_v20 = vpop.permute.xlu0 %3029 }
0x1c37   :  { %8841 = vmatprep.subr.msk.mxu1 %vm378_vm3, %v3030_v20 }
0x1c38   :  { %v3232_v21 = vpop.permute.xlu1 %3231 }
0x1c3a   :  { %8842 = vmatpush3.xpose.msk.msra.mxu1 %vm378_vm3, %v3030_v20  ;;  %v3226_v27 = vpop.permute.xlu0 %3225 }
0x1c3b   :  { %8853 = vmatprep.subr.msk.mxu1 %vm378_vm3, %v3232_v21 }
0x1c3c   :  { %v3230_v17 = vpop.permute.xlu1 %3229 }
0x1c3d   :  { %8844 = vmatmul.mubr.msk.f32.vlgmr.msra.gmra.mxu1 %vm378_vm3, %v10024_v11 }
0x1c3e   :  { %8854 = vmatpush3.xpose.msk.msra.mxu1 %vm378_vm3, %v3232_v21  ;;  %8857 = vmatprep.mubr.msk.f32.mxu1 %vm378_vm3, %v3226_v27 }
0x1c3f   :  { %8855 = vmatprep.subr.msk.mxu1 %vm378_vm3, %v3230_v17 }
0x1c40   :  { %v3228_v31 = vpop.permute.xlu1 %3227 }
0x1c42   :  { %8856 = vmatpush3.xpose.msk.msra.mxu1 %vm378_vm3, %v3230_v17 }
0x1c45   :  { %8858 = vmatmul.mubr.msk.f32.vlgmr.msra.gmra.mxu1 %vm378_vm3, %v3228_v31 }
0x1c7f   :  { %v10105_v32 = vpop.f32.mrf.mxu0 }
0x1c81   :  { %v10107_v33 = vpop.f32.mrf.mxu0 }
0x1cfd   :  { %v8845_v39 = vpop.f32.mrf.mxu1 }
0x1cfe   :  { %v3113_v22 = vadd.f32 %v8845_v39, %v10062_v34 }
0x1cff   :  { %v3107_v38 = vpop.f32.mrf.mxu1 }
0x1d00   :  { %v3108_v36 = vadd.f32 %v3107_v38, %v10065_v35  ;;  %v3119_v37 = vsel %vm462_vm8, %v3113_v22, -inf }
0x1d01   :  { %3120 = vmax.xlane.f32.xlu1 %v3119_v37 }
0x1d02   :  { %v3116_v26 = vsel %vm462_vm8, %v3108_v36, -inf }
0x1d03   :  { %3117 = vmax.xlane.f32.xlu0 %v3116_v26 }
0x1d05   :  { %v8859_v23 = vpop.f32.mrf.mxu1 }
0x1d06   :  { %v3313_v19 = vadd.f32 %v8859_v23, %v10062_v34 }
0x1d07   :  { %v3307_v40 = vpop.f32.mrf.mxu1 }
0x1d08   :  { %v3308_v41 = vadd.f32 %v3307_v40, %v10065_v35  ;;  %v3319_v44 = vsel %vm462_vm8, %v3313_v19, -inf }
0x1d0a   :  { %v3316_v28 = vsel %vm462_vm8, %v3308_v41, -inf }
0x1d0b   :  { %3317 = vmax.xlane.f32.xlu0 %v3316_v28 }
0x1d0f   :  { %3320 = vmax.xlane.f32.xlu0 %v3319_v44 }
0x1d12   :  { %3140 = vrot.lane.b32.xlu1 %v10024_v11, %s9563_s1 }
0x1d16   :  { %3340 = vrot.lane.b32.xlu1 %v10024_v11, %s9566_s23 }
0x1d1a   :  { %3338 = vrot.lane.b32.xlu1 %v10026_v16, %s9566_s23 }
0x1d25   :  { %3138 = vrot.lane.b32.xlu0 %v10026_v16, %s9563_s1 }
0x1d8a   :  { %v3121_v42 = vpop.xlane.xlu1 %3120 }
0x1d8b   :  { %v3123_v45 = vsub.f32 %v3113_v22, %v3121_v42 }
0x1d8c   :  { %v3118_v46 = vpop.xlane.xlu0 %3117 }
0x1d8d   :  { %v3126_v47 = vmul.f32 1.442695, %v3123_v45  ;;  %v3122_v48 = vsub.f32 %v3108_v36, %v3118_v46 }
0x1d8e   :  { %v3141_v49 = vpop.permute.xlu1 %3140 }
0x1d8f   :  { %9328 = vpow2.f32 %v3126_v47  ;;  %v3124_v52 = vmul.f32 1.442695, %v3122_v48  ;;  %8846 = vmatprep.subr.mxu0 %v3141_v49 }
0x1d90   :  { %8847 = vmatpush3.msra.mxu0 %v3141_v49 }
0x1d91   :  { %9330 = vpow2.f32 %v3124_v52 }
0x1d92   :  { %v3341_v58 = vpop.permute.xlu1 %3340 }
0x1d94   :  { %v3318_v53 = vpop.xlane.xlu0 %3317 }
0x1d95   :  { %v3322_v3 = vsub.f32 %v3308_v41, %v3318_v53 }
0x1d96   :  { %v3339_v7 = vpop.permute.xlu1 %3338 }
0x1d97   :  { %v3324_v25 = vmul.f32 1.442695, %v3322_v3 }
0x1d98   :  { %v3321_v54 = vpop.xlane.xlu0 %3320 }
0x1d99   :  { %v3323_v55 = vsub.f32 %v3313_v19, %v3321_v54 }
0x1d9b   :  { %v3326_v56 = vmul.f32 1.442695, %v3323_v55 }
0x1d9c   :  { %v9329_v57 = vpop.eup %9328  ;;  %v3139_v59 = vpop.permute.xlu0 %3138 }
0x1d9d   :  { %9332 = vpow2.f32 %v3326_v56  ;;  %8848 = vmatprep.subr.mxu0 %v3139_v59  ;;  %v3131_v43 = vsel %vm462_vm8, %v9329_v57, 0.0 }
0x1d9e   :  { %v9331_v61 = vpop.eup %9330  ;;  %3132 = vadd.xlane.f32.xlu0 %v3131_v43  ;;  %8849 = vmatpush3.msra.mxu0 %v3139_v59  ;;  %9334 = vpow2.f32 %v3324_v25 }
0x1d9f   :  { %8860 = vmatprep.subr.mxu0 %v3341_v58  ;;  %v3128_v0 = vsel %vm462_vm8, %v9331_v61, 0.0 }
0x1da0   :  { %3129 = vadd.xlane.f32.xlu1 %v3128_v0 }
0x1daa   :  { %v9333_v1 = vpop.eup %9332 }
0x1dab   :  { %v3331_v2 = vsel %vm462_vm8, %v9333_v1, 0.0  ;;  %v9335_v5 = vpop.eup %9334 }
0x1dac   :  { %3332 = vadd.xlane.f32.xlu0 %v3331_v2  ;;  %v3328_v6 = vsel %vm462_vm8, %v9335_v5, 0.0 }
0x1db1   :  { %3429 = vrot.lane.b32.xlu1 %v10026_v16, %s9567_s24 }
0x1dc2   :  { %3431 = vrot.lane.b32.xlu0 %v10024_v11, %s9567_s24 }
0x1dc6   :  { %3425 = vrot.lane.b32.xlu0 %v10026_v16, %s9568_s25 }
0x1dd5   :  { %3329 = vadd.xlane.f32.xlu1 %v3328_v6 }
0x1de6   :  { %3427 = vrot.lane.b32.xlu1 %v10024_v11, %s9568_s25 }
0x1e27   :  { %v3133_v24 = vpop.xlane.xlu0 %3132 }
0x1e28   :  { %9336 = vrcp.f32 %v3133_v24 }
0x1e29   :  { %v3130_v8 = vpop.xlane.xlu1 %3129 }
0x1e2a   :  { %9338 = vrcp.f32 %v3130_v8 }
0x1e2d   :  { %v3430_v14 = vpop.permute.xlu1 %3429 }
0x1e35   :  { %v9337_v9 = vpop.eup %9336  ;;  %v3333_v10 = vpop.xlane.xlu0 %3332 }
0x1e36   :  { %v3137_v50 = vmul.f32 %v9337_v9, %v9329_v57  ;;  %9340 = vrcp.f32 %v3333_v10 }
0x1e37   :  { %v9339_v51 = vpop.eup %9338 }
0x1e38   :  { %v3135_v13 = vmul.f32 %v9339_v51, %v9331_v61 }
0x1e39   :  { %v3432_v12 = vpop.permute.xlu0 %3431 }
0x1e3a   :  { %8850 = vmatprep.mubr.msk.f32.mxu0 %vm462_vm8, %v3135_v13 }
0x1e3b   :  { %8851 = vmatmul.mubr.msk.f32.vlgmr.msra.gmra.mxu0 %vm462_vm8, %v3137_v50 }
0x1e3c   :  { %8861 = vmatpush3.msra.mxu0 %v3341_v58 }
0x1e3d   :  { %8862 = vmatprep.subr.mxu0 %v3339_v7  ;;  %v3426_v17 = vpop.permute.xlu0 %3425 }
0x1e3e   :  { %8863 = vmatpush3.msra.mxu0 %v3339_v7 }
0x1e3f   :  { %8867 = vmatprep.subr.msk.mxu0 %vm378_vm3, %v3432_v12 }
0x1e43   :  { %v9341_v18 = vpop.eup %9340 }
0x1e44   :  { %v3337_v27 = vmul.f32 %v9341_v18, %v9333_v1 }
0x1e5e   :  { %v3330_v15 = vpop.xlane.xlu1 %3329 }
0x1e5f   :  { %9342 = vrcp.f32 %v3330_v15 }
0x1e62   :  { %v3428_v31 = vpop.permute.xlu1 %3427 }
0x1e6c   :  { %v9343_v20 = vpop.eup %9342 }
0x1e6d   :  { %v3335_v21 = vmul.f32 %v9343_v20, %v9335_v5 }
0x1e6f   :  { %8864 = vmatprep.mubr.msk.f32.mxu0 %vm462_vm8, %v3335_v21 }
0x1e70   :  { %8865 = vmatmul.mubr.msk.f32.vlgmr.msra.gmra.mxu0 %vm462_vm8, %v3337_v27 }
0x1e71   :  { %8868 = vmatpush3.xpose.msk.msra.mxu0 %vm378_vm3, %v3432_v12  ;;  %8871 = vmatprep.mubr.msk.f32.mxu0 %vm378_vm3, %v3426_v17 }
0x1e72   :  { %8869 = vmatprep.subr.msk.mxu0 %vm378_vm3, %v3430_v14 }
0x1e75   :  { %8870 = vmatpush3.xpose.msk.msra.mxu0 %vm378_vm3, %v3430_v14 }
0x1e78   :  { %8872 = vmatmul.mubr.msk.f32.vlgmr.msra.gmra.mxu0 %vm378_vm3, %v3428_v31 }
0x1efb   :  { %v10109_v39 = vpop.f32.mrf.mxu0 }
0x1efd   :  { %v10111_v22 = vpop.f32.mrf.mxu0 }
0x1f30   :  { %v10113_v38 = vpop.f32.mrf.mxu0 }
0x1f32   :  { %v10115_v36 = vpop.f32.mrf.mxu0 }
0x1f38   :  { %v8873_v37 = vpop.f32.mrf.mxu0 }
0x1f39   :  { %v3513_v26 = vadd.f32 %v8873_v37, %v10062_v34 }
0x1f3a   :  { %v3507_v23 = vpop.f32.mrf.mxu0 }
0x1f3b   :  { %v3508_v40 = vadd.f32 %v3507_v23, %v10065_v35  ;;  %v3519_v41 = vsel %vm462_vm8, %v3513_v26, -inf }
0x1f3c   :  { %3520 = vmax.xlane.f32.xlu1 %v3519_v41  ;;  %v3857_v41 = vld [vmem:[#allocation6 + $0x170] sm:$0xff] }
0x1f3d   :  { %v3516_v19 = vsel %vm462_vm8, %v3508_v40, -inf }
0x1f3e   :  { %3517 = vmax.xlane.f32.xlu0 %v3516_v19  ;;  %v3855_v19 = vld [vmem:[#allocation6 + $0x160] sm:$0xff] }
0x1f4d   :  { %3540 = vrot.lane.b32.xlu1 %v10024_v11, %s9569_s26 }
0x1f51   :  { %3631 = vrot.lane.b32.xlu1 %v10024_v11, %s9570_s28 }
0x1f55   :  { %3629 = vrot.lane.b32.xlu1 %v10026_v16, %s9570_s28 }
0x1f59   :  { %3627 = vrot.lane.b32.xlu1 %v10024_v11, %s9571_s29 }
0x1fc5   :  { %v3521_v28 = vpop.xlane.xlu1 %3520 }
0x1fc6   :  { %v3523_v44 = vsub.f32 %v3513_v26, %v3521_v28 }
0x1fc7   :  { %v3518_v42 = vpop.xlane.xlu0 %3517 }
0x1fc8   :  { %v3526_v45 = vmul.f32 1.442695, %v3523_v44  ;;  %v3522_v46 = vsub.f32 %v3508_v40, %v3518_v42  ;;  %v3858_v40 = vld [vmem:[#allocation6 + $0x178] sm:$0xff]  ;;  %v8059_v42 = vld [vmem:[%s10797_s5 + $0xb] ss:$0 sm:$0xff] }
0x1fc9   :  { %v3541_v47 = vpop.permute.xlu1 %3540 }
0x1fca   :  { %9344 = vpow2.f32 %v3526_v45  ;;  %v3524_v48 = vmul.f32 1.442695, %v3522_v46  ;;  %8874 = vmatprep.subr.mxu1 %v3541_v47  ;;  %v2832_v45 = vadd.f32 %v8059_v42, %v10107_v33  ;;  %v2837_v46 = vadd.f32 %v10105_v32, %v8059_v42 }
0x1fcb   :  { %8875 = vmatpush3.msra.mxu1 %v3541_v47 }
0x1fcc   :  { %9346 = vpow2.f32 %v3524_v48  ;;  %v2840_v47 = vadd.f32 %v2832_v45, %v9998_v60  ;;  %v2841_v48 = vadd.f32 %v2837_v46, %v10002_v62 }
0x1fcd   :  { %v3632_v59 = vpop.permute.xlu1 %3631 }
0x1fd1   :  { %v3630_v2 = vpop.permute.xlu1 %3629 }
0x1fd5   :  { %v3628_v3 = vpop.permute.xlu1 %3627 }
0x1fd7   :  { %v9345_v49 = vpop.eup %9344 }
0x1fd8   :  { %v3531_v52 = vsel %vm462_vm8, %v9345_v49, 0.0 }
0x1fd9   :  { %v9347_v53 = vpop.eup %9346  ;;  %3532 = vadd.xlane.f32.xlu0 %v3531_v52  ;;  %v2849_v52 = vsel %vm290_vm2, %v2841_v48, 0.0 }
0x1fda   :  { %v3528_v54 = vsel %vm462_vm8, %v9347_v53, 0.0 }
0x1fdd   :  { %3529 = vadd.xlane.f32.xlu0 %v3528_v54 }
0x1ff3   :  { %3538 = vrot.lane.b32.xlu0 %v10026_v16, %s9569_s26 }
0x1ff7   :  { %3625 = vrot.lane.b32.xlu0 %v10026_v16, %s9571_s29 }
0x2062   :  { %v3533_v55 = vpop.xlane.xlu0 %3532 }
0x2063   :  { %9348 = vrcp.f32 %v3533_v55 }
0x2066   :  { %v3530_v56 = vpop.xlane.xlu0 %3529 }
0x2067   :  { %9350 = vrcp.f32 %v3530_v56 }
0x206a   :  { %v3539_v57 = vpop.permute.xlu0 %3538 }
0x206b   :  { %8876 = vmatprep.subr.mxu1 %v3539_v57 }
0x206c   :  { %8877 = vmatpush3.msra.mxu1 %v3539_v57 }
0x206d   :  { %8881 = vmatprep.subr.msk.mxu1 %vm378_vm3, %v3632_v59 }
0x206e   :  { %v3626_v1 = vpop.permute.xlu0 %3625 }
0x2070   :  { %v9349_v43 = vpop.eup %9348 }
0x2071   :  { %v3537_v0 = vmul.f32 %v9349_v43, %v9345_v49  ;;  %v2846_v49 = vsel %vm290_vm2, %v2840_v47, 0.0 }
0x2074   :  { %v9351_v61 = vpop.eup %9350 }
0x2075   :  { %v3535_v58 = vmul.f32 %v9351_v61, %v9347_v53 }
0x2077   :  { %8878 = vmatprep.mubr.msk.f32.mxu1 %vm462_vm8, %v3535_v58 }
0x2078   :  { %8879 = vmatmul.mubr.msk.f32.vlgmr.msra.gmra.mxu1 %vm462_vm8, %v3537_v0 }
0x2079   :  { %8882 = vmatpush3.xpose.msk.msra.mxu1 %vm378_vm3, %v3632_v59  ;;  %8885 = vmatprep.mubr.msk.f32.mxu1 %vm378_vm3, %v3626_v1 }
0x207a   :  { %8883 = vmatprep.subr.msk.mxu1 %vm378_vm3, %v3630_v2 }
0x207d   :  { %8884 = vmatpush3.xpose.msk.msra.mxu1 %vm378_vm3, %v3630_v2 }
0x2080   :  { %8886 = vmatmul.mubr.msk.f32.vlgmr.msra.gmra.mxu1 %vm378_vm3, %v3628_v3 }
0x2138   :  { %v8880_v25 = vpop.f32.mrf.mxu1 }
0x213a   :  { %v3616_v5 = vpop.f32.mrf.mxu1 }
0x2140   :  { %v8887_v6 = vpop.f32.mrf.mxu1 }
0x2141   :  { %v3713_v7 = vadd.f32 %v8887_v6, %v10062_v34 }
0x2142   :  { %v3707_v24 = vpop.f32.mrf.mxu1 }
0x2143   :  { %v3708_v8 = vadd.f32 %v3707_v24, %v10065_v35  ;;  %v3719_v9 = vsel %vm462_vm8, %v3713_v7, -inf }
0x2144   :  { %3720 = vmax.xlane.f32.xlu1 %v3719_v9 }
0x2145   :  { %v3716_v51 = vsel %vm462_vm8, %v3708_v8, -inf }
0x2146   :  { %3717 = vmax.xlane.f32.xlu0 %v3716_v51 }
0x2155   :  { %3740 = vrot.lane.b32.xlu1 %v10024_v11, %s9572_s30 }
0x2159   :  { %3827 = vrot.lane.b32.xlu1 %v10115_v36, %s9559_s27 }
0x215d   :  { %3829 = vrot.lane.b32.xlu1 %v10113_v38, %s9559_s27 }
0x2161   :  { %3837 = vrot.lane.b32.xlu1 %v8880_v25, %s9573_s7 }
0x21cd   :  { %v3721_v10 = vpop.xlane.xlu1 %3720 }
0x21ce   :  { %v3723_v13 = vsub.f32 %v3713_v7, %v3721_v10 }
0x21cf   :  { %v3718_v50 = vpop.xlane.xlu0 %3717 }
0x21d0   :  { %v3726_v12 = vmul.f32 1.442695, %v3723_v13  ;;  %v3722_v14 = vsub.f32 %v3708_v8, %v3718_v50 }
0x21d1   :  { %v3741_v15 = vpop.permute.xlu1 %3740 }
0x21d2   :  { %9352 = vpow2.f32 %v3726_v12  ;;  %v3724_v18 = vmul.f32 1.442695, %v3722_v14  ;;  %8888 = vmatprep.subr.mxu0 %v3741_v15  ;;  %v8064_v14 = vld [vmem:[%s10797_s5 + $0xe] ss:$0 sm:$0xff] }
0x21d3   :  { %8889 = vmatpush3.msra.mxu0 %v3741_v15 }
0x21d4   :  { %9354 = vpow2.f32 %v3724_v18  ;;  %v8099_v18 = vld [vmem:[%s10797_s5 + $0x13] ss:$0 sm:$0xff] }
0x21d5   :  { %v3828_v53 = vpop.permute.xlu1 %3827 }
0x21d6   :  { %v3849_v57 = vsel %vm378_vm3, %v10111_v22, %v3828_v53 }
0x21d9   :  { %v3830_v54 = vpop.permute.xlu1 %3829 }
0x21da   :  { %v3850_v32 = vsel %vm378_vm3, %v10109_v39, %v3830_v54 }
0x21dd   :  { %v3838_v55 = vpop.permute.xlu1 %3837 }
0x21de   :  { %v3852_v59 = vsel %vm462_vm8, %v3850_v32, %v3838_v55 }
0x21df   :  { %v9353_v11 = vpop.eup %9352 }
0x21e0   :  { %v3731_v20 = vsel %vm462_vm8, %v9353_v11, 0.0 }
0x21e1   :  { %v9355_v21 = vpop.eup %9354  ;;  %3732 = vadd.xlane.f32.xlu0 %v3731_v20 }
0x21e2   :  { %v3728_v27 = vsel %vm462_vm8, %v9355_v21, 0.0 }
0x21e5   :  { %3729 = vadd.xlane.f32.xlu0 %v3728_v27 }
0x21fb   :  { %3738 = vrot.lane.b32.xlu0 %v10026_v16, %s9572_s30  ;;  %v3856_v16 = vld [vmem:[#allocation6 + $0x168] sm:$0xff] }
0x21ff   :  { %3835 = vrot.lane.b32.xlu0 %v3616_v5, %s9573_s7 }
0x226a   :  { %v3733_v17 = vpop.xlane.xlu0 %3732 }
0x226b   :  { %9356 = vrcp.f32 %v3733_v17 }
0x226e   :  { %v3730_v31 = vpop.xlane.xlu0 %3729 }
0x226f   :  { %9358 = vrcp.f32 %v3730_v31 }
0x2272   :  { %v3739_v38 = vpop.permute.xlu0 %3738 }
0x2273   :  { %8890 = vmatprep.subr.mxu0 %v3739_v38 }
0x2274   :  { %8891 = vmatpush3.msra.mxu0 %v3739_v38 }
0x2275   :  { %8895 = vmatprep.subr.mxu0 %v3858_v40 }
0x2276   :  { %v3836_v56 = vpop.permute.xlu0 %3835 }
0x2277   :  { %v3851_v60 = vsel %vm462_vm8, %v3849_v57, %v3836_v56 }
0x2278   :  { %v9357_v36 = vpop.eup %9356 }
0x2279   :  { %v3737_v23 = vmul.f32 %v9357_v36, %v9353_v11  ;;  %v8065_v11 = vld [vmem:[%s10797_s5 + $0xf] ss:$0 sm:$0xff] }
0x227c   :  { %v9359_v37 = vpop.eup %9358 }
0x227d   :  { %v3735_v26 = vmul.f32 %v9359_v37, %v9355_v21 }
0x227f   :  { %8892 = vmatprep.mubr.msk.f32.mxu0 %vm462_vm8, %v3735_v26 }
0x2280   :  { %8893 = vmatmul.mubr.msk.f32.vlgmr.msra.gmra.mxu0 %vm462_vm8, %v3737_v23 }
0x2281   :  { %8896 = vmatpush3.msra.mxu0 %v3858_v40 }
0x2282   :  { %8897 = vmatprep.subr.mxu0 %v3857_v41 }
0x2283   :  { %8898 = vmatpush3.msra.mxu0 %v3857_v41 }
0x2284   :  { %8899 = vmatprep.subr.mxu0 %v3856_v16 }
0x2285   :  { %8900 = vmatpush3.msra.mxu0 %v3856_v16 }
0x2286   :  { %8901 = vmatprep.subr.mxu0 %v3855_v19 }
0x2287   :  { %8902 = vmatpush3.msra.mxu0 %v3855_v19 }
0x2340   :  { %v8894_v28 = vpop.f32.mrf.mxu0 }
0x2341   :  { %3845 = vrot.lane.b32.xlu1 %v8894_v28, %s9574_s8 }
0x2342   :  { %v3816_v44 = vpop.f32.mrf.mxu0 }
0x2343   :  { %3843 = vrot.lane.b32.xlu0 %v3816_v44, %s9574_s8 }
0x2362   :  { %2847 = vadd.xlane.f32.xlu0 %v2846_v49 }
0x2365   :  { %2850 = vadd.xlane.f32.xlu1 %v2849_v52 }
0x23b3   :  { %v3846_v33 = vpop.permute.xlu1 %3845 }
0x23b4   :  { %v3854_v61 = vsel %vm1200_vm9, %v3852_v59, %v3846_v33  ;;  %v4092_v59 = vld [vmem:[#allocation6 + $0x1b8] sm:$0xff] }
0x23b5   :  { %v3844_v62 = vpop.permute.xlu0 %3843  ;;  %8917 = vmatprep.subr.mxu0 %v4092_v59 }
0x23b6   :  { %v3853_v43 = vsel %vm1200_vm9, %v3851_v60, %v3844_v62 }
0x23b7   :  { %8903 = vmatprep.mubr.msk.f32.mxu0 %vm290_vm2, %v3853_v43  ;;  %v4091_v43 = vld [vmem:[#allocation6 + $0x1b0] sm:$0xff] }
0x23b8   :  { %8904 = vmatmul.mubr.msk.f32.vlgmr.msra.gmra.mxu0 %vm290_vm2, %v3854_v61  ;;  %v3999_v61 = vld [vmem:[#allocation6 + $0x198] sm:$0xff] }
0x23b9   :  { %8906 = vmatprep.subr.mxu1 %v3999_v61  ;;  %8918 = vmatpush3.msra.mxu0 %v4092_v59 }
0x23ba   :  { %8907 = vmatpush3.msra.mxu1 %v3999_v61  ;;  %8919 = vmatprep.subr.mxu0 %v4091_v43 }
0x23bb   :  { %8920 = vmatpush3.msra.mxu0 %v4091_v43 }
0x23eb   :  { %v2848_v58 = vpop.xlane.xlu0 %2847 }
0x23ec   :  { %v2852_v0 = vmul.f32 0.03125, %v2848_v58  ;;  %v4090_v58 = vld [vmem:[#allocation6 + $0x1a8] sm:$0xff] }
0x23ed   :  { %8921 = vmatprep.subr.mxu0 %v4090_v58 }
0x23ee   :  { %v2854_v22 = vsub.f32 %v2840_v47, %v2852_v0  ;;  %v2851_v1 = vpop.xlane.xlu1 %2850  ;;  %8922 = vmatpush3.msra.mxu0 %v4090_v58  ;;  %v3998_v0 = vld [vmem:[#allocation6 + $0x190] sm:$0xff] }
0x23ef   :  { %v2853_v2 = vmul.f32 0.03125, %v2851_v1  ;;  %8908 = vmatprep.subr.mxu1 %v3998_v0  ;;  %v3997_v1 = vld [vmem:[#allocation6 + $0x188] sm:$0xff] }
0x23f0   :  { %v2856_v3 = vmul.f32 %v2854_v22, %v2854_v22  ;;  %8909 = vmatpush3.msra.mxu1 %v3998_v0 }
0x23f1   :  { %v2855_v39 = vsub.f32 %v2841_v48, %v2853_v2  ;;  %8910 = vmatprep.subr.mxu1 %v3997_v1  ;;  %v3996_v2 = vld [vmem:[#allocation6 + $0x180] sm:$0xff] }
0x23f2   :  { %v2858_v25 = vsel %vm290_vm2, %v2856_v3, 0.0  ;;  %8911 = vmatpush3.msra.mxu1 %v3997_v1 }
0x23f3   :  { %2859 = vadd.xlane.f32.xlu0 %v2858_v25  ;;  %v2857_v5 = vmul.f32 %v2855_v39, %v2855_v39  ;;  %8912 = vmatprep.subr.mxu1 %v3996_v2 }
0x23f4   :  { %8913 = vmatpush3.msra.mxu1 %v3996_v2 }
0x23f5   :  { %v2861_v6 = vsel %vm290_vm2, %v2857_v5, 0.0 }
0x23f7   :  { %2862 = vadd.xlane.f32.xlu0 %v2861_v6 }
0x2478   :  { %v8905_v13 = vpop.f32.mrf.mxu0 }
0x2479   :  { %v3945_v38 = vadd.f32 %v8905_v13, %v8099_v18 }
0x247a   :  { %v3939_v12 = vpop.f32.mrf.mxu0 }
0x247b   :  { %v3940_v20 = vadd.f32 %v8099_v18, %v3939_v12  ;;  %v3949_v40 = vadd.f32 %v3945_v38, %v10012_v4  ;;  %v8068_v12 = vld [vmem:[%s10797_s5 + $0x10] ss:$0 sm:$0xff]  ;;  %v8105_v38 = vld [vmem:[%s10797_s5 + $0x1a] ss:$0 sm:$0xff] }
0x247c   :  { %v2860_v7 = vpop.xlane.xlu0 %2859 }
0x247d   :  { %v2864_v24 = vmul.f32 0.03125, %v2860_v7  ;;  %v3948_v36 = vadd.f32 %v3940_v20, %v10005_v63  ;;  %v3957_v19 = vsel %vm290_vm2, %v3949_v40, 0.0  ;;  %v8104_v20 = vld [vmem:[%s10797_s5 + $0x19] ss:$0 sm:$0xff] }
0x247f   :  { %v2866_v8 = vadd.f32 1e-05, %v2864_v24  ;;  %v3954_v41 = vsel %vm290_vm2, %v3948_v36, 0.0 }
0x2480   :  { %v2863_v9 = vpop.xlane.xlu0 %2862 }
0x2481   :  { %9360 = vrsqrt.f32 %v2866_v8  ;;  %v2865_v51 = vmul.f32 0.03125, %v2863_v9 }
0x2483   :  { %v2867_v10 = vadd.f32 1e-05, %v2865_v51 }
0x2485   :  { %9362 = vrsqrt.f32 %v2867_v10 }
0x248e   :  { %v9361_v50 = vpop.eup %9360 }
0x248f   :  { %v2870_v15 = vmul.f32 %v9361_v50, %v2854_v22  ;;  %v4089_v22 = vld [vmem:[#allocation6 + $0x1a0] sm:$0xff] }
0x2490   :  { %8923 = vmatprep.subr.mxu0 %v4089_v22 }
0x2491   :  { %v2878_v21 = vmul.f32 %v8064_v14, %v2870_v15  ;;  %8924 = vmatpush3.msra.mxu0 %v4089_v22  ;;  %v8069_v15 = vld [vmem:[%s10797_s5 + $0x11] ss:$0 sm:$0xff] }
0x2492   :  { %v9363_v27 = vpop.eup %9362 }
0x2493   :  { %v2886_v17 = vadd.f32 %v8065_v11, %v2878_v21  ;;  %v2871_v31 = vmul.f32 %v9363_v27, %v2855_v39 }
0x2495   :  { %v2892_v37 = vsel %vm290_vm2, %v2886_v17, 0.0  ;;  %v2879_v26 = vmul.f32 %v8064_v14, %v2871_v31 }
0x2496   :  { %2893 = vadd.xlane.f32.xlu1 %v2892_v37 }
0x2497   :  { %v2887_v23 = vadd.f32 %v8065_v11, %v2879_v26 }
0x2499   :  { %v2895_v16 = vsel %vm290_vm2, %v2887_v23, 0.0 }
0x249a   :  { %3955 = vadd.xlane.f32.xlu1 %v3954_v41  ;;  %2896 = vadd.xlane.f32.xlu0 %v2895_v16 }
0x249e   :  { %3958 = vadd.xlane.f32.xlu0 %v3957_v19 }
0x251f   :  { %v2894_v28 = vpop.xlane.xlu1 %2893 }
0x2520   :  { %v2898_v44 = vmul.f32 0.03125, %v2894_v28  ;;  %v8111_v28 = vld [vmem:[%s10797_s5 + $0x15] ss:$0 sm:$0xff] }
0x2522   :  { %v10199_v42 = vsub.f32 %v2886_v17, %v2898_v44 }
0x2523   :  { %v3956_v63 = vpop.xlane.xlu1 %3955  ;;  %v2897_v45 = vpop.xlane.xlu0 %2896 }
0x2524   :  { %v3960_v46 = vmul.f32 0.03125, %v3956_v63  ;;  %v2899_v47 = vmul.f32 0.03125, %v2897_v45  ;;  %v2902_v4 = vmul.f32 %v10199_v42, %v10199_v42 }
0x2526   :  { %v10203_v48 = vsub.f32 %v3948_v36, %v3960_v46  ;;  %v10205_v49 = vsub.f32 %v2887_v23, %v2899_v47  ;;  %v2904_v52 = vsel %vm290_vm2, %v2902_v4, 0.0  ;;  %v8107_v47 = vld [vmem:[%s10797_s5 + $0x14] ss:$0 sm:$0xff] }
0x2527   :  { %2905 = vadd.xlane.f32.xlu1 %v2904_v52  ;;  %v3959_v53 = vpop.xlane.xlu0 %3958 }
0x2528   :  { %v3961_v54 = vmul.f32 0.03125, %v3959_v53  ;;  %v3964_v55 = vmul.f32 %v10203_v48, %v10203_v48  ;;  %v2903_v56 = vmul.f32 %v10205_v49, %v10205_v49 }
0x252a   :  { %v10212_v57 = vsub.f32 %v3949_v40, %v3961_v54  ;;  %v3966_v33 = vsel %vm290_vm2, %v3964_v55, 0.0  ;;  %v2907_v32 = vsel %vm290_vm2, %v2903_v56, 0.0 }
0x252b   :  { %3967 = vadd.xlane.f32.xlu1 %v3966_v33  ;;  %2908 = vadd.xlane.f32.xlu0 %v2907_v32 }
0x252c   :  { %v3965_v60 = vmul.f32 %v10212_v57, %v10212_v57 }
0x252e   :  { %v3969_v62 = vsel %vm290_vm2, %v3965_v60, 0.0 }
0x252f   :  { %3970 = vadd.xlane.f32.xlu0 %v3969_v62 }
0x25b0   :  { %v2906_v3 = vpop.xlane.xlu1 %2905 }
0x25b1   :  { %v2910_v39 = vmul.f32 0.03125, %v2906_v3 }
0x25b3   :  { %v2912_v25 = vadd.f32 1e-05, %v2910_v39 }
0x25b4   :  { %v3968_v5 = vpop.xlane.xlu1 %3967  ;;  %v2909_v6 = vpop.xlane.xlu0 %2908 }
0x25b5   :  { %9364 = vrsqrt.f32 %v2912_v25  ;;  %v3972_v7 = vmul.f32 0.03125, %v3968_v5  ;;  %v2911_v24 = vmul.f32 0.03125, %v2909_v6 }
0x25b7   :  { %v3974_v8 = vadd.f32 1e-05, %v3972_v7  ;;  %v2913_v9 = vadd.f32 1e-05, %v2911_v24 }
0x25b8   :  { %v3971_v51 = vpop.xlane.xlu0 %3970 }
0x25b9   :  { %9366 = vrsqrt.f32 %v3974_v8  ;;  %v3973_v10 = vmul.f32 0.03125, %v3971_v51 }
0x25ba   :  { %9368 = vrsqrt.f32 %v2913_v9 }
0x25bb   :  { %v3975_v13 = vadd.f32 1e-05, %v3973_v10 }
0x25bd   :  { %9370 = vrsqrt.f32 %v3975_v13 }
0x25c2   :  { %v9365_v50 = vpop.eup %9364 }
0x25c3   :  { %v2916_v14 = vmul.f32 %v9365_v50, %v10199_v42 }
0x25c5   :  { %v2924_v18 = vmul.f32 %v8068_v12, %v2916_v14 }
0x25c6   :  { %v9367_v11 = vpop.eup %9366 }
0x25c7   :  { %v9369_v21 = vpop.eup %9368  ;;  %v10229_v27 = vadd.f32 %v8069_v15, %v2924_v18  ;;  %v3978_v17 = vmul.f32 %v9367_v11, %v10203_v48 }
0x25c8   :  { %v2917_v31 = vmul.f32 %v9369_v21, %v10205_v49 }
0x25c9   :  { %8925 = vmatprep.mubr.msk.f32.mxu0 %vm290_vm2, %v10229_v27  ;;  %v3986_v36 = vmul.f32 %v8104_v20, %v3978_v17 }
0x25ca   :  { %v9371_v37 = vpop.eup %9370  ;;  %v2925_v26 = vmul.f32 %v8068_v12, %v2917_v31 }
0x25cb   :  { %v3979_v23 = vmul.f32 %v9371_v37, %v10212_v57  ;;  %v10239_v40 = vadd.f32 %v8105_v38, %v3986_v36 }
0x25cc   :  { %v10241_v41 = vadd.f32 %v8069_v15, %v2925_v26 }
0x25cd   :  { %v3987_v16 = vmul.f32 %v8104_v20, %v3979_v23  ;;  %8914 = vmatprep.mubr.msk.f32.mxu1 %vm290_vm2, %v10239_v40 }
0x25ce   :  { %8926 = vmatmul.mubr.msk.f32.vlgmr.msra.gmra.mxu0 %vm290_vm2, %v10241_v41 }
0x25cf   :  { %v10247_v19 = vadd.f32 %v8105_v38, %v3987_v16 }
0x25d1   :  { %8915 = vmatmul.mubr.msk.f32.vlgmr.msra.gmra.mxu1 %vm290_vm2, %v10247_v19 }
0x268e   :  { %v8927_v44 = vpop.f32.mrf.mxu0 }
0x268f   :  { %v10254_v42 = vadd.f32 %v8927_v44, %v8111_v28 }
0x2690   :  { %v4173_v63 = vpop.f32.mrf.mxu0 }
0x2691   :  { %v10256_v45 = vadd.f32 %v8111_v28, %v4173_v63  ;;  %4384 = vrot.lane.b32.xlu1 %v10254_v42, %s9564_s21  ;;  %8928 = vmatprep.subr.msk.mxu1 %vm378_vm3, %v10254_v42  ;;  %v8916_v46 = vpop.f32.mrf.mxu1 }
0x2692   :  { %8929 = vmatpush3.xpose.msk.msra.mxu1 %vm378_vm3, %v10254_v42  ;;  %v10277_v49 = vadd.f32 %v8916_v46, %v8107_v47 }
0x2693   :  { %4382 = vrot.lane.b32.xlu0 %v10256_v45, %s9564_s21  ;;  %8930 = vmatprep.subr.msk.mxu1 %vm378_vm3, %v10256_v45  ;;  %v4080_v4 = vpop.f32.mrf.mxu1 }
0x2694   :  { %v10271_v48 = vadd.f32 %v8107_v47, %v4080_v4 }
0x2696   :  { %8931 = vmatpush3.xpose.msk.msra.mxu1 %vm378_vm3, %v10256_v45  ;;  %4378 = vrot.lane.b32.xlu1 %v10271_v48, %s9564_s21 }
0x2697   :  { %8932 = vmatprep.mubr.msk.f32.mxu1 %vm378_vm3, %v10271_v48 }
0x2699   :  { %8933 = vmatmul.mubr.msk.f32.vlgmr.msra.gmra.mxu1 %vm378_vm3, %v10277_v49 }
0x269a   :  { %4380 = vrot.lane.b32.xlu1 %v10277_v49, %s9564_s21 }
0x2703   :  { %v4385_v52 = vpop.permute.xlu1 %4384 }
0x2704   :  { %8942 = vmatprep.subr.msk.mxu1 %vm378_vm3, %v4385_v52 }
0x2705   :  { %8943 = vmatpush3.xpose.msk.msra.mxu1 %vm378_vm3, %v4385_v52  ;;  %v4383_v53 = vpop.permute.xlu0 %4382 }
0x2706   :  { %8944 = vmatprep.subr.msk.mxu1 %vm378_vm3, %v4383_v53 }
0x2708   :  { %v4379_v54 = vpop.permute.xlu1 %4378 }
0x2709   :  { %8945 = vmatpush3.xpose.msk.msra.mxu1 %vm378_vm3, %v4383_v53  ;;  %8946 = vmatprep.mubr.msk.f32.mxu1 %vm378_vm3, %v4379_v54 }
0x270c   :  { %v4381_v55 = vpop.permute.xlu1 %4380 }
0x270d   :  { %8947 = vmatmul.mubr.msk.f32.vlgmr.msra.gmra.mxu1 %vm378_vm3, %v4381_v55 }
0x2759   :  { %v8934_v56 = vpop.f32.mrf.mxu1 }
0x275a   :  { %v4266_v57 = vadd.f32 %v8934_v56, %v9687_v30 }
0x275b   :  { %v4260_v33 = vpop.f32.mrf.mxu1 }
0x275c   :  { %v4261_v32 = vadd.f32 %v4260_v33, %v9682_v29  ;;  %v4272_v60 = vsel %vm462_vm8, %v4266_v57, -inf }
0x275d   :  { %4273 = vmax.xlane.f32.xlu1 %v4272_v60 }
0x275e   :  { %v4269_v62 = vsel %vm462_vm8, %v4261_v32, -inf }
0x275f   :  { %4270 = vmax.xlane.f32.xlu0 %v4269_v62 }
0x276e   :  { %4293 = vrot.lane.b32.xlu1 %v10254_v42, %s9561_s20 }
0x2772   :  { %4493 = vrot.lane.b32.xlu1 %v10254_v42, %s9565_s22 }
0x2776   :  { %4491 = vrot.lane.b32.xlu1 %v10256_v45, %s9565_s22 }
0x27cd   :  { %v8948_v59 = vpop.f32.mrf.mxu1 }
0x27ce   :  { %v4466_v58 = vadd.f32 %v8948_v59, %v9687_v30 }
0x27cf   :  { %v4460_v43 = vpop.f32.mrf.mxu1 }
0x27d0   :  { %v4461_v61 = vadd.f32 %v4460_v43, %v9682_v29  ;;  %v4472_v22 = vsel %vm462_vm8, %v4466_v58, -inf }
0x27d2   :  { %v4469_v0 = vsel %vm462_vm8, %v4461_v61, -inf }
0x27d3   :  { %4470 = vmax.xlane.f32.xlu0 %v4469_v0 }
0x27d7   :  { %4473 = vmax.xlane.f32.xlu0 %v4472_v22 }
0x27e6   :  { %v4274_v1 = vpop.xlane.xlu1 %4273 }
0x27e7   :  { %v4276_v5 = vsub.f32 %v4266_v57, %v4274_v1 }
0x27e8   :  { %v4271_v2 = vpop.xlane.xlu0 %4270 }
0x27e9   :  { %v4275_v3 = vsub.f32 %v4261_v32, %v4271_v2  ;;  %v4279_v6 = vmul.f32 1.442695, %v4276_v5 }
0x27ea   :  { %v4294_v39 = vpop.permute.xlu1 %4293 }
0x27eb   :  { %v4277_v25 = vmul.f32 1.442695, %v4275_v3  ;;  %8935 = vmatprep.subr.mxu0 %v4294_v39 }
0x27ec   :  { %8936 = vmatpush3.msra.mxu0 %v4294_v39 }
0x27ed   :  { %9372 = vpow2.f32 %v4277_v25  ;;  %4291 = vrot.lane.b32.xlu0 %v10256_v45, %s9561_s20 }
0x27ee   :  { %9374 = vpow2.f32 %v4279_v6  ;;  %v4494_v18 = vpop.permute.xlu1 %4493 }
0x27f2   :  { %v4492_v31 = vpop.permute.xlu1 %4491 }
0x27fa   :  { %v9373_v7 = vpop.eup %9372 }
0x27fb   :  { %v4281_v24 = vsel %vm462_vm8, %v9373_v7, 0.0  ;;  %v9375_v8 = vpop.eup %9374 }
0x27fc   :  { %4282 = vadd.xlane.f32.xlu1 %v4281_v24  ;;  %v4284_v9 = vsel %vm462_vm8, %v9375_v8, 0.0 }
0x280c   :  { %4285 = vadd.xlane.f32.xlu0 %v4284_v9 }
0x280d   :  { %4582 = vrot.lane.b32.xlu1 %v10256_v45, %s9568_s25 }
0x285c   :  { %v4471_v51 = vpop.xlane.xlu0 %4470 }
0x285d   :  { %v4475_v10 = vsub.f32 %v4461_v61, %v4471_v51 }
0x285f   :  { %v4477_v13 = vmul.f32 1.442695, %v4475_v10 }
0x2860   :  { %v4474_v50 = vpop.xlane.xlu0 %4473 }
0x2861   :  { %9376 = vpow2.f32 %v4477_v13  ;;  %v4476_v12 = vsub.f32 %v4466_v58, %v4474_v50 }
0x2863   :  { %v4479_v14 = vmul.f32 1.442695, %v4476_v12 }
0x2864   :  { %v4292_v15 = vpop.permute.xlu0 %4291 }
0x2865   :  { %9378 = vpow2.f32 %v4479_v14  ;;  %8937 = vmatprep.subr.mxu0 %v4292_v15 }
0x2866   :  { %8938 = vmatpush3.msra.mxu0 %v4292_v15 }
0x2867   :  { %8949 = vmatprep.subr.mxu0 %v4494_v18 }
0x286e   :  { %v9377_v11 = vpop.eup %9376 }
0x286f   :  { %v4481_v20 = vsel %vm462_vm8, %v9377_v11, 0.0 }
0x2870   :  { %4482 = vadd.xlane.f32.xlu1 %v4481_v20 }
0x2872   :  { %v9379_v21 = vpop.eup %9378 }
0x2873   :  { %v4484_v17 = vsel %vm462_vm8, %v9379_v21, 0.0 }
0x2874   :  { %4485 = vadd.xlane.f32.xlu0 %v4484_v17 }
0x2881   :  { %4580 = vrot.lane.b32.xlu1 %v10277_v49, %s9568_s25 }
0x2885   :  { %v4283_v38 = vpop.xlane.xlu1 %4282 }
0x2886   :  { %9380 = vrcp.f32 %v4283_v38 }
0x2889   :  { %v4583_v28 = vpop.permute.xlu1 %4582 }
0x288a   :  { %4584 = vrot.lane.b32.xlu0 %v10254_v42, %s9568_s25 }
0x288e   :  { %4578 = vrot.lane.b32.xlu0 %v10271_v48, %s9568_s25 }
0x2893   :  { %v9381_v36 = vpop.eup %9380 }
0x2894   :  { %v4288_v37 = vmul.f32 %v9381_v36, %v9373_v7 }
0x2895   :  { %v4286_v26 = vpop.xlane.xlu0 %4285 }
0x2896   :  { %8939 = vmatprep.mubr.msk.f32.mxu0 %vm462_vm8, %v4288_v37  ;;  %9382 = vrcp.f32 %v4286_v26 }
0x28a3   :  { %v9383_v23 = vpop.eup %9382 }
0x28a4   :  { %v4290_v16 = vmul.f32 %v9383_v23, %v9375_v8 }
0x28a6   :  { %8940 = vmatmul.mubr.msk.f32.vlgmr.msra.gmra.mxu0 %vm462_vm8, %v4290_v16 }
0x28a7   :  { %8950 = vmatpush3.msra.mxu0 %v4494_v18 }
0x28a8   :  { %8951 = vmatprep.subr.mxu0 %v4492_v31 }
0x28a9   :  { %8952 = vmatpush3.msra.mxu0 %v4492_v31 }
0x28f9   :  { %v4483_v44 = vpop.xlane.xlu1 %4482 }
0x28fa   :  { %9384 = vrcp.f32 %v4483_v44 }
0x28fd   :  { %v4486_v63 = vpop.xlane.xlu0 %4485  ;;  %v4581_v55 = vpop.permute.xlu1 %4580 }
0x28fe   :  { %9386 = vrcp.f32 %v4486_v63 }
0x2901   :  { %v4585_v46 = vpop.permute.xlu0 %4584 }
0x2902   :  { %8956 = vmatprep.subr.msk.mxu0 %vm378_vm3, %v4585_v46 }
0x2905   :  { %v4579_v54 = vpop.permute.xlu0 %4578 }
0x2907   :  { %v9385_v47 = vpop.eup %9384 }
0x2908   :  { %v4488_v4 = vmul.f32 %v9385_v47, %v9377_v11 }
0x290a   :  { %8953 = vmatprep.mubr.msk.f32.mxu0 %vm462_vm8, %v4488_v4 }
0x290b   :  { %v9387_v52 = vpop.eup %9386 }
0x290c   :  { %v4490_v53 = vmul.f32 %v9387_v52, %v9379_v21 }
0x290e   :  { %8954 = vmatmul.mubr.msk.f32.vlgmr.msra.gmra.mxu0 %vm462_vm8, %v4490_v53 }
0x290f   :  { %8957 = vmatpush3.xpose.msk.msra.mxu0 %vm378_vm3, %v4585_v46  ;;  %8960 = vmatprep.mubr.msk.f32.mxu0 %vm378_vm3, %v4579_v54 }
0x2910   :  { %8958 = vmatprep.subr.msk.mxu0 %vm378_vm3, %v4583_v28 }
0x2913   :  { %8959 = vmatpush3.xpose.msk.msra.mxu0 %vm378_vm3, %v4583_v28 }
0x2916   :  { %8961 = vmatmul.mubr.msk.f32.vlgmr.msra.gmra.mxu0 %vm378_vm3, %v4581_v55 }
0x2966   :  { %v10329_v56 = vpop.f32.mrf.mxu0 }
0x2968   :  { %v10331_v57 = vpop.f32.mrf.mxu0 }
0x29ce   :  { %v10333_v33 = vpop.f32.mrf.mxu0 }
0x29d0   :  { %v10335_v32 = vpop.f32.mrf.mxu0 }
0x29d6   :  { %v8962_v60 = vpop.f32.mrf.mxu0 }
0x29d7   :  { %v4666_v62 = vadd.f32 %v8962_v60, %v9687_v30 }
0x29d8   :  { %v4660_v59 = vpop.f32.mrf.mxu0 }
0x29d9   :  { %v4661_v43 = vadd.f32 %v4660_v59, %v9682_v29  ;;  %v4672_v61 = vsel %vm462_vm8, %v4666_v62, -inf  ;;  %v5010_v59 = vld [vmem:[#allocation6 + $0x1d0] sm:$0xff] }
0x29da   :  { %4673 = vmax.xlane.f32.xlu1 %v4672_v61 }
0x29db   :  { %v4669_v58 = vsel %vm462_vm8, %v4661_v43, -inf }
0x29dc   :  { %4670 = vmax.xlane.f32.xlu0 %v4669_v58 }
0x29eb   :  { %4693 = vrot.lane.b32.xlu1 %v10254_v42, %s9567_s24 }
0x29ef   :  { %4784 = vrot.lane.b32.xlu1 %v10254_v42, %s9571_s29 }
0x29f3   :  { %4782 = vrot.lane.b32.xlu1 %v10256_v45, %s9571_s29 }
0x29f7   :  { %4780 = vrot.lane.b32.xlu1 %v10277_v49, %s9571_s29 }
0x2a63   :  { %v4674_v0 = vpop.xlane.xlu1 %4673 }
0x2a64   :  { %v4676_v22 = vsub.f32 %v4666_v62, %v4674_v0  ;;  %v5011_v62 = vld [vmem:[#allocation6 + $0x1d8] sm:$0xff] }
0x2a65   :  { %v4671_v1 = vpop.xlane.xlu0 %4670 }
0x2a66   :  { %v4679_v2 = vmul.f32 1.442695, %v4676_v22  ;;  %v4675_v3 = vsub.f32 %v4661_v43, %v4671_v1  ;;  %v5008_v43 = vld [vmem:[#allocation6 + $0x1c0] sm:$0xff] }
0x2a67   :  { %v4694_v39 = vpop.permute.xlu1 %4693 }
0x2a68   :  { %9388 = vpow2.f32 %v4679_v2  ;;  %v4677_v25 = vmul.f32 1.442695, %v4675_v3  ;;  %8963 = vmatprep.subr.mxu1 %v4694_v39 }
0x2a69   :  { %8964 = vmatpush3.msra.mxu1 %v4694_v39 }
0x2a6a   :  { %9390 = vpow2.f32 %v4677_v25 }
0x2a6b   :  { %v4785_v51 = vpop.permute.xlu1 %4784 }
0x2a75   :  { %v9389_v5 = vpop.eup %9388 }
0x2a76   :  { %v4684_v6 = vsel %vm462_vm8, %v9389_v5, 0.0 }
0x2a77   :  { %v9391_v7 = vpop.eup %9390  ;;  %4685 = vadd.xlane.f32.xlu0 %v4684_v6 }
0x2a78   :  { %v4681_v24 = vsel %vm462_vm8, %v9391_v7, 0.0 }
0x2a7b   :  { %4682 = vadd.xlane.f32.xlu0 %v4681_v24 }
0x2a91   :  { %4691 = vrot.lane.b32.xlu0 %v10256_v45, %s9567_s24 }
0x2a95   :  { %4778 = vrot.lane.b32.xlu0 %v10271_v48, %s9571_s29  ;;  %v4783_v48 = vpop.permute.xlu1 %4782 }
0x2a99   :  { %v4781_v15 = vpop.permute.xlu1 %4780 }
0x2b00   :  { %v4686_v49 = vpop.xlane.xlu0 %4685 }
0x2b01   :  { %9392 = vrcp.f32 %v4686_v49 }
0x2b04   :  { %v4683_v8 = vpop.xlane.xlu0 %4682 }
0x2b05   :  { %9394 = vrcp.f32 %v4683_v8 }
0x2b08   :  { %v4692_v9 = vpop.permute.xlu0 %4691 }
0x2b09   :  { %8965 = vmatprep.subr.mxu1 %v4692_v9 }
0x2b0a   :  { %8966 = vmatpush3.msra.mxu1 %v4692_v9 }
0x2b0b   :  { %8970 = vmatprep.subr.msk.mxu1 %vm378_vm3, %v4785_v51 }
0x2b0c   :  { %v4779_v14 = vpop.permute.xlu0 %4778 }
0x2b0e   :  { %v9393_v10 = vpop.eup %9392 }
0x2b0f   :  { %v4690_v12 = vmul.f32 %v9393_v10, %v9389_v5 }
0x2b12   :  { %v9395_v13 = vpop.eup %9394 }
0x2b13   :  { %v4688_v50 = vmul.f32 %v9395_v13, %v9391_v7 }
0x2b15   :  { %8967 = vmatprep.mubr.msk.f32.mxu1 %vm462_vm8, %v4688_v50 }
0x2b16   :  { %8968 = vmatmul.mubr.msk.f32.vlgmr.msra.gmra.mxu1 %vm462_vm8, %v4690_v12 }
0x2b17   :  { %8971 = vmatpush3.xpose.msk.msra.mxu1 %vm378_vm3, %v4785_v51  ;;  %8974 = vmatprep.mubr.msk.f32.mxu1 %vm378_vm3, %v4779_v14 }
0x2b18   :  { %8972 = vmatprep.subr.msk.mxu1 %vm378_vm3, %v4783_v48 }
0x2b1b   :  { %8973 = vmatpush3.xpose.msk.msra.mxu1 %vm378_vm3, %v4783_v48 }
0x2b1e   :  { %8975 = vmatmul.mubr.msk.f32.vlgmr.msra.gmra.mxu1 %vm378_vm3, %v4781_v15 }
0x2bd6   :  { %v8969_v18 = vpop.f32.mrf.mxu1 }
0x2bd8   :  { %v4769_v11 = vpop.f32.mrf.mxu1 }
0x2bde   :  { %v8976_v20 = vpop.f32.mrf.mxu1 }
0x2bdf   :  { %v4866_v21 = vadd.f32 %v8976_v20, %v9687_v30 }
0x2be0   :  { %v4860_v17 = vpop.f32.mrf.mxu1 }
0x2be1   :  { %v4861_v31 = vadd.f32 %v4860_v17, %v9682_v29  ;;  %v4872_v38 = vsel %vm462_vm8, %v4866_v21, -inf }
0x2be2   :  { %4873 = vmax.xlane.f32.xlu1 %v4872_v38  ;;  %v5151_v38 = vld [vmem:[#allocation6 + $0x1f0] sm:$0xff] }
0x2be3   :  { %v4869_v36 = vsel %vm462_vm8, %v4861_v31, -inf }
0x2be4   :  { %4870 = vmax.xlane.f32.xlu0 %v4869_v36  ;;  %v5150_v36 = vld [vmem:[#allocation6 + $0x1e8] sm:$0xff] }
0x2bf3   :  { %4893 = vrot.lane.b32.xlu1 %v10254_v42, %s9570_s28 }
0x2bf7   :  { %4980 = vrot.lane.b32.xlu1 %v10335_v32, %s9559_s27 }
0x2bfb   :  { %4982 = vrot.lane.b32.xlu1 %v10333_v33, %s9559_s27 }
0x2bff   :  { %4990 = vrot.lane.b32.xlu1 %v8969_v18, %s9573_s7 }
0x2c6b   :  { %v4874_v37 = vpop.xlane.xlu1 %4873 }
0x2c6c   :  { %v4876_v26 = vsub.f32 %v4866_v21, %v4874_v37  ;;  %v5149_v37 = vld [vmem:[#allocation6 + $0x1e0] sm:$0xff] }
0x2c6d   :  { %v4871_v23 = vpop.xlane.xlu0 %4870 }
0x2c6e   :  { %v4879_v16 = vmul.f32 1.442695, %v4876_v26  ;;  %v4875_v28 = vsub.f32 %v4861_v31, %v4871_v23  ;;  %v5251_v26 = vld [vmem:[#allocation6 + $0x238] sm:$0xff]  ;;  %v5250_v23 = vld [vmem:[#allocation6 + $0x230] sm:$0xff] }
0x2c6f   :  { %v4894_v44 = vpop.permute.xlu1 %4893 }
0x2c70   :  { %9396 = vpow2.f32 %v4879_v16  ;;  %v4877_v63 = vmul.f32 1.442695, %v4875_v28  ;;  %8977 = vmatprep.subr.mxu0 %v4894_v44  ;;  %v5249_v16 = vld [vmem:[#allocation6 + $0x228] sm:$0xff]  ;;  %v5248_v28 = vld [vmem:[#allocation6 + $0x220] sm:$0xff] }
0x2c71   :  { %8978 = vmatpush3.msra.mxu0 %v4894_v44 }
0x2c72   :  { %9398 = vpow2.f32 %v4877_v63 }
0x2c73   :  { %v4981_v0 = vpop.permute.xlu1 %4980 }
0x2c74   :  { %v5002_v3 = vsel %vm378_vm3, %v10331_v57, %v4981_v0  ;;  %v8139_v57 = vld [vmem:[%s10797_s5 + $0x16] ss:$0 sm:$0xff]  ;;  %v5244_v0 = vld [vmem:[#allocation6 + $0x200] sm:$0xff] }
0x2c77   :  { %v4983_v22 = vpop.permute.xlu1 %4982 }
0x2c78   :  { %v5003_v25 = vsel %vm378_vm3, %v10329_v56, %v4983_v22  ;;  %v8147_v22 = vld [vmem:[%s10797_s5 + $0x17] ss:$0 sm:$0xff] }
0x2c7b   :  { %v4991_v1 = vpop.permute.xlu1 %4990 }
0x2c7c   :  { %v5005_v7 = vsel %vm462_vm8, %v5003_v25, %v4991_v1 }
0x2c7d   :  { %v9397_v42 = vpop.eup %9396 }
0x2c7e   :  { %v4884_v46 = vsel %vm462_vm8, %v9397_v42, 0.0 }
0x2c7f   :  { %v9399_v47 = vpop.eup %9398  ;;  %4885 = vadd.xlane.f32.xlu0 %v4884_v46 }
0x2c80   :  { %v4881_v4 = vsel %vm462_vm8, %v9399_v47, 0.0 }
0x2c83   :  { %4882 = vadd.xlane.f32.xlu0 %v4881_v4 }
0x2c99   :  { %4891 = vrot.lane.b32.xlu0 %v10256_v45, %s9570_s28  ;;  %v5009_v45 = vld [vmem:[#allocation6 + $0x1c8] sm:$0xff] }
0x2c9d   :  { %4988 = vrot.lane.b32.xlu0 %v4769_v11, %s9573_s7 }
0x2d08   :  { %v4886_v52 = vpop.xlane.xlu0 %4885 }
0x2d09   :  { %9400 = vrcp.f32 %v4886_v52 }
0x2d0c   :  { %v4883_v53 = vpop.xlane.xlu0 %4882 }
0x2d0d   :  { %9402 = vrcp.f32 %v4883_v53  ;;  %v8144_v53 = vld [vmem:[%s10797_s5 + $0x1b] ss:$0 sm:$0xff] }
0x2d10   :  { %v4892_v54 = vpop.permute.xlu0 %4891 }
0x2d11   :  { %8979 = vmatprep.subr.mxu0 %v4892_v54 }
0x2d12   :  { %8980 = vmatpush3.msra.mxu0 %v4892_v54 }
0x2d13   :  { %8984 = vmatprep.subr.mxu0 %v5011_v62 }
0x2d14   :  { %v4989_v2 = vpop.permute.xlu0 %4988 }
0x2d15   :  { %v5004_v5 = vsel %vm462_vm8, %v5002_v3, %v4989_v2 }
0x2d16   :  { %v9401_v55 = vpop.eup %9400 }
0x2d17   :  { %v4890_v60 = vmul.f32 %v9401_v55, %v9397_v42  ;;  %v8145_v55 = vld [vmem:[%s10797_s5 + $0x1c] ss:$0 sm:$0xff] }
0x2d1a   :  { %v9403_v33 = vpop.eup %9402 }
0x2d1b   :  { %v4888_v32 = vmul.f32 %v9403_v33, %v9399_v47 }
0x2d1d   :  { %8981 = vmatprep.mubr.msk.f32.mxu0 %vm462_vm8, %v4888_v32 }
0x2d1e   :  { %8982 = vmatmul.mubr.msk.f32.vlgmr.msra.gmra.mxu0 %vm462_vm8, %v4890_v60 }
0x2d1f   :  { %8985 = vmatpush3.msra.mxu0 %v5011_v62 }
0x2d20   :  { %8986 = vmatprep.subr.mxu0 %v5010_v59 }
0x2d21   :  { %8987 = vmatpush3.msra.mxu0 %v5010_v59 }
0x2d22   :  { %8988 = vmatprep.subr.mxu0 %v5009_v45 }
0x2d23   :  { %8989 = vmatpush3.msra.mxu0 %v5009_v45 }
0x2d24   :  { %8990 = vmatprep.subr.mxu0 %v5008_v43 }
0x2d25   :  { %8991 = vmatpush3.msra.mxu0 %v5008_v43  ;;  %v5247_v43 = vld [vmem:[#allocation6 + $0x218] sm:$0xff] }
0x2d26   :  { %9006 = vmatprep.subr.mxu0 %v5251_v26 }
0x2dde   :  { %v8983_v61 = vpop.f32.mrf.mxu0 }
0x2ddf   :  { %4998 = vrot.lane.b32.xlu1 %v8983_v61, %s9574_s8  ;;  %v5246_v61 = vld [vmem:[#allocation6 + $0x210] sm:$0xff] }
0x2de0   :  { %v4969_v58 = vpop.f32.mrf.mxu0 }
0x2de1   :  { %4996 = vrot.lane.b32.xlu0 %v4969_v58, %s9574_s8  ;;  %v5245_v58 = vld [vmem:[#allocation6 + $0x208] sm:$0xff] }
0x2e51   :  { %v4999_v39 = vpop.permute.xlu1 %4998 }
0x2e52   :  { %v5007_v49 = vsel %vm1200_vm9, %v5005_v7, %v4999_v39 }
0x2e53   :  { %v4997_v6 = vpop.permute.xlu0 %4996 }
0x2e54   :  { %v5006_v24 = vsel %vm1200_vm9, %v5004_v5, %v4997_v6  ;;  %v8151_v6 = vld [vmem:[%s10797_s5 + $0x18] ss:$0 sm:$0xff] }
0x2e55   :  { %8992 = vmatprep.mubr.msk.f32.mxu0 %vm290_vm2, %v5006_v24 }
0x2e56   :  { %8993 = vmatmul.mubr.msk.f32.vlgmr.msra.gmra.mxu0 %vm290_vm2, %v5007_v49 }
0x2e57   :  { %9007 = vmatpush3.msra.mxu0 %v5251_v26 }
0x2e58   :  { %9008 = vmatprep.subr.mxu0 %v5250_v23 }
0x2e59   :  { %9009 = vmatpush3.msra.mxu0 %v5250_v23 }
0x2e5a   :  { %9010 = vmatprep.subr.mxu0 %v5249_v16 }
0x2e5b   :  { %9011 = vmatpush3.msra.mxu0 %v5249_v16 }
0x2e5c   :  { %9012 = vmatprep.subr.mxu0 %v5248_v28 }
0x2e5d   :  { %9013 = vmatpush3.msra.mxu0 %v5248_v28  ;;  %v8156_v28 = vld [vmem:[%s10797_s5 + $0x1d] ss:$0 sm:$0xff] }
0x2e5e   :  { %9014 = vmatprep.subr.mxu0 %v5247_v43 }
0x2e5f   :  { %9015 = vmatpush3.msra.mxu0 %v5247_v43 }
0x2e60   :  { %9016 = vmatprep.subr.mxu0 %v5246_v61 }
0x2e61   :  { %9017 = vmatpush3.msra.mxu0 %v5246_v61 }
0x2e62   :  { %9018 = vmatprep.subr.mxu0 %v5245_v58 }
0x2e63   :  { %9019 = vmatpush3.msra.mxu0 %v5245_v58 }
0x2e64   :  { %9020 = vmatprep.subr.mxu0 %v5244_v0 }
0x2e65   :  { %9021 = vmatpush3.msra.mxu0 %v5244_v0 }
0x2f16   :  { %v8994_v8 = vpop.f32.mrf.mxu0 }
0x2f17   :  { %v5098_v9 = vadd.f32 %v8994_v8, %v8139_v57 }
0x2f18   :  { %v5092_v56 = vpop.f32.mrf.mxu0 }
0x2f19   :  { %v5102_v51 = vadd.f32 %v5098_v9, %v10247_v19  ;;  %v5093_v10 = vadd.f32 %v8139_v57, %v5092_v56 }
0x2f1b   :  { %v5101_v13 = vadd.f32 %v5093_v10, %v10239_v40  ;;  %v5110_v50 = vsel %vm290_vm2, %v5102_v51, 0.0  ;;  %v5152_v40 = vld [vmem:[#allocation6 + $0x1f8] sm:$0xff] }
0x2f1c   :  { %5111 = vadd.xlane.f32.xlu1 %v5110_v50  ;;  %8995 = vmatprep.subr.mxu1 %v5152_v40 }
0x2f1d   :  { %v5107_v12 = vsel %vm290_vm2, %v5101_v13, 0.0  ;;  %8996 = vmatpush3.msra.mxu1 %v5152_v40 }
0x2f1e   :  { %5108 = vadd.xlane.f32.xlu0 %v5107_v12  ;;  %8997 = vmatprep.subr.mxu1 %v5151_v38 }
0x2f1f   :  { %8998 = vmatpush3.msra.mxu1 %v5151_v38 }
0x2f20   :  { %8999 = vmatprep.subr.mxu1 %v5150_v36 }
0x2f21   :  { %9000 = vmatpush3.msra.mxu1 %v5150_v36 }
0x2f22   :  { %9001 = vmatprep.subr.mxu1 %v5149_v37 }
0x2f23   :  { %9002 = vmatpush3.msra.mxu1 %v5149_v37 }
0x2fa5   :  { %v5112_v14 = vpop.xlane.xlu1 %5111 }
0x2fa6   :  { %v5114_v48 = vmul.f32 0.03125, %v5112_v14 }
0x2fa7   :  { %v5109_v15 = vpop.xlane.xlu0 %5108 }
0x2fa8   :  { %v5113_v18 = vmul.f32 0.03125, %v5109_v15  ;;  %v5116_v11 = vsub.f32 %v5102_v51, %v5114_v48 }
0x2faa   :  { %v5115_v20 = vsub.f32 %v5101_v13, %v5113_v18  ;;  %v5118_v31 = vmul.f32 %v5116_v11, %v5116_v11 }
0x2fac   :  { %v5117_v21 = vmul.f32 %v5115_v20, %v5115_v20  ;;  %v5122_v19 = vsel %vm290_vm2, %v5118_v31, 0.0  ;;  %v5390_v31 = vld [vmem:[#allocation6 + $0x248] sm:$0xff] }
0x2fae   :  { %v5119_v17 = vsel %vm290_vm2, %v5117_v21, 0.0  ;;  %v5392_v21 = vld [vmem:[#allocation6 + $0x258] sm:$0xff] }
0x2faf   :  { %5120 = vadd.xlane.f32.xlu0 %v5119_v17  ;;  %v5391_v17 = vld [vmem:[#allocation6 + $0x250] sm:$0xff]  ;;  %9025 = vmatprep.subr.mxu1 %v5392_v21 }
0x2fb3   :  { %5123 = vadd.xlane.f32.xlu0 %v5122_v19  ;;  %v5389_v19 = vld [vmem:[#allocation6 + $0x240] sm:$0xff] }
0x3038   :  { %v5121_v44 = vpop.xlane.xlu0 %5120 }
0x3039   :  { %v5125_v63 = vmul.f32 0.03125, %v5121_v44 }
0x303b   :  { %v5127_v42 = vadd.f32 1e-05, %v5125_v63 }
0x303c   :  { %v5124_v46 = vpop.xlane.xlu0 %5123 }
0x303d   :  { %9404 = vrsqrt.f32 %v5127_v42  ;;  %v5126_v47 = vmul.f32 0.03125, %v5124_v46 }
0x303f   :  { %v5128_v4 = vadd.f32 1e-05, %v5126_v47  ;;  %v8157_v47 = vld [vmem:[%s10797_s5 + $0x1e] ss:$0 sm:$0xff] }
0x3041   :  { %9406 = vrsqrt.f32 %v5128_v4 }
0x304a   :  { %v9405_v52 = vpop.eup %9404 }
0x304b   :  { %v5131_v54 = vmul.f32 %v9405_v52, %v5115_v20 }
0x304d   :  { %v5139_v33 = vmul.f32 %v8144_v53, %v5131_v54  ;;  %v8159_v54 = vld [vmem:[%s10797_s5 + $0x1f] ss:$0 sm:$0xff] }
0x304e   :  { %v9407_v32 = vpop.eup %9406 }
0x304f   :  { %v5132_v60 = vmul.f32 %v9407_v32, %v5116_v11  ;;  %v5147_v62 = vadd.f32 %v8145_v55, %v5139_v33 }
0x3051   :  { %v5140_v59 = vmul.f32 %v8144_v53, %v5132_v60  ;;  %9003 = vmatprep.mubr.msk.f32.mxu1 %vm290_vm2, %v5147_v62 }
0x3053   :  { %v5148_v45 = vadd.f32 %v8145_v55, %v5140_v59 }
0x3055   :  { %9004 = vmatmul.mubr.msk.f32.vlgmr.msra.gmra.mxu1 %vm290_vm2, %v5148_v45 }
0x3056   :  { %9026 = vmatpush3.msra.mxu1 %v5392_v21 }
0x3057   :  { %9027 = vmatprep.subr.mxu1 %v5391_v17 }
0x3058   :  { %9028 = vmatpush3.msra.mxu1 %v5391_v17 }
0x3059   :  { %9029 = vmatprep.subr.mxu1 %v5390_v31 }
0x305a   :  { %9030 = vmatpush3.msra.mxu1 %v5390_v31 }
0x305b   :  { %9031 = vmatprep.subr.mxu1 %v5389_v19 }
0x305c   :  { %9032 = vmatpush3.msra.mxu1 %v5389_v19 }
0x3115   :  { %v9005_v1 = vpop.f32.mrf.mxu1 }
0x3116   :  { %v5239_v2 = vadd.f32 %v9005_v1, %v8147_v22 }
0x3117   :  { %v5233_v3 = vpop.f32.mrf.mxu1 }
0x3118   :  { %v5234_v39 = vadd.f32 %v8147_v22, %v5233_v3  ;;  %v5243_v5 = vmax.f32 %v5239_v2, 0.0 }
0x311a   :  { %v5242_v25 = vmax.f32 %v5234_v39, 0.0 }
0x311c   :  { %9022 = vmatprep.mubr.msk.f32.mxu0 %vm1456_vm10, %v5242_v25 }
0x311d   :  { %9023 = vmatmul.mubr.msk.f32.vlgmr.msra.gmra.mxu0 %vm1456_vm10, %v5243_v5 }
0x31dd   :  { %v9024_v7 = vpop.f32.mrf.mxu0 }
0x31de   :  { %v5338_v24 = vadd.f32 %v9024_v7, %v8151_v6 }
0x31df   :  { %v5332_v49 = vpop.f32.mrf.mxu0 }
0x31e0   :  { %v5342_v57 = vadd.f32 %v5338_v24, %v5148_v45  ;;  %v5333_v8 = vadd.f32 %v8151_v6, %v5332_v49 }
0x31e2   :  { %v5341_v9 = vadd.f32 %v5333_v8, %v5147_v62  ;;  %v5350_v56 = vsel %vm290_vm2, %v5342_v57, 0.0 }
0x31e3   :  { %5351 = vadd.xlane.f32.xlu0 %v5350_v56 }
0x31e4   :  { %v5347_v51 = vsel %vm290_vm2, %v5341_v9, 0.0 }
0x31e5   :  { %5348 = vadd.xlane.f32.xlu1 %v5347_v51 }
0x326c   :  { %v5352_v10 = vpop.xlane.xlu0 %5351 }
0x326d   :  { %v5354_v13 = vmul.f32 0.03125, %v5352_v10 }
0x326e   :  { %v5349_v50 = vpop.xlane.xlu1 %5348 }
0x326f   :  { %v5356_v12 = vsub.f32 %v5342_v57, %v5354_v13  ;;  %v5353_v14 = vmul.f32 0.03125, %v5349_v50 }
0x3271   :  { %v5355_v48 = vsub.f32 %v5341_v9, %v5353_v14  ;;  %v5358_v15 = vmul.f32 %v5356_v12, %v5356_v12 }
0x3273   :  { %v5362_v18 = vsel %vm290_vm2, %v5358_v15, 0.0  ;;  %v5357_v11 = vmul.f32 %v5355_v48, %v5355_v48 }
0x3274   :  { %5363 = vadd.xlane.f32.xlu0 %v5362_v18 }
0x3275   :  { %v5359_v20 = vsel %vm290_vm2, %v5357_v11, 0.0 }
0x3276   :  { %5360 = vadd.xlane.f32.xlu1 %v5359_v20 }
0x32fd   :  { %v5364_v40 = vpop.xlane.xlu0 %5363 }
0x32fe   :  { %v5366_v38 = vmul.f32 0.03125, %v5364_v40 }
0x32ff   :  { %v5361_v36 = vpop.xlane.xlu1 %5360 }
0x3300   :  { %v5368_v37 = vadd.f32 1e-05, %v5366_v38  ;;  %v5365_v26 = vmul.f32 0.03125, %v5361_v36 }
0x3302   :  { %9408 = vrsqrt.f32 %v5368_v37  ;;  %v5367_v23 = vadd.f32 1e-05, %v5365_v26 }
0x3304   :  { %9410 = vrsqrt.f32 %v5367_v23 }
0x330f   :  { %v9409_v16 = vpop.eup %9408 }
0x3310   :  { %v5372_v44 = vmul.f32 %v9409_v16, %v5356_v12 }
0x3311   :  { %v9411_v63 = vpop.eup %9410 }
0x3312   :  { %v5371_v42 = vmul.f32 %v9411_v63, %v5355_v48  ;;  %v5380_v46 = vmul.f32 %v8156_v28, %v5372_v44 }
0x3314   :  { %v5379_v4 = vmul.f32 %v8156_v28, %v5371_v42  ;;  %v10430_v53 = vadd.f32 %v8157_v47, %v5380_v46 }
0x3316   :  { %v10428_v52 = vadd.f32 %v8157_v47, %v5379_v4 }
0x3318   :  { %9033 = vmatprep.mubr.msk.f32.mxu1 %vm290_vm2, %v10428_v52 }
0x3319   :  { %9034 = vmatmul.mubr.msk.f32.vlgmr.msra.gmra.mxu1 %vm290_vm2, %v10430_v53 }
0x33d9   :  { %v9035_v55 = vpop.f32.mrf.mxu1 }
0x33da   :  { %v10439_v33 = vadd.f32 %v9035_v55, %v8159_v54 }
0x33db   :  { %v5473_v32 = vpop.f32.mrf.mxu1 }
0x33dc   :  { %v10441_v60 = vadd.f32 %v8159_v54, %v5473_v32  ;;  %5486 = vrot.lane.b32.xlu1 %v10439_v33, %s9561_s20 }
0x33de   :  { %5484 = vrot.lane.b32.xlu0 %v10441_v60, %s9561_s20  ;;  %9040 = vmatprep.mubr.msk.f32.mxu1 %vm378_vm3, %v10441_v60 }
0x33e0   :  { %5686 = vrot.lane.b32.xlu1 %v10439_v33, %s9565_s22 }
0x33e2   :  { %5680 = vrot.lane.b32.xlu0 %v10441_v60, %s9564_s21 }
0x33e4   :  { %5684 = vrot.lane.b32.xlu1 %v10441_v60, %s9565_s22 }
0x33e8   :  { %5682 = vrot.lane.b32.xlu1 %v10439_v33, %s9564_s21 }
0x344e   :  { %v5487_v62 = vpop.permute.xlu1 %5486 }
0x344f   :  { %9036 = vmatprep.subr.msk.mxu1 %vm378_vm3, %v5487_v62 }
0x3450   :  { %9037 = vmatpush3.xpose.msk.msra.mxu1 %vm378_vm3, %v5487_v62  ;;  %v5485_v59 = vpop.permute.xlu0 %5484 }
0x3451   :  { %9038 = vmatprep.subr.msk.mxu1 %vm378_vm3, %v5485_v59 }
0x3452   :  { %v5687_v45 = vpop.permute.xlu1 %5686 }
0x3454   :  { %9039 = vmatpush3.xpose.msk.msra.mxu1 %vm378_vm3, %v5485_v59  ;;  %v5681_v43 = vpop.permute.xlu0 %5680 }
0x3455   :  { %9050 = vmatprep.subr.msk.mxu1 %vm378_vm3, %v5687_v45 }
0x3456   :  { %v5685_v61 = vpop.permute.xlu1 %5684 }
0x3457   :  { %9041 = vmatmul.mubr.msk.f32.vlgmr.msra.gmra.mxu1 %vm378_vm3, %v10439_v33 }
0x3458   :  { %9051 = vmatpush3.xpose.msk.msra.mxu1 %vm378_vm3, %v5687_v45  ;;  %9054 = vmatprep.mubr.msk.f32.mxu1 %vm378_vm3, %v5681_v43 }
0x3459   :  { %9052 = vmatprep.subr.msk.mxu1 %vm378_vm3, %v5685_v61 }
0x345a   :  { %v5683_v58 = vpop.permute.xlu1 %5682 }
0x345c   :  { %9053 = vmatpush3.xpose.msk.msra.mxu1 %vm378_vm3, %v5685_v61 }
0x345f   :  { %9055 = vmatmul.mubr.msk.f32.vlgmr.msra.gmra.mxu1 %vm378_vm3, %v5683_v58 }
0x3517   :  { %v9042_v0 = vpop.f32.mrf.mxu1 }
0x3518   :  { %v5568_v22 = vadd.f32 %v9042_v0, %v10062_v34 }
0x3519   :  { %v5562_v1 = vpop.f32.mrf.mxu1 }
0x351a   :  { %v5563_v2 = vadd.f32 %v5562_v1, %v10065_v35  ;;  %v5574_v3 = vsel %vm462_vm8, %v5568_v22, -inf }
0x351b   :  { %5575 = vmax.xlane.f32.xlu1 %v5574_v3 }
0x351c   :  { %v5571_v39 = vsel %vm462_vm8, %v5563_v2, -inf }
0x351d   :  { %5572 = vmax.xlane.f32.xlu0 %v5571_v39 }
0x351f   :  { %v9056_v25 = vpop.f32.mrf.mxu1 }
0x3520   :  { %v5768_v7 = vadd.f32 %v9056_v25, %v10062_v34 }
0x3521   :  { %v5762_v5 = vpop.f32.mrf.mxu1 }
0x3522   :  { %v5763_v6 = vadd.f32 %v5762_v5, %v10065_v35  ;;  %v5774_v49 = vsel %vm462_vm8, %v5768_v7, -inf }
0x3524   :  { %v5771_v24 = vsel %vm462_vm8, %v5763_v6, -inf }
0x3525   :  { %5772 = vmax.xlane.f32.xlu0 %v5771_v24 }
0x3529   :  { %5775 = vmax.xlane.f32.xlu0 %v5774_v49 }
0x352c   :  { %5595 = vrot.lane.b32.xlu1 %v10439_v33, %s9563_s1 }
0x3530   :  { %5795 = vrot.lane.b32.xlu1 %v10439_v33, %s9566_s23 }
0x3534   :  { %5793 = vrot.lane.b32.xlu1 %v10441_v60, %s9566_s23 }
0x353f   :  { %5593 = vrot.lane.b32.xlu0 %v10441_v60, %s9563_s1 }
0x35a4   :  { %v5576_v57 = vpop.xlane.xlu1 %5575 }
0x35a5   :  { %v5578_v8 = vsub.f32 %v5568_v22, %v5576_v57 }
0x35a6   :  { %v5573_v9 = vpop.xlane.xlu0 %5572 }
0x35a7   :  { %v5581_v56 = vmul.f32 1.442695, %v5578_v8  ;;  %v5577_v51 = vsub.f32 %v5563_v2, %v5573_v9 }
0x35a8   :  { %v5596_v10 = vpop.permute.xlu1 %5595 }
0x35a9   :  { %9412 = vpow2.f32 %v5581_v56  ;;  %v5579_v13 = vmul.f32 1.442695, %v5577_v51  ;;  %9043 = vmatprep.subr.mxu0 %v5596_v10 }
0x35aa   :  { %9044 = vmatpush3.msra.mxu0 %v5596_v10 }
0x35ab   :  { %9414 = vpow2.f32 %v5579_v13 }
0x35ac   :  { %v5796_v21 = vpop.permute.xlu1 %5795 }
0x35ae   :  { %v5773_v50 = vpop.xlane.xlu0 %5772 }
0x35af   :  { %v5777_v40 = vsub.f32 %v5763_v6, %v5773_v50 }
0x35b0   :  { %v5794_v26 = vpop.permute.xlu1 %5793 }
0x35b1   :  { %v5779_v38 = vmul.f32 1.442695, %v5777_v40 }
0x35b2   :  { %v5776_v12 = vpop.xlane.xlu0 %5775 }
0x35b3   :  { %v5778_v14 = vsub.f32 %v5768_v7, %v5776_v12 }
0x35b5   :  { %v5781_v48 = vmul.f32 1.442695, %v5778_v14 }
0x35b6   :  { %v9413_v15 = vpop.eup %9412  ;;  %v5594_v18 = vpop.permute.xlu0 %5593 }
0x35b7   :  { %9416 = vpow2.f32 %v5781_v48  ;;  %9045 = vmatprep.subr.mxu0 %v5594_v18  ;;  %v5586_v11 = vsel %vm462_vm8, %v9413_v15, 0.0 }
0x35b8   :  { %v9415_v20 = vpop.eup %9414  ;;  %5587 = vadd.xlane.f32.xlu0 %v5586_v11  ;;  %9046 = vmatpush3.msra.mxu0 %v5594_v18  ;;  %9418 = vpow2.f32 %v5779_v38 }
0x35b9   :  { %9057 = vmatprep.subr.mxu0 %v5796_v21  ;;  %v5583_v17 = vsel %vm462_vm8, %v9415_v20, 0.0 }
0x35ba   :  { %5584 = vadd.xlane.f32.xlu1 %v5583_v17 }
0x35c4   :  { %v9417_v31 = vpop.eup %9416 }
0x35c5   :  { %v5786_v19 = vsel %vm462_vm8, %v9417_v31, 0.0  ;;  %v9419_v36 = vpop.eup %9418 }
0x35c6   :  { %5787 = vadd.xlane.f32.xlu0 %v5786_v19  ;;  %v5783_v37 = vsel %vm462_vm8, %v9419_v36, 0.0 }
0x35cb   :  { %5884 = vrot.lane.b32.xlu1 %v10441_v60, %s9567_s24 }
0x35dc   :  { %5886 = vrot.lane.b32.xlu0 %v10439_v33, %s9567_s24 }
0x35e0   :  { %5880 = vrot.lane.b32.xlu0 %v10441_v60, %s9568_s25 }
0x35ef   :  { %5784 = vadd.xlane.f32.xlu1 %v5783_v37 }
0x3600   :  { %5882 = vrot.lane.b32.xlu1 %v10439_v33, %s9568_s25 }
0x3641   :  { %v5588_v23 = vpop.xlane.xlu0 %5587 }
0x3642   :  { %9420 = vrcp.f32 %v5588_v23 }
0x3643   :  { %v5585_v16 = vpop.xlane.xlu1 %5584 }
0x3644   :  { %9422 = vrcp.f32 %v5585_v16 }
0x3647   :  { %v5885_v4 = vpop.permute.xlu1 %5884 }
0x364f   :  { %v9421_v28 = vpop.eup %9420  ;;  %v5788_v63 = vpop.xlane.xlu0 %5787 }
0x3650   :  { %v5592_v46 = vmul.f32 %v9421_v28, %v9413_v15  ;;  %9424 = vrcp.f32 %v5788_v63 }
0x3651   :  { %v9423_v44 = vpop.eup %9422 }
0x3652   :  { %v5590_v42 = vmul.f32 %v9423_v44, %v9415_v20 }
0x3653   :  { %v5887_v47 = vpop.permute.xlu0 %5886 }
0x3654   :  { %9047 = vmatprep.mubr.msk.f32.mxu0 %vm462_vm8, %v5590_v42 }
0x3655   :  { %9048 = vmatmul.mubr.msk.f32.vlgmr.msra.gmra.mxu0 %vm462_vm8, %v5592_v46 }
0x3656   :  { %9058 = vmatpush3.msra.mxu0 %v5796_v21 }
0x3657   :  { %9059 = vmatprep.subr.mxu0 %v5794_v26  ;;  %v5881_v45 = vpop.permute.xlu0 %5880 }
0x3658   :  { %9060 = vmatpush3.msra.mxu0 %v5794_v26 }
0x3659   :  { %9064 = vmatprep.subr.msk.mxu0 %vm378_vm3, %v5887_v47 }
0x365d   :  { %v9425_v55 = vpop.eup %9424 }
0x365e   :  { %v5792_v59 = vmul.f32 %v9425_v55, %v9417_v31 }
0x3678   :  { %v5785_v54 = vpop.xlane.xlu1 %5784 }
0x3679   :  { %9426 = vrcp.f32 %v5785_v54 }
0x367c   :  { %v5883_v43 = vpop.permute.xlu1 %5882 }
0x3686   :  { %v9427_v32 = vpop.eup %9426 }
0x3687   :  { %v5790_v62 = vmul.f32 %v9427_v32, %v9419_v36 }
0x3689   :  { %9061 = vmatprep.mubr.msk.f32.mxu0 %vm462_vm8, %v5790_v62 }
0x368a   :  { %9062 = vmatmul.mubr.msk.f32.vlgmr.msra.gmra.mxu0 %vm462_vm8, %v5792_v59 }
0x368b   :  { %9065 = vmatpush3.xpose.msk.msra.mxu0 %vm378_vm3, %v5887_v47  ;;  %9068 = vmatprep.mubr.msk.f32.mxu0 %vm378_vm3, %v5881_v45 }
0x368c   :  { %9066 = vmatprep.subr.msk.mxu0 %vm378_vm3, %v5885_v4 }
0x368f   :  { %9067 = vmatpush3.xpose.msk.msra.mxu0 %vm378_vm3, %v5885_v4 }
0x3692   :  { %9069 = vmatmul.mubr.msk.f32.vlgmr.msra.gmra.mxu0 %vm378_vm3, %v5883_v43 }
0x3715   :  { %v10507_v61 = vpop.f32.mrf.mxu0 }
0x3717   :  { %v10509_v58 = vpop.f32.mrf.mxu0 }
0x374a   :  { %v10511_v0 = vpop.f32.mrf.mxu0 }
0x374c   :  { %v10513_v22 = vpop.f32.mrf.mxu0 }
0x3752   :  { %v9070_v1 = vpop.f32.mrf.mxu0 }
0x3753   :  { %v5968_v2 = vadd.f32 %v9070_v1, %v10062_v34  ;;  %v6312_v1 = vld [vmem:[#allocation6 + $0x270] sm:$0xff] }
0x3754   :  { %v5962_v3 = vpop.f32.mrf.mxu0 }
0x3755   :  { %v5963_v39 = vadd.f32 %v5962_v3, %v10065_v35  ;;  %v5974_v25 = vsel %vm462_vm8, %v5968_v2, -inf  ;;  %v6547_v3 = vld [vmem:[#allocation6 + $0x2b8] sm:$0xff] }
0x3756   :  { %5975 = vmax.xlane.f32.xlu1 %v5974_v25 }
0x3757   :  { %v5971_v5 = vsel %vm462_vm8, %v5963_v39, -inf }
0x3758   :  { %5972 = vmax.xlane.f32.xlu0 %v5971_v5 }
0x3767   :  { %5995 = vrot.lane.b32.xlu1 %v10439_v33, %s9569_s26 }
0x376b   :  { %6086 = vrot.lane.b32.xlu1 %v10439_v33, %s9570_s28 }
0x376f   :  { %6084 = vrot.lane.b32.xlu1 %v10441_v60, %s9570_s28 }
0x3773   :  { %6082 = vrot.lane.b32.xlu1 %v10439_v33, %s9571_s29 }
0x37df   :  { %v5976_v6 = vpop.xlane.xlu1 %5975 }
0x37e0   :  { %v5978_v7 = vsub.f32 %v5968_v2, %v5976_v6  ;;  %v6310_v2 = vld [vmem:[#allocation6 + $0x260] sm:$0xff] }
0x37e1   :  { %v5973_v24 = vpop.xlane.xlu0 %5972 }
0x37e2   :  { %v5981_v49 = vmul.f32 1.442695, %v5978_v7  ;;  %v5977_v57 = vsub.f32 %v5963_v39, %v5973_v24 }
0x37e3   :  { %v5996_v8 = vpop.permute.xlu1 %5995 }
0x37e4   :  { %9428 = vpow2.f32 %v5981_v49  ;;  %v5979_v9 = vmul.f32 1.442695, %v5977_v57  ;;  %9071 = vmatprep.subr.mxu1 %v5996_v8 }
0x37e5   :  { %9072 = vmatpush3.msra.mxu1 %v5996_v8 }
0x37e6   :  { %9430 = vpow2.f32 %v5979_v9 }
0x37e7   :  { %v6087_v48 = vpop.permute.xlu1 %6086 }
0x37eb   :  { %v6085_v17 = vpop.permute.xlu1 %6084 }
0x37ef   :  { %v6083_v31 = vpop.permute.xlu1 %6082 }
0x37f1   :  { %v9429_v56 = vpop.eup %9428 }
0x37f2   :  { %v5986_v51 = vsel %vm462_vm8, %v9429_v56, 0.0 }
0x37f3   :  { %v9431_v10 = vpop.eup %9430  ;;  %5987 = vadd.xlane.f32.xlu0 %v5986_v51 }
0x37f4   :  { %v5983_v13 = vsel %vm462_vm8, %v9431_v10, 0.0 }
0x37f7   :  { %5984 = vadd.xlane.f32.xlu0 %v5983_v13 }
0x380d   :  { %5993 = vrot.lane.b32.xlu0 %v10441_v60, %s9569_s26 }
0x3811   :  { %6080 = vrot.lane.b32.xlu0 %v10441_v60, %s9571_s29 }
0x387c   :  { %v5988_v50 = vpop.xlane.xlu0 %5987 }
0x387d   :  { %9432 = vrcp.f32 %v5988_v50  ;;  %v6546_v50 = vld [vmem:[#allocation6 + $0x2b0] sm:$0xff] }
0x3880   :  { %v5985_v12 = vpop.xlane.xlu0 %5984 }
0x3881   :  { %9434 = vrcp.f32 %v5985_v12  ;;  %v6454_v12 = vld [vmem:[#allocation6 + $0x298] sm:$0xff] }
0x3884   :  { %v5994_v14 = vpop.permute.xlu0 %5993 }
0x3885   :  { %9073 = vmatprep.subr.mxu1 %v5994_v14 }
0x3886   :  { %9074 = vmatpush3.msra.mxu1 %v5994_v14  ;;  %v6453_v14 = vld [vmem:[#allocation6 + $0x290] sm:$0xff] }
0x3887   :  { %9078 = vmatprep.subr.msk.mxu1 %vm378_vm3, %v6087_v48 }
0x3888   :  { %v6081_v21 = vpop.permute.xlu0 %6080 }
0x388a   :  { %v9433_v15 = vpop.eup %9432 }
0x388b   :  { %v5992_v20 = vmul.f32 %v9433_v15, %v9429_v56  ;;  %v8187_v15 = vld [vmem:[%s10797_s5 + $0x20] ss:$0 sm:$0xff] }
0x388e   :  { %v9435_v18 = vpop.eup %9434 }
0x388f   :  { %v5990_v11 = vmul.f32 %v9435_v18, %v9431_v10 }
0x3891   :  { %9075 = vmatprep.mubr.msk.f32.mxu1 %vm462_vm8, %v5990_v11 }
0x3892   :  { %9076 = vmatmul.mubr.msk.f32.vlgmr.msra.gmra.mxu1 %vm462_vm8, %v5992_v20 }
0x3893   :  { %9079 = vmatpush3.xpose.msk.msra.mxu1 %vm378_vm3, %v6087_v48  ;;  %9082 = vmatprep.mubr.msk.f32.mxu1 %vm378_vm3, %v6081_v21  ;;  %v6452_v48 = vld [vmem:[#allocation6 + $0x288] sm:$0xff] }
0x3894   :  { %9080 = vmatprep.subr.msk.mxu1 %vm378_vm3, %v6085_v17 }
0x3897   :  { %9081 = vmatpush3.xpose.msk.msra.mxu1 %vm378_vm3, %v6085_v17 }
0x3898   :  { %9103 = vmatprep.subr.mxu1 %v6454_v12 }
0x389a   :  { %9083 = vmatmul.mubr.msk.f32.vlgmr.msra.gmra.mxu1 %vm378_vm3, %v6083_v31 }
0x389b   :  { %9104 = vmatpush3.msra.mxu1 %v6454_v12 }
0x389c   :  { %9105 = vmatprep.subr.mxu1 %v6453_v14 }
0x389d   :  { %9106 = vmatpush3.msra.mxu1 %v6453_v14 }
0x389e   :  { %9107 = vmatprep.subr.mxu1 %v6452_v48 }
0x389f   :  { %9108 = vmatpush3.msra.mxu1 %v6452_v48 }
0x3952   :  { %v9077_v19 = vpop.f32.mrf.mxu1 }
0x3954   :  { %v6071_v40 = vpop.f32.mrf.mxu1 }
0x395a   :  { %v9084_v38 = vpop.f32.mrf.mxu1 }
0x395b   :  { %v6168_v36 = vadd.f32 %v9084_v38, %v10062_v34 }
0x395c   :  { %v6162_v37 = vpop.f32.mrf.mxu1 }
0x395d   :  { %v6163_v26 = vadd.f32 %v6162_v37, %v10065_v35  ;;  %v6174_v23 = vsel %vm462_vm8, %v6168_v36, -inf }
0x395e   :  { %6175 = vmax.xlane.f32.xlu1 %v6174_v23 }
0x395f   :  { %v6171_v16 = vsel %vm462_vm8, %v6163_v26, -inf }
0x3960   :  { %6172 = vmax.xlane.f32.xlu0 %v6171_v16 }
0x396f   :  { %6195 = vrot.lane.b32.xlu1 %v10439_v33, %s9572_s30 }
0x3973   :  { %6282 = vrot.lane.b32.xlu1 %v10513_v22, %s9559_s27  ;;  %v6313_v22 = vld [vmem:[#allocation6 + $0x278] sm:$0xff] }
0x3977   :  { %6284 = vrot.lane.b32.xlu1 %v10511_v0, %s9559_s27 }
0x397b   :  { %6292 = vrot.lane.b32.xlu1 %v9077_v19, %s9573_s7  ;;  %v8199_v19 = vld [vmem:[%s10797_s5 + $0x22] ss:$0 sm:$0xff] }
0x39e7   :  { %v6176_v34 = vpop.xlane.xlu1 %6175 }
0x39e8   :  { %v6178_v28 = vsub.f32 %v6168_v36, %v6176_v34 }
0x39e9   :  { %v6173_v35 = vpop.xlane.xlu0 %6172 }
0x39ea   :  { %v6181_v44 = vmul.f32 1.442695, %v6178_v28  ;;  %v6177_v63 = vsub.f32 %v6163_v26, %v6173_v35 }
0x39eb   :  { %v6196_v42 = vpop.permute.xlu1 %6195 }
0x39ec   :  { %9436 = vpow2.f32 %v6181_v44  ;;  %v6179_v46 = vmul.f32 1.442695, %v6177_v63  ;;  %9085 = vmatprep.subr.mxu0 %v6196_v42 }
0x39ed   :  { %9086 = vmatpush3.msra.mxu0 %v6196_v42 }
0x39ee   :  { %9438 = vpow2.f32 %v6179_v46 }
0x39ef   :  { %v6283_v5 = vpop.permute.xlu1 %6282 }
0x39f0   :  { %v6304_v49 = vsel %vm378_vm3, %v10509_v58, %v6283_v5  ;;  %v6545_v58 = vld [vmem:[#allocation6 + $0x2a8] sm:$0xff] }
0x39f3   :  { %v6285_v6 = vpop.permute.xlu1 %6284 }
0x39f4   :  { %v6305_v8 = vsel %vm378_vm3, %v10507_v61, %v6285_v6  ;;  %v6544_v61 = vld [vmem:[#allocation6 + $0x2a0] sm:$0xff] }
0x39f7   :  { %v6293_v7 = vpop.permute.xlu1 %6292 }
0x39f8   :  { %v6307_v51 = vsel %vm462_vm8, %v6305_v8, %v6293_v7 }
0x39f9   :  { %v9437_v33 = vpop.eup %9436 }
0x39fa   :  { %v6186_v47 = vsel %vm462_vm8, %v9437_v33, 0.0 }
0x39fb   :  { %v9439_v4 = vpop.eup %9438  ;;  %6187 = vadd.xlane.f32.xlu0 %v6186_v47 }
0x39fc   :  { %v6183_v54 = vsel %vm462_vm8, %v9439_v4, 0.0 }
0x39ff   :  { %6184 = vadd.xlane.f32.xlu0 %v6183_v54 }
0x3a15   :  { %6193 = vrot.lane.b32.xlu0 %v10441_v60, %s9572_s30  ;;  %v6311_v60 = vld [vmem:[#allocation6 + $0x268] sm:$0xff] }
0x3a19   :  { %6290 = vrot.lane.b32.xlu0 %v6071_v40, %s9573_s7 }
0x3a84   :  { %v6188_v55 = vpop.xlane.xlu0 %6187 }
0x3a85   :  { %9440 = vrcp.f32 %v6188_v55 }
0x3a88   :  { %v6185_v32 = vpop.xlane.xlu0 %6184 }
0x3a89   :  { %9442 = vrcp.f32 %v6185_v32 }
0x3a8c   :  { %v6194_v62 = vpop.permute.xlu0 %6193 }
0x3a8d   :  { %9087 = vmatprep.subr.mxu0 %v6194_v62 }
0x3a8e   :  { %9088 = vmatpush3.msra.mxu0 %v6194_v62  ;;  %v8192_v62 = vld [vmem:[%s10797_s5 + $0x26] ss:$0 sm:$0xff] }
0x3a8f   :  { %9092 = vmatprep.subr.mxu0 %v6313_v22 }
0x3a90   :  { %v6291_v24 = vpop.permute.xlu0 %6290 }
0x3a91   :  { %v6306_v9 = vsel %vm462_vm8, %v6304_v49, %v6291_v24 }
0x3a92   :  { %v9441_v59 = vpop.eup %9440 }
0x3a93   :  { %v6192_v0 = vmul.f32 %v9441_v59, %v9437_v33 }
0x3a96   :  { %v9443_v45 = vpop.eup %9442 }
0x3a97   :  { %v6190_v43 = vmul.f32 %v9443_v45, %v9439_v4  ;;  %v8193_v45 = vld [vmem:[%s10797_s5 + $0x27] ss:$0 sm:$0xff] }
0x3a99   :  { %9089 = vmatprep.mubr.msk.f32.mxu0 %vm462_vm8, %v6190_v43 }
0x3a9a   :  { %9090 = vmatmul.mubr.msk.f32.vlgmr.msra.gmra.mxu0 %vm462_vm8, %v6192_v0 }
0x3a9b   :  { %9093 = vmatpush3.msra.mxu0 %v6313_v22 }
0x3a9c   :  { %9094 = vmatprep.subr.mxu0 %v6312_v1 }
0x3a9d   :  { %9095 = vmatpush3.msra.mxu0 %v6312_v1 }
0x3a9e   :  { %9096 = vmatprep.subr.mxu0 %v6311_v60 }
0x3a9f   :  { %9097 = vmatpush3.msra.mxu0 %v6311_v60 }
0x3aa0   :  { %9098 = vmatprep.subr.mxu0 %v6310_v2 }
0x3aa1   :  { %9099 = vmatpush3.msra.mxu0 %v6310_v2 }
0x3aa2   :  { %9114 = vmatprep.subr.mxu0 %v6547_v3 }
0x3b5a   :  { %v9091_v39 = vpop.f32.mrf.mxu0 }
0x3b5b   :  { %6300 = vrot.lane.b32.xlu1 %v9091_v39, %s9574_s8 }
0x3b5c   :  { %v6271_v25 = vpop.f32.mrf.mxu0 }
0x3b5d   :  { %6298 = vrot.lane.b32.xlu0 %v6271_v25, %s9574_s8  ;;  %v8195_v25 = vld [vmem:[%s10797_s5 + $0x21] ss:$0 sm:$0xff] }
0x3bcd   :  { %v6301_v57 = vpop.permute.xlu1 %6300 }
0x3bce   :  { %v6309_v13 = vsel %vm1200_vm9, %v6307_v51, %v6301_v57 }
0x3bcf   :  { %v6299_v56 = vpop.permute.xlu0 %6298 }
0x3bd0   :  { %v6308_v10 = vsel %vm1200_vm9, %v6306_v9, %v6299_v56 }
0x3bd1   :  { %9100 = vmatprep.mubr.msk.f32.mxu0 %vm290_vm2, %v6308_v10 }
0x3bd2   :  { %9101 = vmatmul.mubr.msk.f32.vlgmr.msra.gmra.mxu0 %vm290_vm2, %v6309_v13 }
0x3bd3   :  { %9115 = vmatpush3.msra.mxu0 %v6547_v3  ;;  %9122 = vmatprep.mubr.msk.f32.mxu0 %vm290_vm2, %v10229_v27  ;;  %v6451_v27 = vld [vmem:[#allocation6 + $0x280] sm:$0xff] }
0x3bd4   :  { %9116 = vmatprep.subr.mxu0 %v6546_v50  ;;  %9109 = vmatprep.subr.mxu1 %v6451_v27 }
0x3bd5   :  { %9117 = vmatpush3.msra.mxu0 %v6546_v50  ;;  %9110 = vmatpush3.msra.mxu1 %v6451_v27 }
0x3bd6   :  { %9118 = vmatprep.subr.mxu0 %v6545_v58 }
0x3bd7   :  { %9119 = vmatpush3.msra.mxu0 %v6545_v58 }
0x3bd8   :  { %9120 = vmatprep.subr.mxu0 %v6544_v61 }
0x3bd9   :  { %9121 = vmatpush3.msra.mxu0 %v6544_v61 }
0x3bda   :  { %9123 = vmatmul.mubr.msk.f32.vlgmr.msra.gmra.mxu0 %vm290_vm2, %v10241_v41 }
0x3c92   :  { %v9102_v18 = vpop.f32.mrf.mxu0 }
0x3c93   :  { %v6400_v11 = vadd.f32 %v9102_v18, %v8187_v15 }
0x3c94   :  { %v6394_v20 = vpop.f32.mrf.mxu0 }
0x3c95   :  { %v6404_v41 = vadd.f32 %v6400_v11, %v10430_v53  ;;  %v6395_v21 = vadd.f32 %v8187_v15, %v6394_v20 }
0x3c97   :  { %v6403_v17 = vadd.f32 %v6395_v21, %v10428_v52  ;;  %v6412_v31 = vsel %vm290_vm2, %v6404_v41, 0.0 }
0x3c98   :  { %6413 = vadd.xlane.f32.xlu1 %v6412_v31 }
0x3c99   :  { %v6409_v40 = vsel %vm290_vm2, %v6403_v17, 0.0 }
0x3c9a   :  { %v9124_v38 = vpop.f32.mrf.mxu0  ;;  %6410 = vadd.xlane.f32.xlu0 %v6409_v40 }
0x3c9b   :  { %v10585_v36 = vadd.f32 %v9124_v38, %v8199_v19 }
0x3c9c   :  { %v6622_v63 = vpop.f32.mrf.mxu0 }
0x3c9d   :  { %9125 = vmatprep.subr.msk.mxu1 %vm378_vm3, %v10585_v36  ;;  %v10593_v42 = vadd.f32 %v8199_v19, %v6622_v63 }
0x3ca9   :  { %6833 = vrot.lane.b32.xlu1 %v10585_v36, %s9564_s21 }
0x3d21   :  { %v6414_v52 = vpop.xlane.xlu1 %6413 }
0x3d22   :  { %v6416_v53 = vmul.f32 0.03125, %v6414_v52 }
0x3d23   :  { %v6411_v37 = vpop.xlane.xlu0 %6410 }
0x3d24   :  { %v6415_v26 = vmul.f32 0.03125, %v6411_v37  ;;  %v6418_v23 = vsub.f32 %v6404_v41, %v6416_v53 }
0x3d25   :  { %v6834_v3 = vpop.permute.xlu1 %6833 }
0x3d26   :  { %v6417_v16 = vsub.f32 %v6403_v17, %v6415_v26  ;;  %v6420_v35 = vmul.f32 %v6418_v23, %v6418_v23 }
0x3d28   :  { %v6419_v34 = vmul.f32 %v6417_v16, %v6417_v16  ;;  %v6424_v44 = vsel %vm290_vm2, %v6420_v35, 0.0 }
0x3d2a   :  { %v6421_v28 = vsel %vm290_vm2, %v6419_v34, 0.0 }
0x3d2b   :  { %6422 = vadd.xlane.f32.xlu0 %v6421_v28 }
0x3d2f   :  { %6425 = vadd.xlane.f32.xlu0 %v6424_v44 }
0x3d45   :  { %6831 = vrot.lane.b32.xlu0 %v10593_v42, %s9564_s21 }
0x3db4   :  { %v6423_v46 = vpop.xlane.xlu0 %6422 }
0x3db5   :  { %v6427_v33 = vmul.f32 0.03125, %v6423_v46 }
0x3db7   :  { %v6429_v47 = vadd.f32 1e-05, %v6427_v33 }
0x3db8   :  { %v6426_v4 = vpop.xlane.xlu0 %6425 }
0x3db9   :  { %9444 = vrsqrt.f32 %v6429_v47  ;;  %v6428_v54 = vmul.f32 0.03125, %v6426_v4 }
0x3dbb   :  { %v6430_v55 = vadd.f32 1e-05, %v6428_v54 }
0x3dbc   :  { %v6832_v24 = vpop.permute.xlu0 %6831 }
0x3dbd   :  { %9446 = vrsqrt.f32 %v6430_v55 }
0x3dc6   :  { %v9445_v32 = vpop.eup %9444 }
0x3dc7   :  { %v6433_v59 = vmul.f32 %v9445_v32, %v6417_v16 }
0x3dc9   :  { %v6441_v43 = vmul.f32 %v8192_v62, %v6433_v59 }
0x3dca   :  { %v9447_v0 = vpop.eup %9446 }
0x3dcb   :  { %v6434_v22 = vmul.f32 %v9447_v0, %v6418_v23  ;;  %v10603_v1 = vadd.f32 %v8193_v45, %v6441_v43 }
0x3dcd   :  { %v6442_v60 = vmul.f32 %v8192_v62, %v6434_v22  ;;  %9111 = vmatprep.mubr.msk.f32.mxu1 %vm290_vm2, %v10603_v1 }
0x3dcf   :  { %v10607_v2 = vadd.f32 %v8193_v45, %v6442_v60 }
0x3dd1   :  { %9112 = vmatmul.mubr.msk.f32.vlgmr.msra.gmra.mxu1 %vm290_vm2, %v10607_v2 }
0x3dd2   :  { %9126 = vmatpush3.xpose.msk.msra.mxu1 %vm378_vm3, %v10585_v36 }
0x3dd3   :  { %9127 = vmatprep.subr.msk.mxu1 %vm378_vm3, %v10593_v42 }
0x3dd6   :  { %9128 = vmatpush3.xpose.msk.msra.mxu1 %vm378_vm3, %v10593_v42 }
0x3dd7   :  { %9139 = vmatprep.subr.msk.mxu1 %vm378_vm3, %v6834_v3 }
0x3e91   :  { %v9113_v39 = vpop.f32.mrf.mxu1 }
0x3e92   :  { %v10623_v7 = vadd.f32 %v9113_v39, %v8195_v25 }
0x3e93   :  { %v6535_v5 = vpop.f32.mrf.mxu1 }
0x3e94   :  { %v10621_v6 = vadd.f32 %v8195_v25, %v6535_v5 }
0x3e96   :  { %6827 = vrot.lane.b32.xlu1 %v10621_v6, %s9564_s21  ;;  %9129 = vmatprep.mubr.msk.f32.mxu1 %vm378_vm3, %v10621_v6 }
0x3e97   :  { %9130 = vmatmul.mubr.msk.f32.vlgmr.msra.gmra.mxu1 %vm378_vm3, %v10623_v7 }
0x3e98   :  { %9140 = vmatpush3.xpose.msk.msra.mxu1 %vm378_vm3, %v6834_v3 }
0x3e99   :  { %9141 = vmatprep.subr.msk.mxu1 %vm378_vm3, %v6832_v24 }
0x3e9a   :  { %6829 = vrot.lane.b32.xlu1 %v10623_v7, %s9564_s21 }
0x3e9c   :  { %9142 = vmatpush3.xpose.msk.msra.mxu1 %vm378_vm3, %v6832_v24 }
0x3f08   :  { %v6828_v49 = vpop.permute.xlu1 %6827 }
0x3f09   :  { %9143 = vmatprep.mubr.msk.f32.mxu1 %vm378_vm3, %v6828_v49 }
0x3f0c   :  { %v6830_v57 = vpop.permute.xlu1 %6829 }
0x3f0d   :  { %9144 = vmatmul.mubr.msk.f32.vlgmr.msra.gmra.mxu1 %vm378_vm3, %v6830_v57 }
0x3f57   :  { %v9131_v8 = vpop.f32.mrf.mxu1 }
0x3f58   :  { %v6715_v9 = vadd.f32 %v9131_v8, %v9687_v30 }
0x3f59   :  { %v6709_v56 = vpop.f32.mrf.mxu1 }
0x3f5a   :  { %v6710_v51 = vadd.f32 %v6709_v56, %v9682_v29  ;;  %v6721_v10 = vsel %vm462_vm8, %v6715_v9, -inf }
0x3f5b   :  { %6722 = vmax.xlane.f32.xlu1 %v6721_v10 }
0x3f5c   :  { %v6718_v13 = vsel %vm462_vm8, %v6710_v51, -inf }
0x3f5d   :  { %6719 = vmax.xlane.f32.xlu0 %v6718_v13 }
0x3f6c   :  { %6742 = vrot.lane.b32.xlu1 %v10585_v36, %s9561_s20 }
0x3f70   :  { %6942 = vrot.lane.b32.xlu1 %v10585_v36, %s9565_s22 }
0x3f74   :  { %6940 = vrot.lane.b32.xlu1 %v10593_v42, %s9565_s22 }
0x3fcd   :  { %v9145_v50 = vpop.f32.mrf.mxu1 }
0x3fce   :  { %v6915_v12 = vadd.f32 %v9145_v50, %v9687_v30 }
0x3fcf   :  { %v6909_v58 = vpop.f32.mrf.mxu1 }
0x3fd0   :  { %v6910_v61 = vadd.f32 %v6909_v58, %v9682_v29  ;;  %v6921_v48 = vsel %vm462_vm8, %v6915_v12, -inf }
0x3fd2   :  { %v6918_v14 = vsel %vm462_vm8, %v6910_v61, -inf }
0x3fd3   :  { %6919 = vmax.xlane.f32.xlu0 %v6918_v14 }
0x3fd7   :  { %6922 = vmax.xlane.f32.xlu0 %v6921_v48 }
0x3fe4   :  { %v6723_v27 = vpop.xlane.xlu1 %6722 }
0x3fe5   :  { %v6725_v41 = vsub.f32 %v6715_v9, %v6723_v27 }
0x3fe6   :  { %v6720_v15 = vpop.xlane.xlu0 %6719 }
0x3fe7   :  { %v6724_v18 = vsub.f32 %v6710_v51, %v6720_v15  ;;  %v6728_v21 = vmul.f32 1.442695, %v6725_v41 }
0x3fe8   :  { %v6743_v11 = vpop.permute.xlu1 %6742 }
0x3fe9   :  { %v6726_v20 = vmul.f32 1.442695, %v6724_v18  ;;  %9132 = vmatprep.subr.mxu0 %v6743_v11 }
0x3fea   :  { %9133 = vmatpush3.msra.mxu0 %v6743_v11 }
0x3feb   :  { %9448 = vpow2.f32 %v6726_v20 }
0x3fec   :  { %9450 = vpow2.f32 %v6728_v21  ;;  %v6943_v34 = vpop.permute.xlu1 %6942 }
0x3fed   :  { %6740 = vrot.lane.b32.xlu0 %v10593_v42, %s9561_s20 }
0x3ff0   :  { %v6941_v46 = vpop.permute.xlu1 %6940 }
0x3ff8   :  { %v9449_v17 = vpop.eup %9448 }
0x3ff9   :  { %v6730_v31 = vsel %vm462_vm8, %v9449_v17, 0.0  ;;  %v9451_v19 = vpop.eup %9450 }
0x3ffa   :  { %6731 = vadd.xlane.f32.xlu1 %v6730_v31  ;;  %v6733_v40 = vsel %vm462_vm8, %v9451_v19, 0.0 }
0x400b   :  { %7031 = vrot.lane.b32.xlu1 %v10593_v42, %s9568_s25 }
0x400c   :  { %6734 = vadd.xlane.f32.xlu0 %v6733_v40 }
0x405c   :  { %v6920_v38 = vpop.xlane.xlu0 %6919 }
0x405d   :  { %v6924_v52 = vsub.f32 %v6910_v61, %v6920_v38 }
0x405f   :  { %v6926_v53 = vmul.f32 1.442695, %v6924_v52 }
0x4060   :  { %v6923_v37 = vpop.xlane.xlu0 %6922 }
0x4061   :  { %9452 = vpow2.f32 %v6926_v53  ;;  %v6925_v26 = vsub.f32 %v6915_v12, %v6923_v37 }
0x4063   :  { %v6928_v23 = vmul.f32 1.442695, %v6925_v26 }
0x4064   :  { %v6741_v16 = vpop.permute.xlu0 %6740 }
0x4065   :  { %9454 = vpow2.f32 %v6928_v23  ;;  %9134 = vmatprep.subr.mxu0 %v6741_v16 }
0x4066   :  { %9135 = vmatpush3.msra.mxu0 %v6741_v16 }
0x4067   :  { %9146 = vmatprep.subr.mxu0 %v6943_v34 }
0x406e   :  { %v9453_v28 = vpop.eup %9452 }
0x406f   :  { %v6930_v35 = vsel %vm462_vm8, %v9453_v28, 0.0 }
0x4070   :  { %6931 = vadd.xlane.f32.xlu1 %v6930_v35 }
0x4072   :  { %v9455_v44 = vpop.eup %9454 }
0x4073   :  { %v6933_v63 = vsel %vm462_vm8, %v9455_v44, 0.0 }
0x4074   :  { %6934 = vadd.xlane.f32.xlu0 %v6933_v63 }
0x4081   :  { %7029 = vrot.lane.b32.xlu1 %v10623_v7, %s9568_s25 }
0x4083   :  { %v6732_v33 = vpop.xlane.xlu1 %6731 }
0x4084   :  { %9456 = vrcp.f32 %v6732_v33 }
0x4087   :  { %v7032_v62 = vpop.permute.xlu1 %7031 }
0x408a   :  { %7033 = vrot.lane.b32.xlu0 %v10585_v36, %s9568_s25 }
0x408e   :  { %7027 = vrot.lane.b32.xlu0 %v10621_v6, %s9568_s25 }
0x4091   :  { %v9457_v47 = vpop.eup %9456 }
0x4092   :  { %v6737_v4 = vmul.f32 %v9457_v47, %v9449_v17 }
0x4094   :  { %9136 = vmatprep.mubr.msk.f32.mxu0 %vm462_vm8, %v6737_v4 }
0x4095   :  { %v6735_v54 = vpop.xlane.xlu0 %6734 }
0x4096   :  { %9458 = vrcp.f32 %v6735_v54 }
0x40a3   :  { %v9459_v55 = vpop.eup %9458 }
0x40a4   :  { %v6739_v32 = vmul.f32 %v9459_v55, %v9451_v19 }
0x40a6   :  { %9137 = vmatmul.mubr.msk.f32.vlgmr.msra.gmra.mxu0 %vm462_vm8, %v6739_v32 }
0x40a7   :  { %9147 = vmatpush3.msra.mxu0 %v6943_v34 }
0x40a8   :  { %9148 = vmatprep.subr.mxu0 %v6941_v46 }
0x40a9   :  { %9149 = vmatpush3.msra.mxu0 %v6941_v46 }
0x40f9   :  { %v6932_v59 = vpop.xlane.xlu1 %6931 }
0x40fa   :  { %9460 = vrcp.f32 %v6932_v59 }
0x40fd   :  { %v6935_v45 = vpop.xlane.xlu0 %6934  ;;  %v7030_v25 = vpop.permute.xlu1 %7029 }
0x40fe   :  { %9462 = vrcp.f32 %v6935_v45 }
0x4101   :  { %v7034_v43 = vpop.permute.xlu0 %7033 }
0x4102   :  { %9153 = vmatprep.subr.msk.mxu0 %vm378_vm3, %v7034_v43 }
0x4105   :  { %v7028_v39 = vpop.permute.xlu0 %7027 }
0x4107   :  { %v9461_v0 = vpop.eup %9460 }
0x4108   :  { %v6937_v22 = vmul.f32 %v9461_v0, %v9453_v28 }
0x410a   :  { %9150 = vmatprep.mubr.msk.f32.mxu0 %vm462_vm8, %v6937_v22 }
0x410b   :  { %v9463_v60 = vpop.eup %9462 }
0x410c   :  { %v6939_v3 = vmul.f32 %v9463_v60, %v9455_v44 }
0x410e   :  { %9151 = vmatmul.mubr.msk.f32.vlgmr.msra.gmra.mxu0 %vm462_vm8, %v6939_v3  ;;  %v7460_v3 = vld [vmem:[#allocation6 + $0x2d8] sm:$0xff] }
0x410f   :  { %9154 = vmatpush3.xpose.msk.msra.mxu0 %vm378_vm3, %v7034_v43  ;;  %9157 = vmatprep.mubr.msk.f32.mxu0 %vm378_vm3, %v7028_v39  ;;  %v7459_v39 = vld [vmem:[#allocation6 + $0x2d0] sm:$0xff] }
0x4110   :  { %9155 = vmatprep.subr.msk.mxu0 %vm378_vm3, %v7032_v62 }
0x4113   :  { %9156 = vmatpush3.xpose.msk.msra.mxu0 %vm378_vm3, %v7032_v62 }
0x4116   :  { %9158 = vmatmul.mubr.msk.f32.vlgmr.msra.gmra.mxu0 %vm378_vm3, %v7030_v25  ;;  %v7457_v25 = vld [vmem:[#allocation6 + $0x2c0] sm:$0xff] }
0x4166   :  { %v10676_v5 = vpop.f32.mrf.mxu0 }
0x4168   :  { %v10678_v24 = vpop.f32.mrf.mxu0 }
0x41ce   :  { %v10680_v49 = vpop.f32.mrf.mxu0 }
0x41d0   :  { %v10682_v57 = vpop.f32.mrf.mxu0 }
0x41d6   :  { %v9159_v8 = vpop.f32.mrf.mxu0 }
0x41d7   :  { %v7115_v9 = vadd.f32 %v9159_v8, %v9687_v30 }
0x41d8   :  { %v7109_v56 = vpop.f32.mrf.mxu0 }
0x41d9   :  { %v7110_v51 = vadd.f32 %v7109_v56, %v9682_v29  ;;  %v7121_v10 = vsel %vm462_vm8, %v7115_v9, -inf }
0x41da   :  { %7122 = vmax.xlane.f32.xlu1 %v7121_v10 }
0x41db   :  { %v7118_v13 = vsel %vm462_vm8, %v7110_v51, -inf }
0x41dc   :  { %7119 = vmax.xlane.f32.xlu0 %v7118_v13 }
0x41eb   :  { %7142 = vrot.lane.b32.xlu1 %v10585_v36, %s9567_s24 }
0x41ef   :  { %7233 = vrot.lane.b32.xlu1 %v10585_v36, %s9571_s29 }
0x41f3   :  { %7231 = vrot.lane.b32.xlu1 %v10593_v42, %s9571_s29 }
0x41f7   :  { %7229 = vrot.lane.b32.xlu1 %v10623_v7, %s9571_s29 }
0x4263   :  { %v7123_v50 = vpop.xlane.xlu1 %7122 }
0x4264   :  { %v7125_v58 = vsub.f32 %v7115_v9, %v7123_v50 }
0x4265   :  { %v7120_v61 = vpop.xlane.xlu0 %7119 }
0x4266   :  { %v7128_v12 = vmul.f32 1.442695, %v7125_v58  ;;  %v7124_v14 = vsub.f32 %v7110_v51, %v7120_v61 }
0x4267   :  { %v7143_v48 = vpop.permute.xlu1 %7142 }
0x4268   :  { %9464 = vpow2.f32 %v7128_v12  ;;  %v7126_v27 = vmul.f32 1.442695, %v7124_v14  ;;  %9160 = vmatprep.subr.mxu1 %v7143_v48 }
0x4269   :  { %9161 = vmatpush3.msra.mxu1 %v7143_v48 }
0x426a   :  { %9466 = vpow2.f32 %v7126_v27 }
0x426b   :  { %v7234_v17 = vpop.permute.xlu1 %7233 }
0x4275   :  { %v9465_v15 = vpop.eup %9464 }
0x4276   :  { %v7133_v18 = vsel %vm462_vm8, %v9465_v15, 0.0 }
0x4277   :  { %v9467_v11 = vpop.eup %9466  ;;  %7134 = vadd.xlane.f32.xlu0 %v7133_v18 }
0x4278   :  { %v7130_v20 = vsel %vm462_vm8, %v9467_v11, 0.0 }
0x427b   :  { %7131 = vadd.xlane.f32.xlu0 %v7130_v20 }
0x4291   :  { %7140 = vrot.lane.b32.xlu0 %v10593_v42, %s9567_s24 }
0x4295   :  { %7227 = vrot.lane.b32.xlu0 %v10621_v6, %s9571_s29  ;;  %v7232_v6 = vpop.permute.xlu1 %7231 }
0x4299   :  { %v7230_v53 = vpop.permute.xlu1 %7229 }
0x4300   :  { %v7135_v7 = vpop.xlane.xlu0 %7134 }
0x4301   :  { %9468 = vrcp.f32 %v7135_v7 }
0x4304   :  { %v7132_v41 = vpop.xlane.xlu0 %7131 }
0x4305   :  { %9470 = vrcp.f32 %v7132_v41 }
0x4308   :  { %v7141_v21 = vpop.permute.xlu0 %7140 }
0x4309   :  { %9162 = vmatprep.subr.mxu1 %v7141_v21 }
0x430a   :  { %9163 = vmatpush3.msra.mxu1 %v7141_v21 }
0x430b   :  { %9167 = vmatprep.subr.msk.mxu1 %vm378_vm3, %v7234_v17 }
0x430c   :  { %v7228_v52 = vpop.permute.xlu0 %7227 }
0x430e   :  { %v9469_v31 = vpop.eup %9468 }
0x430f   :  { %v7139_v38 = vmul.f32 %v9469_v31, %v9465_v15 }
0x4312   :  { %v9471_v19 = vpop.eup %9470 }
0x4313   :  { %v7137_v40 = vmul.f32 %v9471_v19, %v9467_v11 }
0x4315   :  { %9164 = vmatprep.mubr.msk.f32.mxu1 %vm462_vm8, %v7137_v40 }
0x4316   :  { %9165 = vmatmul.mubr.msk.f32.vlgmr.msra.gmra.mxu1 %vm462_vm8, %v7139_v38 }
0x4317   :  { %9168 = vmatpush3.xpose.msk.msra.mxu1 %vm378_vm3, %v7234_v17  ;;  %9171 = vmatprep.mubr.msk.f32.mxu1 %vm378_vm3, %v7228_v52 }
0x4318   :  { %9169 = vmatprep.subr.msk.mxu1 %vm378_vm3, %v7232_v6 }
0x431b   :  { %9170 = vmatpush3.xpose.msk.msra.mxu1 %vm378_vm3, %v7232_v6 }
0x431e   :  { %9172 = vmatmul.mubr.msk.f32.vlgmr.msra.gmra.mxu1 %vm378_vm3, %v7230_v53 }
0x43d6   :  { %v9166_v37 = vpop.f32.mrf.mxu1 }
0x43d8   :  { %v7218_v26 = vpop.f32.mrf.mxu1 }
0x43de   :  { %v9173_v23 = vpop.f32.mrf.mxu1 }
0x43df   :  { %v7315_v16 = vadd.f32 %v9173_v23, %v9687_v30  ;;  %v7598_v23 = vld [vmem:[#allocation6 + $0x2e0] sm:$0xff] }
0x43e0   :  { %v7309_v34 = vpop.f32.mrf.mxu1 }
0x43e1   :  { %v7310_v28 = vadd.f32 %v7309_v34, %v9682_v29  ;;  %v7321_v35 = vsel %vm462_vm8, %v7315_v16, -inf  ;;  %v7699_v34 = vld [vmem:[#allocation6 + $0x330] sm:$0xff] }
0x43e2   :  { %7322 = vmax.xlane.f32.xlu1 %v7321_v35  ;;  %v7697_v35 = vld [vmem:[#allocation6 + $0x320] sm:$0xff] }
0x43e3   :  { %v7318_v44 = vsel %vm462_vm8, %v7310_v28, -inf }
0x43e4   :  { %7319 = vmax.xlane.f32.xlu0 %v7318_v44 }
0x43f3   :  { %7342 = vrot.lane.b32.xlu1 %v10585_v36, %s9570_s28 }
0x43f7   :  { %7429 = vrot.lane.b32.xlu1 %v10682_v57, %s9559_s27 }
0x43fb   :  { %7431 = vrot.lane.b32.xlu1 %v10680_v49, %s9559_s27 }
0x43ff   :  { %7439 = vrot.lane.b32.xlu1 %v9166_v37, %s9573_s7  ;;  %v7600_v37 = vld [vmem:[#allocation6 + $0x2f0] sm:$0xff] }
0x446b   :  { %v7323_v30 = vpop.xlane.xlu1 %7322 }
0x446c   :  { %v7325_v63 = vsub.f32 %v7315_v16, %v7323_v30  ;;  %v7700_v16 = vld [vmem:[#allocation6 + $0x338] sm:$0xff] }
0x446d   :  { %v7320_v29 = vpop.xlane.xlu0 %7319 }
0x446e   :  { %v7328_v46 = vmul.f32 1.442695, %v7325_v63  ;;  %v7324_v33 = vsub.f32 %v7310_v28, %v7320_v29  ;;  %v7698_v28 = vld [vmem:[#allocation6 + $0x328] sm:$0xff] }
0x446f   :  { %v7343_v47 = vpop.permute.xlu1 %7342 }
0x4470   :  { %9472 = vpow2.f32 %v7328_v46  ;;  %v7326_v4 = vmul.f32 1.442695, %v7324_v33  ;;  %9174 = vmatprep.subr.mxu0 %v7343_v47 }
0x4471   :  { %9175 = vmatpush3.msra.mxu0 %v7343_v47 }
0x4472   :  { %9474 = vpow2.f32 %v7326_v4  ;;  %v8232_v4 = vld [vmem:[%s10797_s5 + $0x28] ss:$0 sm:$0xff] }
0x4473   :  { %v7430_v8 = vpop.permute.xlu1 %7429 }
0x4474   :  { %v7451_v10 = vsel %vm378_vm3, %v10678_v24, %v7430_v8  ;;  %v8227_v24 = vld [vmem:[%s10797_s5 + $0x23] ss:$0 sm:$0xff] }
0x4477   :  { %v7432_v9 = vpop.permute.xlu1 %7431 }
0x4478   :  { %v7452_v50 = vsel %vm378_vm3, %v10676_v5, %v7432_v9 }
0x447b   :  { %v7440_v56 = vpop.permute.xlu1 %7439 }
0x447c   :  { %v7454_v12 = vsel %vm462_vm8, %v7452_v50, %v7440_v56  ;;  %v8239_v56 = vld [vmem:[%s10797_s5 + $0x25] ss:$0 sm:$0xff] }
0x447d   :  { %v9473_v36 = vpop.eup %9472 }
0x447e   :  { %v7333_v54 = vsel %vm462_vm8, %v9473_v36, 0.0 }
0x447f   :  { %v9475_v55 = vpop.eup %9474  ;;  %7334 = vadd.xlane.f32.xlu0 %v7333_v54  ;;  %v8233_v54 = vld [vmem:[%s10797_s5 + $0x29] ss:$0 sm:$0xff] }
0x4480   :  { %v7330_v32 = vsel %vm462_vm8, %v9475_v55, 0.0 }
0x4483   :  { %7331 = vadd.xlane.f32.xlu0 %v7330_v32 }
0x4499   :  { %7340 = vrot.lane.b32.xlu0 %v10593_v42, %s9570_s28  ;;  %v7458_v42 = vld [vmem:[#allocation6 + $0x2c8] sm:$0xff] }
0x449d   :  { %7437 = vrot.lane.b32.xlu0 %v7218_v26, %s9573_s7  ;;  %v7599_v26 = vld [vmem:[#allocation6 + $0x2e8] sm:$0xff] }
0x4508   :  { %v7335_v62 = vpop.xlane.xlu0 %7334 }
0x4509   :  { %9476 = vrcp.f32 %v7335_v62 }
0x450c   :  { %v7332_v59 = vpop.xlane.xlu0 %7331 }
0x450d   :  { %9478 = vrcp.f32 %v7332_v59 }
0x4510   :  { %v7341_v45 = vpop.permute.xlu0 %7340 }
0x4511   :  { %9176 = vmatprep.subr.mxu0 %v7341_v45 }
0x4512   :  { %9177 = vmatpush3.msra.mxu0 %v7341_v45 }
0x4513   :  { %9181 = vmatprep.subr.mxu0 %v7460_v3 }
0x4514   :  { %v7438_v51 = vpop.permute.xlu0 %7437 }
0x4515   :  { %v7453_v58 = vsel %vm462_vm8, %v7451_v10, %v7438_v51 }
0x4516   :  { %v9477_v43 = vpop.eup %9476 }
0x4517   :  { %v7339_v60 = vmul.f32 %v9477_v43, %v9473_v36 }
0x451a   :  { %v9479_v0 = vpop.eup %9478 }
0x451b   :  { %v7337_v22 = vmul.f32 %v9479_v0, %v9475_v55  ;;  %v7696_v0 = vld [vmem:[#allocation6 + $0x318] sm:$0xff] }
0x451d   :  { %9178 = vmatprep.mubr.msk.f32.mxu0 %vm462_vm8, %v7337_v22  ;;  %v7695_v22 = vld [vmem:[#allocation6 + $0x310] sm:$0xff] }
0x451e   :  { %9179 = vmatmul.mubr.msk.f32.vlgmr.msra.gmra.mxu0 %vm462_vm8, %v7339_v60  ;;  %v7694_v60 = vld [vmem:[#allocation6 + $0x308] sm:$0xff] }
0x451f   :  { %9182 = vmatpush3.msra.mxu0 %v7460_v3  ;;  %v7693_v3 = vld [vmem:[#allocation6 + $0x300] sm:$0xff] }
0x4520   :  { %9183 = vmatprep.subr.mxu0 %v7459_v39 }
0x4521   :  { %9184 = vmatpush3.msra.mxu0 %v7459_v39  ;;  %v8235_v39 = vld [vmem:[%s10797_s5 + $0x24] ss:$0 sm:$0xff] }
0x4522   :  { %9185 = vmatprep.subr.mxu0 %v7458_v42 }
0x4523   :  { %9186 = vmatpush3.msra.mxu0 %v7458_v42 }
0x4524   :  { %9187 = vmatprep.subr.mxu0 %v7457_v25 }
0x4525   :  { %9188 = vmatpush3.msra.mxu0 %v7457_v25 }
0x4526   :  { %9203 = vmatprep.subr.mxu0 %v7700_v16 }
0x45de   :  { %v9180_v49 = vpop.f32.mrf.mxu0 }
0x45df   :  { %7447 = vrot.lane.b32.xlu1 %v9180_v49, %s9574_s8 }
0x45e0   :  { %v7418_v57 = vpop.f32.mrf.mxu0 }
0x45e1   :  { %7445 = vrot.lane.b32.xlu0 %v7418_v57, %s9574_s8 }
0x4651   :  { %v7448_v13 = vpop.permute.xlu1 %7447 }
0x4652   :  { %v7456_v48 = vsel %vm1200_vm9, %v7454_v12, %v7448_v13 }
0x4653   :  { %v7446_v61 = vpop.permute.xlu0 %7445 }
0x4654   :  { %v7455_v14 = vsel %vm1200_vm9, %v7453_v58, %v7446_v61 }
0x4655   :  { %9189 = vmatprep.mubr.msk.f32.mxu0 %vm290_vm2, %v7455_v14 }
0x4656   :  { %9190 = vmatmul.mubr.msk.f32.vlgmr.msra.gmra.mxu0 %vm290_vm2, %v7456_v48 }
0x4657   :  { %9204 = vmatpush3.msra.mxu0 %v7700_v16 }
0x4658   :  { %9205 = vmatprep.subr.mxu0 %v7699_v34 }
0x4659   :  { %9206 = vmatpush3.msra.mxu0 %v7699_v34 }
0x465a   :  { %9207 = vmatprep.subr.mxu0 %v7698_v28 }
0x465b   :  { %9208 = vmatpush3.msra.mxu0 %v7698_v28 }
0x465c   :  { %9209 = vmatprep.subr.mxu0 %v7697_v35 }
0x465d   :  { %9210 = vmatpush3.msra.mxu0 %v7697_v35 }
0x465e   :  { %9211 = vmatprep.subr.mxu0 %v7696_v0 }
0x465f   :  { %9212 = vmatpush3.msra.mxu0 %v7696_v0 }
0x4660   :  { %9213 = vmatprep.subr.mxu0 %v7695_v22 }
0x4661   :  { %9214 = vmatpush3.msra.mxu0 %v7695_v22 }
0x4662   :  { %9215 = vmatprep.subr.mxu0 %v7694_v60 }
0x4663   :  { %9216 = vmatpush3.msra.mxu0 %v7694_v60 }
0x4664   :  { %9217 = vmatprep.subr.mxu0 %v7693_v3 }
0x4665   :  { %9218 = vmatpush3.msra.mxu0 %v7693_v3 }
0x4716   :  { %v9191_v27 = vpop.f32.mrf.mxu0 }
0x4717   :  { %v7547_v15 = vadd.f32 %v9191_v27, %v8227_v24 }
0x4718   :  { %v7541_v5 = vpop.f32.mrf.mxu0 }
0x4719   :  { %v7551_v18 = vadd.f32 %v7547_v15, %v10607_v2  ;;  %v7542_v11 = vadd.f32 %v8227_v24, %v7541_v5 }
0x471b   :  { %v7550_v20 = vadd.f32 %v7542_v11, %v10603_v1  ;;  %v7559_v7 = vsel %vm290_vm2, %v7551_v18, 0.0  ;;  %v7601_v1 = vld [vmem:[#allocation6 + $0x2f8] sm:$0xff] }
0x471c   :  { %7560 = vadd.xlane.f32.xlu1 %v7559_v7  ;;  %9192 = vmatprep.subr.mxu1 %v7601_v1 }
0x471d   :  { %v7556_v41 = vsel %vm290_vm2, %v7550_v20, 0.0  ;;  %9193 = vmatpush3.msra.mxu1 %v7601_v1  ;;  %v8245_v1 = vld [vmem:[%s10797_s5 + $0x2b] ss:$0 sm:$0xff] }
0x471e   :  { %7557 = vadd.xlane.f32.xlu0 %v7556_v41  ;;  %9194 = vmatprep.subr.mxu1 %v7600_v37 }
0x471f   :  { %9195 = vmatpush3.msra.mxu1 %v7600_v37 }
0x4720   :  { %9196 = vmatprep.subr.mxu1 %v7599_v26 }
0x4721   :  { %9197 = vmatpush3.msra.mxu1 %v7599_v26 }
0x4722   :  { %9198 = vmatprep.subr.mxu1 %v7598_v23 }
0x4723   :  { %9199 = vmatpush3.msra.mxu1 %v7598_v23 }
0x47a5   :  { %v7561_v21 = vpop.xlane.xlu1 %7560 }
0x47a6   :  { %v7563_v17 = vmul.f32 0.03125, %v7561_v21 }
0x47a7   :  { %v7558_v31 = vpop.xlane.xlu0 %7557 }
0x47a8   :  { %v7562_v19 = vmul.f32 0.03125, %v7558_v31  ;;  %v7565_v40 = vsub.f32 %v7551_v18, %v7563_v17 }
0x47aa   :  { %v7564_v38 = vsub.f32 %v7550_v20, %v7562_v19  ;;  %v7567_v53 = vmul.f32 %v7565_v40, %v7565_v40 }
0x47ac   :  { %v7566_v52 = vmul.f32 %v7564_v38, %v7564_v38  ;;  %v7571_v2 = vsel %vm290_vm2, %v7567_v53, 0.0 }
0x47ae   :  { %v7568_v6 = vsel %vm290_vm2, %v7566_v52, 0.0 }
0x47af   :  { %7569 = vadd.xlane.f32.xlu0 %v7568_v6  ;;  %v8244_v6 = vld [vmem:[%s10797_s5 + $0x2a] ss:$0 sm:$0xff] }
0x47b3   :  { %7572 = vadd.xlane.f32.xlu0 %v7571_v2 }
0x4838   :  { %v7570_v44 = vpop.xlane.xlu0 %7569 }
0x4839   :  { %v7574_v30 = vmul.f32 0.03125, %v7570_v44 }
0x483b   :  { %v7576_v63 = vadd.f32 1e-05, %v7574_v30 }
0x483c   :  { %v7573_v29 = vpop.xlane.xlu0 %7572 }
0x483d   :  { %9480 = vrsqrt.f32 %v7576_v63  ;;  %v7575_v46 = vmul.f32 0.03125, %v7573_v29 }
0x483f   :  { %v7577_v33 = vadd.f32 1e-05, %v7575_v46 }
0x4841   :  { %9482 = vrsqrt.f32 %v7577_v33 }
0x484a   :  { %v9481_v47 = vpop.eup %9480 }
0x484b   :  { %v7580_v36 = vmul.f32 %v9481_v47, %v7564_v38 }
0x484d   :  { %v7588_v55 = vmul.f32 %v8232_v4, %v7580_v36 }
0x484e   :  { %v9483_v32 = vpop.eup %9482 }
0x484f   :  { %v7581_v62 = vmul.f32 %v9483_v32, %v7565_v40  ;;  %v7596_v59 = vadd.f32 %v8233_v54, %v7588_v55  ;;  %v7867_v55 = vld [vmem:[#allocation6 + $0x358] sm:$0xff]  ;;  %v7866_v32 = vld [vmem:[#allocation6 + $0x350] sm:$0xff] }
0x4850   :  { %9222 = vmatprep.subr.mxu1 %v7867_v55 }
0x4851   :  { %v7589_v45 = vmul.f32 %v8232_v4, %v7581_v62  ;;  %9200 = vmatprep.mubr.msk.f32.mxu1 %vm290_vm2, %v7596_v59  ;;  %v7865_v62 = vld [vmem:[#allocation6 + $0x348] sm:$0xff] }
0x4853   :  { %v7597_v43 = vadd.f32 %v8233_v54, %v7589_v45 }
0x4855   :  { %9201 = vmatmul.mubr.msk.f32.vlgmr.msra.gmra.mxu1 %vm290_vm2, %v7597_v43 }
0x4856   :  { %9223 = vmatpush3.msra.mxu1 %v7867_v55 }
0x4857   :  { %9224 = vmatprep.subr.mxu1 %v7866_v32 }
0x4858   :  { %9225 = vmatpush3.msra.mxu1 %v7866_v32 }
0x4859   :  { %9226 = vmatprep.subr.mxu1 %v7865_v62 }
0x485a   :  { %9227 = vmatpush3.msra.mxu1 %v7865_v62 }
0x4915   :  { %v9202_v42 = vpop.f32.mrf.mxu1 }
0x4916   :  { %v7688_v25 = vadd.f32 %v9202_v42, %v8235_v39 }
0x4917   :  { %v7682_v49 = vpop.f32.mrf.mxu1 }
0x4918   :  { %v7683_v57 = vadd.f32 %v8235_v39, %v7682_v49  ;;  %v7692_v9 = vmax.f32 %v7688_v25, 0.0 }
0x491a   :  { %v7691_v8 = vmax.f32 %v7683_v57, 0.0  ;;  %v8247_v57 = vld [vmem:[%s10797_s5 + $0x2c] ss:$0 sm:$0xff] }
0x491c   :  { %9219 = vmatprep.mubr.msk.f32.mxu0 %vm1456_vm10, %v7691_v8 }
0x491d   :  { %9220 = vmatmul.mubr.msk.f32.vlgmr.msra.gmra.mxu0 %vm1456_vm10, %v7692_v9 }
0x49dd   :  { %v9221_v51 = vpop.f32.mrf.mxu0 }
0x49de   :  { %v7787_v10 = vadd.f32 %v9221_v51, %v8239_v56 }
0x49df   :  { %v7781_v13 = vpop.f32.mrf.mxu0 }
0x49e0   :  { %v7791_v50 = vadd.f32 %v7787_v10, %v7597_v43  ;;  %v7782_v58 = vadd.f32 %v8239_v56, %v7781_v13 }
0x49e2   :  { %v7790_v61 = vadd.f32 %v7782_v58, %v7596_v59  ;;  %v7799_v12 = vsel %vm290_vm2, %v7791_v50, 0.0  ;;  %v7864_v59 = vld [vmem:[#allocation6 + $0x340] sm:$0xff] }
0x49e3   :  { %7800 = vadd.xlane.f32.xlu0 %v7799_v12  ;;  %9228 = vmatprep.subr.mxu1 %v7864_v59 }
0x49e4   :  { %v7796_v14 = vsel %vm290_vm2, %v7790_v61, 0.0  ;;  %9229 = vmatpush3.msra.mxu1 %v7864_v59 }
0x49e5   :  { %7797 = vadd.xlane.f32.xlu1 %v7796_v14 }
0x4a6c   :  { %v7801_v48 = vpop.xlane.xlu0 %7800 }
0x4a6d   :  { %v7803_v24 = vmul.f32 0.03125, %v7801_v48 }
0x4a6e   :  { %v7798_v27 = vpop.xlane.xlu1 %7797 }
0x4a6f   :  { %v7805_v15 = vsub.f32 %v7791_v50, %v7803_v24  ;;  %v7802_v5 = vmul.f32 0.03125, %v7798_v27 }
0x4a71   :  { %v7804_v18 = vsub.f32 %v7790_v61, %v7802_v5  ;;  %v7807_v11 = vmul.f32 %v7805_v15, %v7805_v15 }
0x4a73   :  { %v7811_v20 = vsel %vm290_vm2, %v7807_v11, 0.0  ;;  %v7806_v7 = vmul.f32 %v7804_v18, %v7804_v18 }
0x4a74   :  { %7812 = vadd.xlane.f32.xlu0 %v7811_v20 }
0x4a75   :  { %v7808_v41 = vsel %vm290_vm2, %v7806_v7, 0.0 }
0x4a76   :  { %7809 = vadd.xlane.f32.xlu1 %v7808_v41 }
0x4afd   :  { %v7813_v21 = vpop.xlane.xlu0 %7812 }
0x4afe   :  { %v7815_v17 = vmul.f32 0.03125, %v7813_v21 }
0x4aff   :  { %v7810_v31 = vpop.xlane.xlu1 %7809 }
0x4b00   :  { %v7817_v19 = vadd.f32 1e-05, %v7815_v17  ;;  %v7814_v40 = vmul.f32 0.03125, %v7810_v31 }
0x4b02   :  { %9484 = vrsqrt.f32 %v7817_v19  ;;  %v7816_v38 = vadd.f32 1e-05, %v7814_v40 }
0x4b04   :  { %9486 = vrsqrt.f32 %v7816_v38 }
0x4b0f   :  { %v9485_v52 = vpop.eup %9484 }
0x4b10   :  { %v7821_v53 = vmul.f32 %v9485_v52, %v7805_v15 }
0x4b11   :  { %v9487_v2 = vpop.eup %9486 }
0x4b12   :  { %v7829_v37 = vmul.f32 %v8244_v6, %v7821_v53  ;;  %v7820_v26 = vmul.f32 %v9487_v2, %v7804_v18 }
0x4b14   :  { %v7837_v23 = vadd.f32 %v8245_v1, %v7829_v37  ;;  %v7828_v16 = vmul.f32 %v8244_v6, %v7820_v26 }
0x4b16   :  { %v7841_v34 = vsel %vm290_vm2, %v7837_v23, 0.0  ;;  %v7836_v28 = vadd.f32 %v8245_v1, %v7828_v16 }
0x4b17   :  { %7842 = vadd.xlane.f32.xlu0 %v7841_v34 }
0x4b18   :  { %v7838_v35 = vsel %vm290_vm2, %v7836_v28, 0.0 }
0x4b19   :  { %7839 = vadd.xlane.f32.xlu1 %v7838_v35 }
0x4ba0   :  { %v7843_v44 = vpop.xlane.xlu0 %7842 }
0x4ba1   :  { %v7845_v30 = vmul.f32 0.03125, %v7843_v44 }
0x4ba2   :  { %v7840_v63 = vpop.xlane.xlu1 %7839 }
0x4ba3   :  { %v7847_v29 = vsub.f32 %v7837_v23, %v7845_v30  ;;  %v7844_v46 = vmul.f32 0.03125, %v7840_v63 }
0x4ba5   :  { %v7846_v33 = vsub.f32 %v7836_v28, %v7844_v46  ;;  %v7849_v47 = vmul.f32 %v7847_v29, %v7847_v29 }
0x4ba7   :  { %v7853_v4 = vsel %vm290_vm2, %v7849_v47, 0.0  ;;  %v7848_v36 = vmul.f32 %v7846_v33, %v7846_v33 }
0x4ba8   :  { %7854 = vadd.xlane.f32.xlu0 %v7853_v4 }
0x4ba9   :  { %v7850_v54 = vsel %vm290_vm2, %v7848_v36, 0.0 }
0x4baa   :  { %7851 = vadd.xlane.f32.xlu1 %v7850_v54 }
0x4c31   :  { %v7855_v45 = vpop.xlane.xlu0 %7854 }
0x4c32   :  { %v7857_v43 = vmul.f32 0.03125, %v7855_v45 }
0x4c33   :  { %v7852_v0 = vpop.xlane.xlu1 %7851 }
0x4c34   :  { %v7859_v22 = vadd.f32 1e-05, %v7857_v43  ;;  %v7856_v60 = vmul.f32 0.03125, %v7852_v0 }
0x4c36   :  { %v7858_v3 = vadd.f32 1e-05, %v7856_v60  ;;  %9488 = vrsqrt.f32 %v7859_v22 }
0x4c38   :  { %9490 = vrsqrt.f32 %v7858_v3 }
0x4c43   :  { %v9489_v39 = vpop.eup %9488 }
0x4c44   :  { %v7863_v49 = vmul.f32 %v9489_v39, %v7847_v29 }
0x4c45   :  { %v9491_v42 = vpop.eup %9490 }
0x4c46   :  { %v7862_v25 = vmul.f32 %v9491_v42, %v7846_v33 }
0x4c48   :  { %9230 = vmatprep.mubr.msk.f32.mxu1 %vm290_vm2, %v7862_v25 }
0x4c49   :  { %9231 = vmatmul.mubr.msk.f32.vlgmr.msra.gmra.mxu1 %vm290_vm2, %v7863_v49 }
0x4d09   :  { %v9232_v8 = vpop.f32.mrf.mxu1 }
0x4d0a   :  { %v7954_v9 = vadd.f32 %v9232_v8, %v8247_v57 }
0x4d0b   :  { %v7948_v56 = vpop.f32.mrf.mxu1 }
0x4d0c   :  { %7958 = vst.msk [vmem:[%s10798_s6 + $0x8] sm:$0xff] %vm108_vm1, %v7954_v9  ;;  %v7949_v51 = vadd.f32 %v8247_v57, %v7948_v56 }
0x4d0e   :  { %7957 = vst.msk [vmem:[%s10798_s6] sm:$0xff] %vm108_vm1, %v7949_v51 }
0x4d0f   :  { %7963 = vsyncpa [#allocation3], 1 }
0x4d10   :  { %7964 = vsyncpa [#allocation5], 1 }

</bundles_post_ra>
